<compile_context>
chip_gen: v7x
topology: tpu7x:2x2x1
jax: 0.10.0
libtpu: 0.0.40
codegen_flags: <defaults>
</compile_context>

<pallas_src>
import functools

import jax
import jax.numpy as jnp
from jax import lax
from jax.experimental import pallas as pl
from jax.experimental.pallas import tpu as pltpu


NUM_UNITS = 13   # GF0 + 4 Gated_blocks x 3 Gated_fusion units each


def _c_list(n):
    # Conv in-channel count per Gated_fusion unit, in Sequential order:
    # GF0 | GB1(first): b1,b2,b3 | GB2: b1(2n),b2,b3 | GB3 | GB4(classify)
    return [n, n, n, n, 2 * n, n, n, 2 * n, n, n, 2 * n, n, n]


def _tree_sum(terms):
    """Pairwise-tree sum to shorten the serial VALU dependency chain."""
    while len(terms) > 1:
        nxt = [terms[j] + terms[j + 1] for j in range(0, len(terms) - 1, 2)]
        if len(terms) % 2:
            nxt.append(terms[-1])
        terms = nxt
    return terms[0]


# ----------------------------------------------------------------------------
# Fused Pallas kernel
# ----------------------------------------------------------------------------
def _fused_kernel(xs_ref, meta_ref, wx_ref, wm_ref, convw_ref, lin_ref,
                  clsw_ref, clsb_ref, out_ref, *, n, embed_dims, c_list):
    E = embed_dims
    cdims = (((1,), (0,)), ((), ()))           # canonical (M,K) @ (K,N)

    # ---- fused projection prologue: feat_i = tanh(x_i @ Wx_i + meta @ Wm_i) ----
    # TODO(synk): projection_module is user-supplied in the reference
    # (proj_module[i](x[i], metadata)); modeled here as tanh(x@Wx + m@Wm).
    meta = meta_ref[...]                        # (B, d_meta) f32
    x_full, x_head = [], []
    for i in range(n):
        f = lax.dot_general(xs_ref[i], wx_ref[i], cdims,
                            preferred_element_type=jnp.float32)
        f = f + lax.dot_general(meta, wm_ref[i], cdims,
                                preferred_element_type=jnp.float32)
        f = jnp.tanh(f)                         # (B, E) f32
        x_full.append(f)
        x_head.append(f[0:n, :])                # (n, E): the only rows gates read

    def gf_unit(y, prev, gcum, u):
        """One Gated_fusion unit on the (n, E) working set.

        y    : list of n (n, E) current gated rows (rows 0..n-1 of cur_i)
        prev : list of n (n, E) or None; concat channel order [prev..., cur...]
        gcum : list of n (1, E) cumulative gate products (or None before unit 0)
        """
        srcs = y if prev is None else (prev + y)
        assert len(srcs) == c_list[u]
        wcol = convw_ref[u]                     # (n, cmax) f32, padded cols unused
        # Conv1d(k=1, C->1, no bias): per-row weighted channel sum, vectorized
        # over modalities via (n,1) column broadcast; tree-reassociated adds.
        v = _tree_sum([wcol[:, c:c + 1] * srcs[c] for c in range(len(srcs))])
        # All n gate Linears in ONE MXU call: (n,E) @ (E, n*E), f32 accumulate.
        g_all = lax.dot_general(v, lin_ref[u], cdims,
                                preferred_element_type=jnp.float32)  # (n, n*E)
        new_y, new_g = [], []
        for i in range(n):
            gi = jax.nn.sigmoid(g_all[i:i + 1, i * E:(i + 1) * E])   # (1, E)
            new_y.append(y[i] * gi)
            new_g.append(gi if gcum is None else gcum[i] * gi)
        return new_y, new_g

    # ---- 13-unit gated chain (all on the (n, E) working set) ----
    a, gcum = gf_unit(x_head, None, None, 0)        # gated_fusion[0]
    cur, gcum = gf_unit(a, None, gcum, 1)           # GB1.block1 (skip, first=True)
    cur, gcum = gf_unit(cur, None, gcum, 2)         # GB1.block2
    cur, gcum = gf_unit(cur, None, gcum, 3)         # GB1.block3
    prev = a
    u = 4
    for _ in range(2):                              # GB2, GB3 (skip, first=False)
        c1, gcum = gf_unit(cur, prev, gcum, u)
        c2, gcum = gf_unit(c1, None, gcum, u + 1)
        c3, gcum = gf_unit(c2, None, gcum, u + 2)
        prev, cur = cur, c3
        u += 3
    e, gcum = gf_unit(cur, prev, gcum, 10)          # GB4 (will_classify=True)
    e, gcum = gf_unit(e, None, gcum, 11)
    _, gcum = gf_unit(e, None, gcum, 12)

    # ---- apply cumulative gates ONCE to the full batch, modal sum, classifier ----
    feat = _tree_sum([x_full[i] * gcum[i] for i in range(n)])        # (B, E) f32
    logits = lax.dot_general(feat, clsw_ref[...], cdims,
                             preferred_element_type=jnp.float32)     # (B, num_class)
    out_ref[...] = jax.nn.sigmoid(logits + clsb_ref[...]).astype(out_ref.dtype)


def second_edition_pallas(xs_stacked, metadata, packed):
    """Single fused pallas_call: projection + 13-unit gated stack + classifier."""
    n, B, _ = xs_stacked.shape
    E = packed["wx"].shape[-1]
    num_class = packed["cls_w_t"].shape[-1]
    assert B >= n, ("reference module gates modality i with batch row i of the "
                    "channel concat; it requires batch >= num_modal")
    vmem = functools.partial(pl.BlockSpec, memory_space=pltpu.MemorySpace.VMEM)
    kernel = functools.partial(_fused_kernel, n=n, embed_dims=E, c_list=_c_list(n))
    args = (xs_stacked, metadata, packed["wx"], packed["wm"], packed["convw"],
            packed["lin_t"], packed["cls_w_t"], packed["cls_b"])
    param_bytes = sum(int(a.size) * a.dtype.itemsize for a in args)
    vmem_limit = int(min(64 * 2**20, max(32 * 2**20, 4 * param_bytes)))
    return pl.pallas_call(
        kernel,
        out_shape=jax.ShapeDtypeStruct((B, num_class), jnp.float32),
        in_specs=[vmem()] * len(args),
        out_specs=vmem(),
        compiler_params=pltpu.CompilerParams(vmem_limit_bytes=vmem_limit),
    )(*args)


# ----------------------------------------------------------------------------
# Parameters: PyTorch-like per-unit init, then one-time repack into the fused
# kernel layout (pre-transposed (K,N) gate weights concatenated per unit).
# ----------------------------------------------------------------------------
def init_params(key, num_branch, embed_dims, num_class, d_in, d_meta):
    n = num_branch
    keys = iter(jax.random.split(key, 2 * n + 2 * NUM_UNITS + 1))
    proj = [{"wx": 0.1 * jax.random.normal(next(keys), (d_in, embed_dims), jnp.float32),
             "wm": 0.1 * jax.random.normal(next(keys), (d_meta, embed_dims), jnp.float32)}
            for _ in range(n)]
    gf = [{"conv": 0.5 * jax.random.normal(next(keys), (n, C, 1), jnp.float32),
           "lin": (1.0 / jnp.sqrt(embed_dims))
                  * jax.random.normal(next(keys), (n, embed_dims, embed_dims), jnp.float32)}
          for C in _c_list(n)]
    cls_w = (1.0 / jnp.sqrt(embed_dims)) * jax.random.normal(
        next(keys), (num_class, embed_dims), jnp.float32)
    cls_b = jnp.zeros((num_class,), jnp.float32)
    return {"proj": proj, "gf": gf, "cls_w": cls_w, "cls_b": cls_b}


def pack_params(params, num_branch, embed_dims):
    """One-time repack of per-unit weights into the fused-kernel layout."""
    n, E = num_branch, embed_dims
    cmax = 2 * n
    c_list = _c_list(n)
    convw = jnp.zeros((NUM_UNITS, n, cmax), jnp.float32)
    for u, p in enumerate(params["gf"]):
        convw = convw.at[u, :, :c_list[u]].set(p["conv"][..., 0])
    # Gate Linear weights: PyTorch (out,in) -> pre-transposed (in,out), then
    # concatenated across modalities along N: lin_t[u][:, i*E:(i+1)*E] = W_{u,i}.T
    lin = jnp.stack([p["lin"] for p in params["gf"]], axis=0)       # (13, n, Eo, Ei)
    lin_t = jnp.transpose(lin, (0, 3, 1, 2)).reshape(NUM_UNITS, E, n * E)
    wx = jnp.stack([p["wx"] for p in params["proj"]], axis=0)       # (n, d_in, E)
    wm = jnp.stack([p["wm"] for p in params["proj"]], axis=0)       # (n, d_meta, E)
    num_class = params["cls_w"].shape[0]
    return {
        "wx": wx.astype(jnp.float32),
        "wm": wm.astype(jnp.float32),
        "convw": convw,                                             # (13, n, 2n) f32
        "lin_t": lin_t.astype(jnp.float32),                         # (13, E, n*E) f32
        "cls_w_t": params["cls_w"].T.astype(jnp.float32),           # (E, num_class)
        "cls_b": params["cls_b"].reshape(1, num_class).astype(jnp.float32),
    }


def second_edition_forward(packed, xs, metadata):
    X = jnp.stack(xs, axis=0)                                       # (n, B, d_in)
    return second_edition_pallas(X, metadata, packed)


# ----------------------------------------------------------------------------
# Pure-JAX reference (mirrors the PyTorch module) for a sanity check.
# ----------------------------------------------------------------------------
def reference_forward(params, xs, metadata):
    n = len(xs)
    feats = [jnp.tanh(xs[i] @ params["proj"][i]["wx"] + metadata @ params["proj"][i]["wm"])
             for i in range(n)]

    def gf(cur, prev, p):
        srcs = cur if prev is None else (prev + cur)
        convw = p["conv"][..., 0]                                   # (n, C)
        out = []
        for i in range(n):
            v = jnp.zeros_like(cur[0][0:1, :])
            for c in range(len(srcs)):
                v = v + convw[i, c] * srcs[c][i:i + 1, :]
            g = jax.nn.sigmoid(v @ p["lin"][i].T)
            out.append(cur[i] * g)
        return out

    gfp = params["gf"]
    a = gf(feats, None, gfp[0])
    cur = gf(a, None, gfp[1]); cur = gf(cur, None, gfp[2]); cur = gf(cur, None, gfp[3])
    prev, u = a, 4
    for _ in range(2):
        c1 = gf(cur, prev, gfp[u]); c2 = gf(c1, None, gfp[u + 1]); c3 = gf(c2, None, gfp[u + 2])
        prev, cur = cur, c3
        u += 3
    e = gf(cur, prev, gfp[10]); e = gf(e, None, gfp[11]); e = gf(e, None, gfp[12])
    feat = sum(e[1:], e[0])
    return jax.nn.sigmoid(feat @ params["cls_w"].T + params["cls_b"])


# ----------------------------------------------------------------------------
if __name__ == "__main__":
    num_branch = 3
    B = 4              # must satisfy B >= num_branch (conv_weights[i] batch-indexing quirk)
    E = 128            # embed_dims
    num_class = 5
    d_in, d_meta = 16, 8

    key = jax.random.PRNGKey(0)
    kp, kx, km = jax.random.split(key, 3)
    params = init_params(kp, num_branch, E, num_class, d_in, d_meta)
    packed = pack_params(params, num_branch, E)

    xkeys = jax.random.split(kx, num_branch)
    xs = [jax.random.normal(xkeys[i], (B, d_in), jnp.float32) for i in range(num_branch)]
    metadata = jax.random.normal(km, (B, d_meta), jnp.float32)

    out = jax.jit(second_edition_forward)(packed, xs, metadata)
    out = jax.block_until_ready(out)
    assert out.shape == (B, num_class), out.shape
    assert bool(jnp.all(jnp.isfinite(out)))

    ref = reference_forward(params, xs, metadata)
    assert bool(jnp.allclose(out, ref, rtol=5e-2, atol=5e-2)), (out, ref)

    print("KERNEL_OK")
</pallas_src>

<mosaic_0001>
module attributes {stable_mosaic.version = 11 : i64} {
  func.func @_fused_kernel(%arg0: memref<3x4x16xf32, #tpu.memory_space<vmem>>, %arg1: memref<4x8xf32, #tpu.memory_space<vmem>>, %arg2: memref<3x16x128xf32, #tpu.memory_space<vmem>>, %arg3: memref<3x8x128xf32, #tpu.memory_space<vmem>>, %arg4: memref<13x3x6xf32, #tpu.memory_space<vmem>>, %arg5: memref<13x128x384xf32, #tpu.memory_space<vmem>>, %arg6: memref<128x5xf32, #tpu.memory_space<vmem>>, %arg7: memref<1x5xf32, #tpu.memory_space<vmem>>, %arg8: memref<4x5xf32, #tpu.memory_space<vmem>>) attributes {dimension_semantics = [], scalar_prefetch = 0 : i64, scratch_operands = 0 : i64, tpu.core_type = #tpu.core_type<tc>} {
    %c0 = arith.constant 0 : index
    %c0_0 = arith.constant 0 : index
    %0 = vector.load %arg1[%c0, %c0_0] : memref<4x8xf32, #tpu.memory_space<vmem>>, vector<4x8xf32>
    %c0_1 = arith.constant 0 : index
    %c0_2 = arith.constant 0 : index
    %c0_3 = arith.constant 0 : index
    %1 = vector.load %arg0[%c0_1, %c0_2, %c0_3] : memref<3x4x16xf32, #tpu.memory_space<vmem>>, vector<1x4x16xf32>
    %2 = vector.shape_cast %1 : vector<1x4x16xf32> to vector<4x16xf32>
    %c0_4 = arith.constant 0 : index
    %c0_5 = arith.constant 0 : index
    %c0_6 = arith.constant 0 : index
    %3 = vector.load %arg2[%c0_4, %c0_5, %c0_6] : memref<3x16x128xf32, #tpu.memory_space<vmem>>, vector<1x16x128xf32>
    %4 = vector.shape_cast %3 : vector<1x16x128xf32> to vector<16x128xf32>
    %cst = arith.constant dense<0.000000e+00> : vector<4x128xf32>
    %5 = tpu.matmul %2, %4, %cst {dimension_numbers = #tpu.dot_dimension_numbers<[1], [0], [0], [1], [0, 0, 1, 1], [], []>} : vector<4x16xf32>, vector<16x128xf32>, vector<4x128xf32> -> vector<4x128xf32>
    %c0_7 = arith.constant 0 : index
    %c0_8 = arith.constant 0 : index
    %c0_9 = arith.constant 0 : index
    %6 = vector.load %arg3[%c0_7, %c0_8, %c0_9] : memref<3x8x128xf32, #tpu.memory_space<vmem>>, vector<1x8x128xf32>
    %7 = vector.shape_cast %6 : vector<1x8x128xf32> to vector<8x128xf32>
    %cst_10 = arith.constant dense<0.000000e+00> : vector<4x128xf32>
    %8 = tpu.matmul %0, %7, %cst_10 {dimension_numbers = #tpu.dot_dimension_numbers<[1], [0], [0], [1], [0, 0, 1, 1], [], []>} : vector<4x8xf32>, vector<8x128xf32>, vector<4x128xf32> -> vector<4x128xf32>
    %9 = arith.addf %5, %8 : vector<4x128xf32>
    %10 = math.tanh %9 : vector<4x128xf32>
    %11 = vector.extract_strided_slice %10 {offsets = [0, 0], sizes = [3, 128], strides = [1, 1]} : vector<4x128xf32> to vector<3x128xf32>
    %c1 = arith.constant 1 : index
    %c0_11 = arith.constant 0 : index
    %c0_12 = arith.constant 0 : index
    %12 = vector.load %arg0[%c1, %c0_11, %c0_12] : memref<3x4x16xf32, #tpu.memory_space<vmem>>, vector<1x4x16xf32>
    %13 = vector.shape_cast %12 : vector<1x4x16xf32> to vector<4x16xf32>
    %c1_13 = arith.constant 1 : index
    %c0_14 = arith.constant 0 : index
    %c0_15 = arith.constant 0 : index
    %14 = vector.load %arg2[%c1_13, %c0_14, %c0_15] : memref<3x16x128xf32, #tpu.memory_space<vmem>>, vector<1x16x128xf32>
    %15 = vector.shape_cast %14 : vector<1x16x128xf32> to vector<16x128xf32>
    %cst_16 = arith.constant dense<0.000000e+00> : vector<4x128xf32>
    %16 = tpu.matmul %13, %15, %cst_16 {dimension_numbers = #tpu.dot_dimension_numbers<[1], [0], [0], [1], [0, 0, 1, 1], [], []>} : vector<4x16xf32>, vector<16x128xf32>, vector<4x128xf32> -> vector<4x128xf32>
    %c1_17 = arith.constant 1 : index
    %c0_18 = arith.constant 0 : index
    %c0_19 = arith.constant 0 : index
    %17 = vector.load %arg3[%c1_17, %c0_18, %c0_19] : memref<3x8x128xf32, #tpu.memory_space<vmem>>, vector<1x8x128xf32>
    %18 = vector.shape_cast %17 : vector<1x8x128xf32> to vector<8x128xf32>
    %cst_20 = arith.constant dense<0.000000e+00> : vector<4x128xf32>
    %19 = tpu.matmul %0, %18, %cst_20 {dimension_numbers = #tpu.dot_dimension_numbers<[1], [0], [0], [1], [0, 0, 1, 1], [], []>} : vector<4x8xf32>, vector<8x128xf32>, vector<4x128xf32> -> vector<4x128xf32>
    %20 = arith.addf %16, %19 : vector<4x128xf32>
    %21 = math.tanh %20 : vector<4x128xf32>
    %22 = vector.extract_strided_slice %21 {offsets = [0, 0], sizes = [3, 128], strides = [1, 1]} : vector<4x128xf32> to vector<3x128xf32>
    %c2 = arith.constant 2 : index
    %c0_21 = arith.constant 0 : index
    %c0_22 = arith.constant 0 : index
    %23 = vector.load %arg0[%c2, %c0_21, %c0_22] : memref<3x4x16xf32, #tpu.memory_space<vmem>>, vector<1x4x16xf32>
    %24 = vector.shape_cast %23 : vector<1x4x16xf32> to vector<4x16xf32>
    %c2_23 = arith.constant 2 : index
    %c0_24 = arith.constant 0 : index
    %c0_25 = arith.constant 0 : index
    %25 = vector.load %arg2[%c2_23, %c0_24, %c0_25] : memref<3x16x128xf32, #tpu.memory_space<vmem>>, vector<1x16x128xf32>
    %26 = vector.shape_cast %25 : vector<1x16x128xf32> to vector<16x128xf32>
    %cst_26 = arith.constant dense<0.000000e+00> : vector<4x128xf32>
    %27 = tpu.matmul %24, %26, %cst_26 {dimension_numbers = #tpu.dot_dimension_numbers<[1], [0], [0], [1], [0, 0, 1, 1], [], []>} : vector<4x16xf32>, vector<16x128xf32>, vector<4x128xf32> -> vector<4x128xf32>
    %c2_27 = arith.constant 2 : index
    %c0_28 = arith.constant 0 : index
    %c0_29 = arith.constant 0 : index
    %28 = vector.load %arg3[%c2_27, %c0_28, %c0_29] : memref<3x8x128xf32, #tpu.memory_space<vmem>>, vector<1x8x128xf32>
    %29 = vector.shape_cast %28 : vector<1x8x128xf32> to vector<8x128xf32>
    %cst_30 = arith.constant dense<0.000000e+00> : vector<4x128xf32>
    %30 = tpu.matmul %0, %29, %cst_30 {dimension_numbers = #tpu.dot_dimension_numbers<[1], [0], [0], [1], [0, 0, 1, 1], [], []>} : vector<4x8xf32>, vector<8x128xf32>, vector<4x128xf32> -> vector<4x128xf32>
    %31 = arith.addf %27, %30 : vector<4x128xf32>
    %32 = math.tanh %31 : vector<4x128xf32>
    %33 = vector.extract_strided_slice %32 {offsets = [0, 0], sizes = [3, 128], strides = [1, 1]} : vector<4x128xf32> to vector<3x128xf32>
    %c0_31 = arith.constant 0 : index
    %c0_32 = arith.constant 0 : index
    %c0_33 = arith.constant 0 : index
    %34 = vector.load %arg4[%c0_31, %c0_32, %c0_33] : memref<13x3x6xf32, #tpu.memory_space<vmem>>, vector<1x3x6xf32>
    %35 = vector.shape_cast %34 : vector<1x3x6xf32> to vector<3x6xf32>
    %36 = vector.extract_strided_slice %35 {offsets = [0, 0], sizes = [3, 1], strides = [1, 1]} : vector<3x6xf32> to vector<3x1xf32>
    %37 = vector.broadcast %36 : vector<3x1xf32> to vector<3x128xf32>
    %38 = arith.mulf %37, %11 : vector<3x128xf32>
    %39 = vector.extract_strided_slice %35 {offsets = [0, 1], sizes = [3, 1], strides = [1, 1]} : vector<3x6xf32> to vector<3x1xf32>
    %40 = vector.broadcast %39 : vector<3x1xf32> to vector<3x128xf32>
    %41 = arith.mulf %40, %22 : vector<3x128xf32>
    %42 = vector.extract_strided_slice %35 {offsets = [0, 2], sizes = [3, 1], strides = [1, 1]} : vector<3x6xf32> to vector<3x1xf32>
    %43 = vector.broadcast %42 : vector<3x1xf32> to vector<3x128xf32>
    %44 = arith.mulf %43, %33 : vector<3x128xf32>
    %45 = arith.addf %38, %41 : vector<3x128xf32>
    %46 = arith.addf %45, %44 : vector<3x128xf32>
    %c0_34 = arith.constant 0 : index
    %c0_35 = arith.constant 0 : index
    %c0_36 = arith.constant 0 : index
    %47 = vector.load %arg5[%c0_34, %c0_35, %c0_36] : memref<13x128x384xf32, #tpu.memory_space<vmem>>, vector<1x128x384xf32>
    %48 = vector.shape_cast %47 : vector<1x128x384xf32> to vector<128x384xf32>
    %cst_37 = arith.constant dense<0.000000e+00> : vector<3x384xf32>
    %49 = tpu.matmul %46, %48, %cst_37 {dimension_numbers = #tpu.dot_dimension_numbers<[1], [0], [0], [1], [0, 0, 1, 1], [], []>} : vector<3x128xf32>, vector<128x384xf32>, vector<3x384xf32> -> vector<3x384xf32>
    %50 = vector.extract_strided_slice %49 {offsets = [0, 0], sizes = [1, 128], strides = [1, 1]} : vector<3x384xf32> to vector<1x128xf32>
    %51 = arith.negf %50 : vector<1x128xf32>
    %52 = math.exp %51 : vector<1x128xf32>
    %cst_38 = arith.constant 1.000000e+00 : f32
    %53 = vector.broadcast %cst_38 : f32 to vector<1x128xf32>
    %54 = arith.addf %53, %52 : vector<1x128xf32>
    %55 = arith.divf %53, %54 : vector<1x128xf32>
    %56 = vector.broadcast %55 : vector<1x128xf32> to vector<3x128xf32>
    %57 = arith.mulf %11, %56 : vector<3x128xf32>
    %58 = vector.extract_strided_slice %49 {offsets = [1, 128], sizes = [1, 128], strides = [1, 1]} : vector<3x384xf32> to vector<1x128xf32>
    %59 = arith.negf %58 : vector<1x128xf32>
    %60 = math.exp %59 : vector<1x128xf32>
    %cst_39 = arith.constant 1.000000e+00 : f32
    %61 = vector.broadcast %cst_39 : f32 to vector<1x128xf32>
    %62 = arith.addf %61, %60 : vector<1x128xf32>
    %63 = arith.divf %61, %62 : vector<1x128xf32>
    %64 = vector.broadcast %63 : vector<1x128xf32> to vector<3x128xf32>
    %65 = arith.mulf %22, %64 : vector<3x128xf32>
    %66 = vector.extract_strided_slice %49 {offsets = [2, 256], sizes = [1, 128], strides = [1, 1]} : vector<3x384xf32> to vector<1x128xf32>
    %67 = arith.negf %66 : vector<1x128xf32>
    %68 = math.exp %67 : vector<1x128xf32>
    %cst_40 = arith.constant 1.000000e+00 : f32
    %69 = vector.broadcast %cst_40 : f32 to vector<1x128xf32>
    %70 = arith.addf %69, %68 : vector<1x128xf32>
    %71 = arith.divf %69, %70 : vector<1x128xf32>
    %72 = vector.broadcast %71 : vector<1x128xf32> to vector<3x128xf32>
    %73 = arith.mulf %33, %72 : vector<3x128xf32>
    %c1_41 = arith.constant 1 : index
    %c0_42 = arith.constant 0 : index
    %c0_43 = arith.constant 0 : index
    %74 = vector.load %arg4[%c1_41, %c0_42, %c0_43] : memref<13x3x6xf32, #tpu.memory_space<vmem>>, vector<1x3x6xf32>
    %75 = vector.shape_cast %74 : vector<1x3x6xf32> to vector<3x6xf32>
    %76 = vector.extract_strided_slice %75 {offsets = [0, 0], sizes = [3, 1], strides = [1, 1]} : vector<3x6xf32> to vector<3x1xf32>
    %77 = vector.broadcast %76 : vector<3x1xf32> to vector<3x128xf32>
    %78 = arith.mulf %77, %57 : vector<3x128xf32>
    %79 = vector.extract_strided_slice %75 {offsets = [0, 1], sizes = [3, 1], strides = [1, 1]} : vector<3x6xf32> to vector<3x1xf32>
    %80 = vector.broadcast %79 : vector<3x1xf32> to vector<3x128xf32>
    %81 = arith.mulf %80, %65 : vector<3x128xf32>
    %82 = vector.extract_strided_slice %75 {offsets = [0, 2], sizes = [3, 1], strides = [1, 1]} : vector<3x6xf32> to vector<3x1xf32>
    %83 = vector.broadcast %82 : vector<3x1xf32> to vector<3x128xf32>
    %84 = arith.mulf %83, %73 : vector<3x128xf32>
    %85 = arith.addf %78, %81 : vector<3x128xf32>
    %86 = arith.addf %85, %84 : vector<3x128xf32>
    %c1_44 = arith.constant 1 : index
    %c0_45 = arith.constant 0 : index
    %c0_46 = arith.constant 0 : index
    %87 = vector.load %arg5[%c1_44, %c0_45, %c0_46] : memref<13x128x384xf32, #tpu.memory_space<vmem>>, vector<1x128x384xf32>
    %88 = vector.shape_cast %87 : vector<1x128x384xf32> to vector<128x384xf32>
    %cst_47 = arith.constant dense<0.000000e+00> : vector<3x384xf32>
    %89 = tpu.matmul %86, %88, %cst_47 {dimension_numbers = #tpu.dot_dimension_numbers<[1], [0], [0], [1], [0, 0, 1, 1], [], []>} : vector<3x128xf32>, vector<128x384xf32>, vector<3x384xf32> -> vector<3x384xf32>
    %90 = vector.extract_strided_slice %89 {offsets = [0, 0], sizes = [1, 128], strides = [1, 1]} : vector<3x384xf32> to vector<1x128xf32>
    %91 = arith.negf %90 : vector<1x128xf32>
    %92 = math.exp %91 : vector<1x128xf32>
    %cst_48 = arith.constant 1.000000e+00 : f32
    %93 = vector.broadcast %cst_48 : f32 to vector<1x128xf32>
    %94 = arith.addf %93, %92 : vector<1x128xf32>
    %95 = arith.divf %93, %94 : vector<1x128xf32>
    %96 = vector.broadcast %95 : vector<1x128xf32> to vector<3x128xf32>
    %97 = arith.mulf %57, %96 : vector<3x128xf32>
    %98 = arith.mulf %55, %95 : vector<1x128xf32>
    %99 = vector.extract_strided_slice %89 {offsets = [1, 128], sizes = [1, 128], strides = [1, 1]} : vector<3x384xf32> to vector<1x128xf32>
    %100 = arith.negf %99 : vector<1x128xf32>
    %101 = math.exp %100 : vector<1x128xf32>
    %cst_49 = arith.constant 1.000000e+00 : f32
    %102 = vector.broadcast %cst_49 : f32 to vector<1x128xf32>
    %103 = arith.addf %102, %101 : vector<1x128xf32>
    %104 = arith.divf %102, %103 : vector<1x128xf32>
    %105 = vector.broadcast %104 : vector<1x128xf32> to vector<3x128xf32>
    %106 = arith.mulf %65, %105 : vector<3x128xf32>
    %107 = arith.mulf %63, %104 : vector<1x128xf32>
    %108 = vector.extract_strided_slice %89 {offsets = [2, 256], sizes = [1, 128], strides = [1, 1]} : vector<3x384xf32> to vector<1x128xf32>
    %109 = arith.negf %108 : vector<1x128xf32>
    %110 = math.exp %109 : vector<1x128xf32>
    %cst_50 = arith.constant 1.000000e+00 : f32
    %111 = vector.broadcast %cst_50 : f32 to vector<1x128xf32>
    %112 = arith.addf %111, %110 : vector<1x128xf32>
    %113 = arith.divf %111, %112 : vector<1x128xf32>
    %114 = vector.broadcast %113 : vector<1x128xf32> to vector<3x128xf32>
    %115 = arith.mulf %73, %114 : vector<3x128xf32>
    %116 = arith.mulf %71, %113 : vector<1x128xf32>
    %c2_51 = arith.constant 2 : index
    %c0_52 = arith.constant 0 : index
    %c0_53 = arith.constant 0 : index
    %117 = vector.load %arg4[%c2_51, %c0_52, %c0_53] : memref<13x3x6xf32, #tpu.memory_space<vmem>>, vector<1x3x6xf32>
    %118 = vector.shape_cast %117 : vector<1x3x6xf32> to vector<3x6xf32>
    %119 = vector.extract_strided_slice %118 {offsets = [0, 0], sizes = [3, 1], strides = [1, 1]} : vector<3x6xf32> to vector<3x1xf32>
    %120 = vector.broadcast %119 : vector<3x1xf32> to vector<3x128xf32>
    %121 = arith.mulf %120, %97 : vector<3x128xf32>
    %122 = vector.extract_strided_slice %118 {offsets = [0, 1], sizes = [3, 1], strides = [1, 1]} : vector<3x6xf32> to vector<3x1xf32>
    %123 = vector.broadcast %122 : vector<3x1xf32> to vector<3x128xf32>
    %124 = arith.mulf %123, %106 : vector<3x128xf32>
    %125 = vector.extract_strided_slice %118 {offsets = [0, 2], sizes = [3, 1], strides = [1, 1]} : vector<3x6xf32> to vector<3x1xf32>
    %126 = vector.broadcast %125 : vector<3x1xf32> to vector<3x128xf32>
    %127 = arith.mulf %126, %115 : vector<3x128xf32>
    %128 = arith.addf %121, %124 : vector<3x128xf32>
    %129 = arith.addf %128, %127 : vector<3x128xf32>
    %c2_54 = arith.constant 2 : index
    %c0_55 = arith.constant 0 : index
    %c0_56 = arith.constant 0 : index
    %130 = vector.load %arg5[%c2_54, %c0_55, %c0_56] : memref<13x128x384xf32, #tpu.memory_space<vmem>>, vector<1x128x384xf32>
    %131 = vector.shape_cast %130 : vector<1x128x384xf32> to vector<128x384xf32>
    %cst_57 = arith.constant dense<0.000000e+00> : vector<3x384xf32>
    %132 = tpu.matmul %129, %131, %cst_57 {dimension_numbers = #tpu.dot_dimension_numbers<[1], [0], [0], [1], [0, 0, 1, 1], [], []>} : vector<3x128xf32>, vector<128x384xf32>, vector<3x384xf32> -> vector<3x384xf32>
    %133 = vector.extract_strided_slice %132 {offsets = [0, 0], sizes = [1, 128], strides = [1, 1]} : vector<3x384xf32> to vector<1x128xf32>
    %134 = arith.negf %133 : vector<1x128xf32>
    %135 = math.exp %134 : vector<1x128xf32>
    %cst_58 = arith.constant 1.000000e+00 : f32
    %136 = vector.broadcast %cst_58 : f32 to vector<1x128xf32>
    %137 = arith.addf %136, %135 : vector<1x128xf32>
    %138 = arith.divf %136, %137 : vector<1x128xf32>
    %139 = vector.broadcast %138 : vector<1x128xf32> to vector<3x128xf32>
    %140 = arith.mulf %97, %139 : vector<3x128xf32>
    %141 = arith.mulf %98, %138 : vector<1x128xf32>
    %142 = vector.extract_strided_slice %132 {offsets = [1, 128], sizes = [1, 128], strides = [1, 1]} : vector<3x384xf32> to vector<1x128xf32>
    %143 = arith.negf %142 : vector<1x128xf32>
    %144 = math.exp %143 : vector<1x128xf32>
    %cst_59 = arith.constant 1.000000e+00 : f32
    %145 = vector.broadcast %cst_59 : f32 to vector<1x128xf32>
    %146 = arith.addf %145, %144 : vector<1x128xf32>
    %147 = arith.divf %145, %146 : vector<1x128xf32>
    %148 = vector.broadcast %147 : vector<1x128xf32> to vector<3x128xf32>
    %149 = arith.mulf %106, %148 : vector<3x128xf32>
    %150 = arith.mulf %107, %147 : vector<1x128xf32>
    %151 = vector.extract_strided_slice %132 {offsets = [2, 256], sizes = [1, 128], strides = [1, 1]} : vector<3x384xf32> to vector<1x128xf32>
    %152 = arith.negf %151 : vector<1x128xf32>
    %153 = math.exp %152 : vector<1x128xf32>
    %cst_60 = arith.constant 1.000000e+00 : f32
    %154 = vector.broadcast %cst_60 : f32 to vector<1x128xf32>
    %155 = arith.addf %154, %153 : vector<1x128xf32>
    %156 = arith.divf %154, %155 : vector<1x128xf32>
    %157 = vector.broadcast %156 : vector<1x128xf32> to vector<3x128xf32>
    %158 = arith.mulf %115, %157 : vector<3x128xf32>
    %159 = arith.mulf %116, %156 : vector<1x128xf32>
    %c3 = arith.constant 3 : index
    %c0_61 = arith.constant 0 : index
    %c0_62 = arith.constant 0 : index
    %160 = vector.load %arg4[%c3, %c0_61, %c0_62] : memref<13x3x6xf32, #tpu.memory_space<vmem>>, vector<1x3x6xf32>
    %161 = vector.shape_cast %160 : vector<1x3x6xf32> to vector<3x6xf32>
    %162 = vector.extract_strided_slice %161 {offsets = [0, 0], sizes = [3, 1], strides = [1, 1]} : vector<3x6xf32> to vector<3x1xf32>
    %163 = vector.broadcast %162 : vector<3x1xf32> to vector<3x128xf32>
    %164 = arith.mulf %163, %140 : vector<3x128xf32>
    %165 = vector.extract_strided_slice %161 {offsets = [0, 1], sizes = [3, 1], strides = [1, 1]} : vector<3x6xf32> to vector<3x1xf32>
    %166 = vector.broadcast %165 : vector<3x1xf32> to vector<3x128xf32>
    %167 = arith.mulf %166, %149 : vector<3x128xf32>
    %168 = vector.extract_strided_slice %161 {offsets = [0, 2], sizes = [3, 1], strides = [1, 1]} : vector<3x6xf32> to vector<3x1xf32>
    %169 = vector.broadcast %168 : vector<3x1xf32> to vector<3x128xf32>
    %170 = arith.mulf %169, %158 : vector<3x128xf32>
    %171 = arith.addf %164, %167 : vector<3x128xf32>
    %172 = arith.addf %171, %170 : vector<3x128xf32>
    %c3_63 = arith.constant 3 : index
    %c0_64 = arith.constant 0 : index
    %c0_65 = arith.constant 0 : index
    %173 = vector.load %arg5[%c3_63, %c0_64, %c0_65] : memref<13x128x384xf32, #tpu.memory_space<vmem>>, vector<1x128x384xf32>
    %174 = vector.shape_cast %173 : vector<1x128x384xf32> to vector<128x384xf32>
    %cst_66 = arith.constant dense<0.000000e+00> : vector<3x384xf32>
    %175 = tpu.matmul %172, %174, %cst_66 {dimension_numbers = #tpu.dot_dimension_numbers<[1], [0], [0], [1], [0, 0, 1, 1], [], []>} : vector<3x128xf32>, vector<128x384xf32>, vector<3x384xf32> -> vector<3x384xf32>
    %176 = vector.extract_strided_slice %175 {offsets = [0, 0], sizes = [1, 128], strides = [1, 1]} : vector<3x384xf32> to vector<1x128xf32>
    %177 = arith.negf %176 : vector<1x128xf32>
    %178 = math.exp %177 : vector<1x128xf32>
    %cst_67 = arith.constant 1.000000e+00 : f32
    %179 = vector.broadcast %cst_67 : f32 to vector<1x128xf32>
    %180 = arith.addf %179, %178 : vector<1x128xf32>
    %181 = arith.divf %179, %180 : vector<1x128xf32>
    %182 = vector.broadcast %181 : vector<1x128xf32> to vector<3x128xf32>
    %183 = arith.mulf %140, %182 : vector<3x128xf32>
    %184 = arith.mulf %141, %181 : vector<1x128xf32>
    %185 = vector.extract_strided_slice %175 {offsets = [1, 128], sizes = [1, 128], strides = [1, 1]} : vector<3x384xf32> to vector<1x128xf32>
    %186 = arith.negf %185 : vector<1x128xf32>
    %187 = math.exp %186 : vector<1x128xf32>
    %cst_68 = arith.constant 1.000000e+00 : f32
    %188 = vector.broadcast %cst_68 : f32 to vector<1x128xf32>
    %189 = arith.addf %188, %187 : vector<1x128xf32>
    %190 = arith.divf %188, %189 : vector<1x128xf32>
    %191 = vector.broadcast %190 : vector<1x128xf32> to vector<3x128xf32>
    %192 = arith.mulf %149, %191 : vector<3x128xf32>
    %193 = arith.mulf %150, %190 : vector<1x128xf32>
    %194 = vector.extract_strided_slice %175 {offsets = [2, 256], sizes = [1, 128], strides = [1, 1]} : vector<3x384xf32> to vector<1x128xf32>
    %195 = arith.negf %194 : vector<1x128xf32>
    %196 = math.exp %195 : vector<1x128xf32>
    %cst_69 = arith.constant 1.000000e+00 : f32
    %197 = vector.broadcast %cst_69 : f32 to vector<1x128xf32>
    %198 = arith.addf %197, %196 : vector<1x128xf32>
    %199 = arith.divf %197, %198 : vector<1x128xf32>
    %200 = vector.broadcast %199 : vector<1x128xf32> to vector<3x128xf32>
    %201 = arith.mulf %158, %200 : vector<3x128xf32>
    %202 = arith.mulf %159, %199 : vector<1x128xf32>
    %c4 = arith.constant 4 : index
    %c0_70 = arith.constant 0 : index
    %c0_71 = arith.constant 0 : index
    %203 = vector.load %arg4[%c4, %c0_70, %c0_71] : memref<13x3x6xf32, #tpu.memory_space<vmem>>, vector<1x3x6xf32>
    %204 = vector.shape_cast %203 : vector<1x3x6xf32> to vector<3x6xf32>
    %205 = vector.extract_strided_slice %204 {offsets = [0, 0], sizes = [3, 1], strides = [1, 1]} : vector<3x6xf32> to vector<3x1xf32>
    %206 = vector.broadcast %205 : vector<3x1xf32> to vector<3x128xf32>
    %207 = arith.mulf %206, %57 : vector<3x128xf32>
    %208 = vector.extract_strided_slice %204 {offsets = [0, 1], sizes = [3, 1], strides = [1, 1]} : vector<3x6xf32> to vector<3x1xf32>
    %209 = vector.broadcast %208 : vector<3x1xf32> to vector<3x128xf32>
    %210 = arith.mulf %209, %65 : vector<3x128xf32>
    %211 = vector.extract_strided_slice %204 {offsets = [0, 2], sizes = [3, 1], strides = [1, 1]} : vector<3x6xf32> to vector<3x1xf32>
    %212 = vector.broadcast %211 : vector<3x1xf32> to vector<3x128xf32>
    %213 = arith.mulf %212, %73 : vector<3x128xf32>
    %214 = vector.extract_strided_slice %204 {offsets = [0, 3], sizes = [3, 1], strides = [1, 1]} : vector<3x6xf32> to vector<3x1xf32>
    %215 = vector.broadcast %214 : vector<3x1xf32> to vector<3x128xf32>
    %216 = arith.mulf %215, %183 : vector<3x128xf32>
    %217 = vector.extract_strided_slice %204 {offsets = [0, 4], sizes = [3, 1], strides = [1, 1]} : vector<3x6xf32> to vector<3x1xf32>
    %218 = vector.broadcast %217 : vector<3x1xf32> to vector<3x128xf32>
    %219 = arith.mulf %218, %192 : vector<3x128xf32>
    %220 = vector.extract_strided_slice %204 {offsets = [0, 5], sizes = [3, 1], strides = [1, 1]} : vector<3x6xf32> to vector<3x1xf32>
    %221 = vector.broadcast %220 : vector<3x1xf32> to vector<3x128xf32>
    %222 = arith.mulf %221, %201 : vector<3x128xf32>
    %223 = arith.addf %207, %210 : vector<3x128xf32>
    %224 = arith.addf %213, %216 : vector<3x128xf32>
    %225 = arith.addf %219, %222 : vector<3x128xf32>
    %226 = arith.addf %223, %224 : vector<3x128xf32>
    %227 = arith.addf %226, %225 : vector<3x128xf32>
    %c4_72 = arith.constant 4 : index
    %c0_73 = arith.constant 0 : index
    %c0_74 = arith.constant 0 : index
    %228 = vector.load %arg5[%c4_72, %c0_73, %c0_74] : memref<13x128x384xf32, #tpu.memory_space<vmem>>, vector<1x128x384xf32>
    %229 = vector.shape_cast %228 : vector<1x128x384xf32> to vector<128x384xf32>
    %cst_75 = arith.constant dense<0.000000e+00> : vector<3x384xf32>
    %230 = tpu.matmul %227, %229, %cst_75 {dimension_numbers = #tpu.dot_dimension_numbers<[1], [0], [0], [1], [0, 0, 1, 1], [], []>} : vector<3x128xf32>, vector<128x384xf32>, vector<3x384xf32> -> vector<3x384xf32>
    %231 = vector.extract_strided_slice %230 {offsets = [0, 0], sizes = [1, 128], strides = [1, 1]} : vector<3x384xf32> to vector<1x128xf32>
    %232 = arith.negf %231 : vector<1x128xf32>
    %233 = math.exp %232 : vector<1x128xf32>
    %cst_76 = arith.constant 1.000000e+00 : f32
    %234 = vector.broadcast %cst_76 : f32 to vector<1x128xf32>
    %235 = arith.addf %234, %233 : vector<1x128xf32>
    %236 = arith.divf %234, %235 : vector<1x128xf32>
    %237 = vector.broadcast %236 : vector<1x128xf32> to vector<3x128xf32>
    %238 = arith.mulf %183, %237 : vector<3x128xf32>
    %239 = arith.mulf %184, %236 : vector<1x128xf32>
    %240 = vector.extract_strided_slice %230 {offsets = [1, 128], sizes = [1, 128], strides = [1, 1]} : vector<3x384xf32> to vector<1x128xf32>
    %241 = arith.negf %240 : vector<1x128xf32>
    %242 = math.exp %241 : vector<1x128xf32>
    %cst_77 = arith.constant 1.000000e+00 : f32
    %243 = vector.broadcast %cst_77 : f32 to vector<1x128xf32>
    %244 = arith.addf %243, %242 : vector<1x128xf32>
    %245 = arith.divf %243, %244 : vector<1x128xf32>
    %246 = vector.broadcast %245 : vector<1x128xf32> to vector<3x128xf32>
    %247 = arith.mulf %192, %246 : vector<3x128xf32>
    %248 = arith.mulf %193, %245 : vector<1x128xf32>
    %249 = vector.extract_strided_slice %230 {offsets = [2, 256], sizes = [1, 128], strides = [1, 1]} : vector<3x384xf32> to vector<1x128xf32>
    %250 = arith.negf %249 : vector<1x128xf32>
    %251 = math.exp %250 : vector<1x128xf32>
    %cst_78 = arith.constant 1.000000e+00 : f32
    %252 = vector.broadcast %cst_78 : f32 to vector<1x128xf32>
    %253 = arith.addf %252, %251 : vector<1x128xf32>
    %254 = arith.divf %252, %253 : vector<1x128xf32>
    %255 = vector.broadcast %254 : vector<1x128xf32> to vector<3x128xf32>
    %256 = arith.mulf %201, %255 : vector<3x128xf32>
    %257 = arith.mulf %202, %254 : vector<1x128xf32>
    %c5 = arith.constant 5 : index
    %c0_79 = arith.constant 0 : index
    %c0_80 = arith.constant 0 : index
    %258 = vector.load %arg4[%c5, %c0_79, %c0_80] : memref<13x3x6xf32, #tpu.memory_space<vmem>>, vector<1x3x6xf32>
    %259 = vector.shape_cast %258 : vector<1x3x6xf32> to vector<3x6xf32>
    %260 = vector.extract_strided_slice %259 {offsets = [0, 0], sizes = [3, 1], strides = [1, 1]} : vector<3x6xf32> to vector<3x1xf32>
    %261 = vector.broadcast %260 : vector<3x1xf32> to vector<3x128xf32>
    %262 = arith.mulf %261, %238 : vector<3x128xf32>
    %263 = vector.extract_strided_slice %259 {offsets = [0, 1], sizes = [3, 1], strides = [1, 1]} : vector<3x6xf32> to vector<3x1xf32>
    %264 = vector.broadcast %263 : vector<3x1xf32> to vector<3x128xf32>
    %265 = arith.mulf %264, %247 : vector<3x128xf32>
    %266 = vector.extract_strided_slice %259 {offsets = [0, 2], sizes = [3, 1], strides = [1, 1]} : vector<3x6xf32> to vector<3x1xf32>
    %267 = vector.broadcast %266 : vector<3x1xf32> to vector<3x128xf32>
    %268 = arith.mulf %267, %256 : vector<3x128xf32>
    %269 = arith.addf %262, %265 : vector<3x128xf32>
    %270 = arith.addf %269, %268 : vector<3x128xf32>
    %c5_81 = arith.constant 5 : index
    %c0_82 = arith.constant 0 : index
    %c0_83 = arith.constant 0 : index
    %271 = vector.load %arg5[%c5_81, %c0_82, %c0_83] : memref<13x128x384xf32, #tpu.memory_space<vmem>>, vector<1x128x384xf32>
    %272 = vector.shape_cast %271 : vector<1x128x384xf32> to vector<128x384xf32>
    %cst_84 = arith.constant dense<0.000000e+00> : vector<3x384xf32>
    %273 = tpu.matmul %270, %272, %cst_84 {dimension_numbers = #tpu.dot_dimension_numbers<[1], [0], [0], [1], [0, 0, 1, 1], [], []>} : vector<3x128xf32>, vector<128x384xf32>, vector<3x384xf32> -> vector<3x384xf32>
    %274 = vector.extract_strided_slice %273 {offsets = [0, 0], sizes = [1, 128], strides = [1, 1]} : vector<3x384xf32> to vector<1x128xf32>
    %275 = arith.negf %274 : vector<1x128xf32>
    %276 = math.exp %275 : vector<1x128xf32>
    %cst_85 = arith.constant 1.000000e+00 : f32
    %277 = vector.broadcast %cst_85 : f32 to vector<1x128xf32>
    %278 = arith.addf %277, %276 : vector<1x128xf32>
    %279 = arith.divf %277, %278 : vector<1x128xf32>
    %280 = vector.broadcast %279 : vector<1x128xf32> to vector<3x128xf32>
    %281 = arith.mulf %238, %280 : vector<3x128xf32>
    %282 = arith.mulf %239, %279 : vector<1x128xf32>
    %283 = vector.extract_strided_slice %273 {offsets = [1, 128], sizes = [1, 128], strides = [1, 1]} : vector<3x384xf32> to vector<1x128xf32>
    %284 = arith.negf %283 : vector<1x128xf32>
    %285 = math.exp %284 : vector<1x128xf32>
    %cst_86 = arith.constant 1.000000e+00 : f32
    %286 = vector.broadcast %cst_86 : f32 to vector<1x128xf32>
    %287 = arith.addf %286, %285 : vector<1x128xf32>
    %288 = arith.divf %286, %287 : vector<1x128xf32>
    %289 = vector.broadcast %288 : vector<1x128xf32> to vector<3x128xf32>
    %290 = arith.mulf %247, %289 : vector<3x128xf32>
    %291 = arith.mulf %248, %288 : vector<1x128xf32>
    %292 = vector.extract_strided_slice %273 {offsets = [2, 256], sizes = [1, 128], strides = [1, 1]} : vector<3x384xf32> to vector<1x128xf32>
    %293 = arith.negf %292 : vector<1x128xf32>
    %294 = math.exp %293 : vector<1x128xf32>
    %cst_87 = arith.constant 1.000000e+00 : f32
    %295 = vector.broadcast %cst_87 : f32 to vector<1x128xf32>
    %296 = arith.addf %295, %294 : vector<1x128xf32>
    %297 = arith.divf %295, %296 : vector<1x128xf32>
    %298 = vector.broadcast %297 : vector<1x128xf32> to vector<3x128xf32>
    %299 = arith.mulf %256, %298 : vector<3x128xf32>
    %300 = arith.mulf %257, %297 : vector<1x128xf32>
    %c6 = arith.constant 6 : index
    %c0_88 = arith.constant 0 : index
    %c0_89 = arith.constant 0 : index
    %301 = vector.load %arg4[%c6, %c0_88, %c0_89] : memref<13x3x6xf32, #tpu.memory_space<vmem>>, vector<1x3x6xf32>
    %302 = vector.shape_cast %301 : vector<1x3x6xf32> to vector<3x6xf32>
    %303 = vector.extract_strided_slice %302 {offsets = [0, 0], sizes = [3, 1], strides = [1, 1]} : vector<3x6xf32> to vector<3x1xf32>
    %304 = vector.broadcast %303 : vector<3x1xf32> to vector<3x128xf32>
    %305 = arith.mulf %304, %281 : vector<3x128xf32>
    %306 = vector.extract_strided_slice %302 {offsets = [0, 1], sizes = [3, 1], strides = [1, 1]} : vector<3x6xf32> to vector<3x1xf32>
    %307 = vector.broadcast %306 : vector<3x1xf32> to vector<3x128xf32>
    %308 = arith.mulf %307, %290 : vector<3x128xf32>
    %309 = vector.extract_strided_slice %302 {offsets = [0, 2], sizes = [3, 1], strides = [1, 1]} : vector<3x6xf32> to vector<3x1xf32>
    %310 = vector.broadcast %309 : vector<3x1xf32> to vector<3x128xf32>
    %311 = arith.mulf %310, %299 : vector<3x128xf32>
    %312 = arith.addf %305, %308 : vector<3x128xf32>
    %313 = arith.addf %312, %311 : vector<3x128xf32>
    %c6_90 = arith.constant 6 : index
    %c0_91 = arith.constant 0 : index
    %c0_92 = arith.constant 0 : index
    %314 = vector.load %arg5[%c6_90, %c0_91, %c0_92] : memref<13x128x384xf32, #tpu.memory_space<vmem>>, vector<1x128x384xf32>
    %315 = vector.shape_cast %314 : vector<1x128x384xf32> to vector<128x384xf32>
    %cst_93 = arith.constant dense<0.000000e+00> : vector<3x384xf32>
    %316 = tpu.matmul %313, %315, %cst_93 {dimension_numbers = #tpu.dot_dimension_numbers<[1], [0], [0], [1], [0, 0, 1, 1], [], []>} : vector<3x128xf32>, vector<128x384xf32>, vector<3x384xf32> -> vector<3x384xf32>
    %317 = vector.extract_strided_slice %316 {offsets = [0, 0], sizes = [1, 128], strides = [1, 1]} : vector<3x384xf32> to vector<1x128xf32>
    %318 = arith.negf %317 : vector<1x128xf32>
    %319 = math.exp %318 : vector<1x128xf32>
    %cst_94 = arith.constant 1.000000e+00 : f32
    %320 = vector.broadcast %cst_94 : f32 to vector<1x128xf32>
    %321 = arith.addf %320, %319 : vector<1x128xf32>
    %322 = arith.divf %320, %321 : vector<1x128xf32>
    %323 = vector.broadcast %322 : vector<1x128xf32> to vector<3x128xf32>
    %324 = arith.mulf %281, %323 : vector<3x128xf32>
    %325 = arith.mulf %282, %322 : vector<1x128xf32>
    %326 = vector.extract_strided_slice %316 {offsets = [1, 128], sizes = [1, 128], strides = [1, 1]} : vector<3x384xf32> to vector<1x128xf32>
    %327 = arith.negf %326 : vector<1x128xf32>
    %328 = math.exp %327 : vector<1x128xf32>
    %cst_95 = arith.constant 1.000000e+00 : f32
    %329 = vector.broadcast %cst_95 : f32 to vector<1x128xf32>
    %330 = arith.addf %329, %328 : vector<1x128xf32>
    %331 = arith.divf %329, %330 : vector<1x128xf32>
    %332 = vector.broadcast %331 : vector<1x128xf32> to vector<3x128xf32>
    %333 = arith.mulf %290, %332 : vector<3x128xf32>
    %334 = arith.mulf %291, %331 : vector<1x128xf32>
    %335 = vector.extract_strided_slice %316 {offsets = [2, 256], sizes = [1, 128], strides = [1, 1]} : vector<3x384xf32> to vector<1x128xf32>
    %336 = arith.negf %335 : vector<1x128xf32>
    %337 = math.exp %336 : vector<1x128xf32>
    %cst_96 = arith.constant 1.000000e+00 : f32
    %338 = vector.broadcast %cst_96 : f32 to vector<1x128xf32>
    %339 = arith.addf %338, %337 : vector<1x128xf32>
    %340 = arith.divf %338, %339 : vector<1x128xf32>
    %341 = vector.broadcast %340 : vector<1x128xf32> to vector<3x128xf32>
    %342 = arith.mulf %299, %341 : vector<3x128xf32>
    %343 = arith.mulf %300, %340 : vector<1x128xf32>
    %c7 = arith.constant 7 : index
    %c0_97 = arith.constant 0 : index
    %c0_98 = arith.constant 0 : index
    %344 = vector.load %arg4[%c7, %c0_97, %c0_98] : memref<13x3x6xf32, #tpu.memory_space<vmem>>, vector<1x3x6xf32>
    %345 = vector.shape_cast %344 : vector<1x3x6xf32> to vector<3x6xf32>
    %346 = vector.extract_strided_slice %345 {offsets = [0, 0], sizes = [3, 1], strides = [1, 1]} : vector<3x6xf32> to vector<3x1xf32>
    %347 = vector.broadcast %346 : vector<3x1xf32> to vector<3x128xf32>
    %348 = arith.mulf %347, %183 : vector<3x128xf32>
    %349 = vector.extract_strided_slice %345 {offsets = [0, 1], sizes = [3, 1], strides = [1, 1]} : vector<3x6xf32> to vector<3x1xf32>
    %350 = vector.broadcast %349 : vector<3x1xf32> to vector<3x128xf32>
    %351 = arith.mulf %350, %192 : vector<3x128xf32>
    %352 = vector.extract_strided_slice %345 {offsets = [0, 2], sizes = [3, 1], strides = [1, 1]} : vector<3x6xf32> to vector<3x1xf32>
    %353 = vector.broadcast %352 : vector<3x1xf32> to vector<3x128xf32>
    %354 = arith.mulf %353, %201 : vector<3x128xf32>
    %355 = vector.extract_strided_slice %345 {offsets = [0, 3], sizes = [3, 1], strides = [1, 1]} : vector<3x6xf32> to vector<3x1xf32>
    %356 = vector.broadcast %355 : vector<3x1xf32> to vector<3x128xf32>
    %357 = arith.mulf %356, %324 : vector<3x128xf32>
    %358 = vector.extract_strided_slice %345 {offsets = [0, 4], sizes = [3, 1], strides = [1, 1]} : vector<3x6xf32> to vector<3x1xf32>
    %359 = vector.broadcast %358 : vector<3x1xf32> to vector<3x128xf32>
    %360 = arith.mulf %359, %333 : vector<3x128xf32>
    %361 = vector.extract_strided_slice %345 {offsets = [0, 5], sizes = [3, 1], strides = [1, 1]} : vector<3x6xf32> to vector<3x1xf32>
    %362 = vector.broadcast %361 : vector<3x1xf32> to vector<3x128xf32>
    %363 = arith.mulf %362, %342 : vector<3x128xf32>
    %364 = arith.addf %348, %351 : vector<3x128xf32>
    %365 = arith.addf %354, %357 : vector<3x128xf32>
    %366 = arith.addf %360, %363 : vector<3x128xf32>
    %367 = arith.addf %364, %365 : vector<3x128xf32>
    %368 = arith.addf %367, %366 : vector<3x128xf32>
    %c7_99 = arith.constant 7 : index
    %c0_100 = arith.constant 0 : index
    %c0_101 = arith.constant 0 : index
    %369 = vector.load %arg5[%c7_99, %c0_100, %c0_101] : memref<13x128x384xf32, #tpu.memory_space<vmem>>, vector<1x128x384xf32>
    %370 = vector.shape_cast %369 : vector<1x128x384xf32> to vector<128x384xf32>
    %cst_102 = arith.constant dense<0.000000e+00> : vector<3x384xf32>
    %371 = tpu.matmul %368, %370, %cst_102 {dimension_numbers = #tpu.dot_dimension_numbers<[1], [0], [0], [1], [0, 0, 1, 1], [], []>} : vector<3x128xf32>, vector<128x384xf32>, vector<3x384xf32> -> vector<3x384xf32>
    %372 = vector.extract_strided_slice %371 {offsets = [0, 0], sizes = [1, 128], strides = [1, 1]} : vector<3x384xf32> to vector<1x128xf32>
    %373 = arith.negf %372 : vector<1x128xf32>
    %374 = math.exp %373 : vector<1x128xf32>
    %cst_103 = arith.constant 1.000000e+00 : f32
    %375 = vector.broadcast %cst_103 : f32 to vector<1x128xf32>
    %376 = arith.addf %375, %374 : vector<1x128xf32>
    %377 = arith.divf %375, %376 : vector<1x128xf32>
    %378 = vector.broadcast %377 : vector<1x128xf32> to vector<3x128xf32>
    %379 = arith.mulf %324, %378 : vector<3x128xf32>
    %380 = arith.mulf %325, %377 : vector<1x128xf32>
    %381 = vector.extract_strided_slice %371 {offsets = [1, 128], sizes = [1, 128], strides = [1, 1]} : vector<3x384xf32> to vector<1x128xf32>
    %382 = arith.negf %381 : vector<1x128xf32>
    %383 = math.exp %382 : vector<1x128xf32>
    %cst_104 = arith.constant 1.000000e+00 : f32
    %384 = vector.broadcast %cst_104 : f32 to vector<1x128xf32>
    %385 = arith.addf %384, %383 : vector<1x128xf32>
    %386 = arith.divf %384, %385 : vector<1x128xf32>
    %387 = vector.broadcast %386 : vector<1x128xf32> to vector<3x128xf32>
    %388 = arith.mulf %333, %387 : vector<3x128xf32>
    %389 = arith.mulf %334, %386 : vector<1x128xf32>
    %390 = vector.extract_strided_slice %371 {offsets = [2, 256], sizes = [1, 128], strides = [1, 1]} : vector<3x384xf32> to vector<1x128xf32>
    %391 = arith.negf %390 : vector<1x128xf32>
    %392 = math.exp %391 : vector<1x128xf32>
    %cst_105 = arith.constant 1.000000e+00 : f32
    %393 = vector.broadcast %cst_105 : f32 to vector<1x128xf32>
    %394 = arith.addf %393, %392 : vector<1x128xf32>
    %395 = arith.divf %393, %394 : vector<1x128xf32>
    %396 = vector.broadcast %395 : vector<1x128xf32> to vector<3x128xf32>
    %397 = arith.mulf %342, %396 : vector<3x128xf32>
    %398 = arith.mulf %343, %395 : vector<1x128xf32>
    %c8 = arith.constant 8 : index
    %c0_106 = arith.constant 0 : index
    %c0_107 = arith.constant 0 : index
    %399 = vector.load %arg4[%c8, %c0_106, %c0_107] : memref<13x3x6xf32, #tpu.memory_space<vmem>>, vector<1x3x6xf32>
    %400 = vector.shape_cast %399 : vector<1x3x6xf32> to vector<3x6xf32>
    %401 = vector.extract_strided_slice %400 {offsets = [0, 0], sizes = [3, 1], strides = [1, 1]} : vector<3x6xf32> to vector<3x1xf32>
    %402 = vector.broadcast %401 : vector<3x1xf32> to vector<3x128xf32>
    %403 = arith.mulf %402, %379 : vector<3x128xf32>
    %404 = vector.extract_strided_slice %400 {offsets = [0, 1], sizes = [3, 1], strides = [1, 1]} : vector<3x6xf32> to vector<3x1xf32>
    %405 = vector.broadcast %404 : vector<3x1xf32> to vector<3x128xf32>
    %406 = arith.mulf %405, %388 : vector<3x128xf32>
    %407 = vector.extract_strided_slice %400 {offsets = [0, 2], sizes = [3, 1], strides = [1, 1]} : vector<3x6xf32> to vector<3x1xf32>
    %408 = vector.broadcast %407 : vector<3x1xf32> to vector<3x128xf32>
    %409 = arith.mulf %408, %397 : vector<3x128xf32>
    %410 = arith.addf %403, %406 : vector<3x128xf32>
    %411 = arith.addf %410, %409 : vector<3x128xf32>
    %c8_108 = arith.constant 8 : index
    %c0_109 = arith.constant 0 : index
    %c0_110 = arith.constant 0 : index
    %412 = vector.load %arg5[%c8_108, %c0_109, %c0_110] : memref<13x128x384xf32, #tpu.memory_space<vmem>>, vector<1x128x384xf32>
    %413 = vector.shape_cast %412 : vector<1x128x384xf32> to vector<128x384xf32>
    %cst_111 = arith.constant dense<0.000000e+00> : vector<3x384xf32>
    %414 = tpu.matmul %411, %413, %cst_111 {dimension_numbers = #tpu.dot_dimension_numbers<[1], [0], [0], [1], [0, 0, 1, 1], [], []>} : vector<3x128xf32>, vector<128x384xf32>, vector<3x384xf32> -> vector<3x384xf32>
    %415 = vector.extract_strided_slice %414 {offsets = [0, 0], sizes = [1, 128], strides = [1, 1]} : vector<3x384xf32> to vector<1x128xf32>
    %416 = arith.negf %415 : vector<1x128xf32>
    %417 = math.exp %416 : vector<1x128xf32>
    %cst_112 = arith.constant 1.000000e+00 : f32
    %418 = vector.broadcast %cst_112 : f32 to vector<1x128xf32>
    %419 = arith.addf %418, %417 : vector<1x128xf32>
    %420 = arith.divf %418, %419 : vector<1x128xf32>
    %421 = vector.broadcast %420 : vector<1x128xf32> to vector<3x128xf32>
    %422 = arith.mulf %379, %421 : vector<3x128xf32>
    %423 = arith.mulf %380, %420 : vector<1x128xf32>
    %424 = vector.extract_strided_slice %414 {offsets = [1, 128], sizes = [1, 128], strides = [1, 1]} : vector<3x384xf32> to vector<1x128xf32>
    %425 = arith.negf %424 : vector<1x128xf32>
    %426 = math.exp %425 : vector<1x128xf32>
    %cst_113 = arith.constant 1.000000e+00 : f32
    %427 = vector.broadcast %cst_113 : f32 to vector<1x128xf32>
    %428 = arith.addf %427, %426 : vector<1x128xf32>
    %429 = arith.divf %427, %428 : vector<1x128xf32>
    %430 = vector.broadcast %429 : vector<1x128xf32> to vector<3x128xf32>
    %431 = arith.mulf %388, %430 : vector<3x128xf32>
    %432 = arith.mulf %389, %429 : vector<1x128xf32>
    %433 = vector.extract_strided_slice %414 {offsets = [2, 256], sizes = [1, 128], strides = [1, 1]} : vector<3x384xf32> to vector<1x128xf32>
    %434 = arith.negf %433 : vector<1x128xf32>
    %435 = math.exp %434 : vector<1x128xf32>
    %cst_114 = arith.constant 1.000000e+00 : f32
    %436 = vector.broadcast %cst_114 : f32 to vector<1x128xf32>
    %437 = arith.addf %436, %435 : vector<1x128xf32>
    %438 = arith.divf %436, %437 : vector<1x128xf32>
    %439 = vector.broadcast %438 : vector<1x128xf32> to vector<3x128xf32>
    %440 = arith.mulf %397, %439 : vector<3x128xf32>
    %441 = arith.mulf %398, %438 : vector<1x128xf32>
    %c9 = arith.constant 9 : index
    %c0_115 = arith.constant 0 : index
    %c0_116 = arith.constant 0 : index
    %442 = vector.load %arg4[%c9, %c0_115, %c0_116] : memref<13x3x6xf32, #tpu.memory_space<vmem>>, vector<1x3x6xf32>
    %443 = vector.shape_cast %442 : vector<1x3x6xf32> to vector<3x6xf32>
    %444 = vector.extract_strided_slice %443 {offsets = [0, 0], sizes = [3, 1], strides = [1, 1]} : vector<3x6xf32> to vector<3x1xf32>
    %445 = vector.broadcast %444 : vector<3x1xf32> to vector<3x128xf32>
    %446 = arith.mulf %445, %422 : vector<3x128xf32>
    %447 = vector.extract_strided_slice %443 {offsets = [0, 1], sizes = [3, 1], strides = [1, 1]} : vector<3x6xf32> to vector<3x1xf32>
    %448 = vector.broadcast %447 : vector<3x1xf32> to vector<3x128xf32>
    %449 = arith.mulf %448, %431 : vector<3x128xf32>
    %450 = vector.extract_strided_slice %443 {offsets = [0, 2], sizes = [3, 1], strides = [1, 1]} : vector<3x6xf32> to vector<3x1xf32>
    %451 = vector.broadcast %450 : vector<3x1xf32> to vector<3x128xf32>
    %452 = arith.mulf %451, %440 : vector<3x128xf32>
    %453 = arith.addf %446, %449 : vector<3x128xf32>
    %454 = arith.addf %453, %452 : vector<3x128xf32>
    %c9_117 = arith.constant 9 : index
    %c0_118 = arith.constant 0 : index
    %c0_119 = arith.constant 0 : index
    %455 = vector.load %arg5[%c9_117, %c0_118, %c0_119] : memref<13x128x384xf32, #tpu.memory_space<vmem>>, vector<1x128x384xf32>
    %456 = vector.shape_cast %455 : vector<1x128x384xf32> to vector<128x384xf32>
    %cst_120 = arith.constant dense<0.000000e+00> : vector<3x384xf32>
    %457 = tpu.matmul %454, %456, %cst_120 {dimension_numbers = #tpu.dot_dimension_numbers<[1], [0], [0], [1], [0, 0, 1, 1], [], []>} : vector<3x128xf32>, vector<128x384xf32>, vector<3x384xf32> -> vector<3x384xf32>
    %458 = vector.extract_strided_slice %457 {offsets = [0, 0], sizes = [1, 128], strides = [1, 1]} : vector<3x384xf32> to vector<1x128xf32>
    %459 = arith.negf %458 : vector<1x128xf32>
    %460 = math.exp %459 : vector<1x128xf32>
    %cst_121 = arith.constant 1.000000e+00 : f32
    %461 = vector.broadcast %cst_121 : f32 to vector<1x128xf32>
    %462 = arith.addf %461, %460 : vector<1x128xf32>
    %463 = arith.divf %461, %462 : vector<1x128xf32>
    %464 = vector.broadcast %463 : vector<1x128xf32> to vector<3x128xf32>
    %465 = arith.mulf %422, %464 : vector<3x128xf32>
    %466 = arith.mulf %423, %463 : vector<1x128xf32>
    %467 = vector.extract_strided_slice %457 {offsets = [1, 128], sizes = [1, 128], strides = [1, 1]} : vector<3x384xf32> to vector<1x128xf32>
    %468 = arith.negf %467 : vector<1x128xf32>
    %469 = math.exp %468 : vector<1x128xf32>
    %cst_122 = arith.constant 1.000000e+00 : f32
    %470 = vector.broadcast %cst_122 : f32 to vector<1x128xf32>
    %471 = arith.addf %470, %469 : vector<1x128xf32>
    %472 = arith.divf %470, %471 : vector<1x128xf32>
    %473 = vector.broadcast %472 : vector<1x128xf32> to vector<3x128xf32>
    %474 = arith.mulf %431, %473 : vector<3x128xf32>
    %475 = arith.mulf %432, %472 : vector<1x128xf32>
    %476 = vector.extract_strided_slice %457 {offsets = [2, 256], sizes = [1, 128], strides = [1, 1]} : vector<3x384xf32> to vector<1x128xf32>
    %477 = arith.negf %476 : vector<1x128xf32>
    %478 = math.exp %477 : vector<1x128xf32>
    %cst_123 = arith.constant 1.000000e+00 : f32
    %479 = vector.broadcast %cst_123 : f32 to vector<1x128xf32>
    %480 = arith.addf %479, %478 : vector<1x128xf32>
    %481 = arith.divf %479, %480 : vector<1x128xf32>
    %482 = vector.broadcast %481 : vector<1x128xf32> to vector<3x128xf32>
    %483 = arith.mulf %440, %482 : vector<3x128xf32>
    %484 = arith.mulf %441, %481 : vector<1x128xf32>
    %c10 = arith.constant 10 : index
    %c0_124 = arith.constant 0 : index
    %c0_125 = arith.constant 0 : index
    %485 = vector.load %arg4[%c10, %c0_124, %c0_125] : memref<13x3x6xf32, #tpu.memory_space<vmem>>, vector<1x3x6xf32>
    %486 = vector.shape_cast %485 : vector<1x3x6xf32> to vector<3x6xf32>
    %487 = vector.extract_strided_slice %486 {offsets = [0, 0], sizes = [3, 1], strides = [1, 1]} : vector<3x6xf32> to vector<3x1xf32>
    %488 = vector.broadcast %487 : vector<3x1xf32> to vector<3x128xf32>
    %489 = arith.mulf %488, %324 : vector<3x128xf32>
    %490 = vector.extract_strided_slice %486 {offsets = [0, 1], sizes = [3, 1], strides = [1, 1]} : vector<3x6xf32> to vector<3x1xf32>
    %491 = vector.broadcast %490 : vector<3x1xf32> to vector<3x128xf32>
    %492 = arith.mulf %491, %333 : vector<3x128xf32>
    %493 = vector.extract_strided_slice %486 {offsets = [0, 2], sizes = [3, 1], strides = [1, 1]} : vector<3x6xf32> to vector<3x1xf32>
    %494 = vector.broadcast %493 : vector<3x1xf32> to vector<3x128xf32>
    %495 = arith.mulf %494, %342 : vector<3x128xf32>
    %496 = vector.extract_strided_slice %486 {offsets = [0, 3], sizes = [3, 1], strides = [1, 1]} : vector<3x6xf32> to vector<3x1xf32>
    %497 = vector.broadcast %496 : vector<3x1xf32> to vector<3x128xf32>
    %498 = arith.mulf %497, %465 : vector<3x128xf32>
    %499 = vector.extract_strided_slice %486 {offsets = [0, 4], sizes = [3, 1], strides = [1, 1]} : vector<3x6xf32> to vector<3x1xf32>
    %500 = vector.broadcast %499 : vector<3x1xf32> to vector<3x128xf32>
    %501 = arith.mulf %500, %474 : vector<3x128xf32>
    %502 = vector.extract_strided_slice %486 {offsets = [0, 5], sizes = [3, 1], strides = [1, 1]} : vector<3x6xf32> to vector<3x1xf32>
    %503 = vector.broadcast %502 : vector<3x1xf32> to vector<3x128xf32>
    %504 = arith.mulf %503, %483 : vector<3x128xf32>
    %505 = arith.addf %489, %492 : vector<3x128xf32>
    %506 = arith.addf %495, %498 : vector<3x128xf32>
    %507 = arith.addf %501, %504 : vector<3x128xf32>
    %508 = arith.addf %505, %506 : vector<3x128xf32>
    %509 = arith.addf %508, %507 : vector<3x128xf32>
    %c10_126 = arith.constant 10 : index
    %c0_127 = arith.constant 0 : index
    %c0_128 = arith.constant 0 : index
    %510 = vector.load %arg5[%c10_126, %c0_127, %c0_128] : memref<13x128x384xf32, #tpu.memory_space<vmem>>, vector<1x128x384xf32>
    %511 = vector.shape_cast %510 : vector<1x128x384xf32> to vector<128x384xf32>
    %cst_129 = arith.constant dense<0.000000e+00> : vector<3x384xf32>
    %512 = tpu.matmul %509, %511, %cst_129 {dimension_numbers = #tpu.dot_dimension_numbers<[1], [0], [0], [1], [0, 0, 1, 1], [], []>} : vector<3x128xf32>, vector<128x384xf32>, vector<3x384xf32> -> vector<3x384xf32>
    %513 = vector.extract_strided_slice %512 {offsets = [0, 0], sizes = [1, 128], strides = [1, 1]} : vector<3x384xf32> to vector<1x128xf32>
    %514 = arith.negf %513 : vector<1x128xf32>
    %515 = math.exp %514 : vector<1x128xf32>
    %cst_130 = arith.constant 1.000000e+00 : f32
    %516 = vector.broadcast %cst_130 : f32 to vector<1x128xf32>
    %517 = arith.addf %516, %515 : vector<1x128xf32>
    %518 = arith.divf %516, %517 : vector<1x128xf32>
    %519 = vector.broadcast %518 : vector<1x128xf32> to vector<3x128xf32>
    %520 = arith.mulf %465, %519 : vector<3x128xf32>
    %521 = arith.mulf %466, %518 : vector<1x128xf32>
    %522 = vector.extract_strided_slice %512 {offsets = [1, 128], sizes = [1, 128], strides = [1, 1]} : vector<3x384xf32> to vector<1x128xf32>
    %523 = arith.negf %522 : vector<1x128xf32>
    %524 = math.exp %523 : vector<1x128xf32>
    %cst_131 = arith.constant 1.000000e+00 : f32
    %525 = vector.broadcast %cst_131 : f32 to vector<1x128xf32>
    %526 = arith.addf %525, %524 : vector<1x128xf32>
    %527 = arith.divf %525, %526 : vector<1x128xf32>
    %528 = vector.broadcast %527 : vector<1x128xf32> to vector<3x128xf32>
    %529 = arith.mulf %474, %528 : vector<3x128xf32>
    %530 = arith.mulf %475, %527 : vector<1x128xf32>
    %531 = vector.extract_strided_slice %512 {offsets = [2, 256], sizes = [1, 128], strides = [1, 1]} : vector<3x384xf32> to vector<1x128xf32>
    %532 = arith.negf %531 : vector<1x128xf32>
    %533 = math.exp %532 : vector<1x128xf32>
    %cst_132 = arith.constant 1.000000e+00 : f32
    %534 = vector.broadcast %cst_132 : f32 to vector<1x128xf32>
    %535 = arith.addf %534, %533 : vector<1x128xf32>
    %536 = arith.divf %534, %535 : vector<1x128xf32>
    %537 = vector.broadcast %536 : vector<1x128xf32> to vector<3x128xf32>
    %538 = arith.mulf %483, %537 : vector<3x128xf32>
    %539 = arith.mulf %484, %536 : vector<1x128xf32>
    %c11 = arith.constant 11 : index
    %c0_133 = arith.constant 0 : index
    %c0_134 = arith.constant 0 : index
    %540 = vector.load %arg4[%c11, %c0_133, %c0_134] : memref<13x3x6xf32, #tpu.memory_space<vmem>>, vector<1x3x6xf32>
    %541 = vector.shape_cast %540 : vector<1x3x6xf32> to vector<3x6xf32>
    %542 = vector.extract_strided_slice %541 {offsets = [0, 0], sizes = [3, 1], strides = [1, 1]} : vector<3x6xf32> to vector<3x1xf32>
    %543 = vector.broadcast %542 : vector<3x1xf32> to vector<3x128xf32>
    %544 = arith.mulf %543, %520 : vector<3x128xf32>
    %545 = vector.extract_strided_slice %541 {offsets = [0, 1], sizes = [3, 1], strides = [1, 1]} : vector<3x6xf32> to vector<3x1xf32>
    %546 = vector.broadcast %545 : vector<3x1xf32> to vector<3x128xf32>
    %547 = arith.mulf %546, %529 : vector<3x128xf32>
    %548 = vector.extract_strided_slice %541 {offsets = [0, 2], sizes = [3, 1], strides = [1, 1]} : vector<3x6xf32> to vector<3x1xf32>
    %549 = vector.broadcast %548 : vector<3x1xf32> to vector<3x128xf32>
    %550 = arith.mulf %549, %538 : vector<3x128xf32>
    %551 = arith.addf %544, %547 : vector<3x128xf32>
    %552 = arith.addf %551, %550 : vector<3x128xf32>
    %c11_135 = arith.constant 11 : index
    %c0_136 = arith.constant 0 : index
    %c0_137 = arith.constant 0 : index
    %553 = vector.load %arg5[%c11_135, %c0_136, %c0_137] : memref<13x128x384xf32, #tpu.memory_space<vmem>>, vector<1x128x384xf32>
    %554 = vector.shape_cast %553 : vector<1x128x384xf32> to vector<128x384xf32>
    %cst_138 = arith.constant dense<0.000000e+00> : vector<3x384xf32>
    %555 = tpu.matmul %552, %554, %cst_138 {dimension_numbers = #tpu.dot_dimension_numbers<[1], [0], [0], [1], [0, 0, 1, 1], [], []>} : vector<3x128xf32>, vector<128x384xf32>, vector<3x384xf32> -> vector<3x384xf32>
    %556 = vector.extract_strided_slice %555 {offsets = [0, 0], sizes = [1, 128], strides = [1, 1]} : vector<3x384xf32> to vector<1x128xf32>
    %557 = arith.negf %556 : vector<1x128xf32>
    %558 = math.exp %557 : vector<1x128xf32>
    %cst_139 = arith.constant 1.000000e+00 : f32
    %559 = vector.broadcast %cst_139 : f32 to vector<1x128xf32>
    %560 = arith.addf %559, %558 : vector<1x128xf32>
    %561 = arith.divf %559, %560 : vector<1x128xf32>
    %562 = vector.broadcast %561 : vector<1x128xf32> to vector<3x128xf32>
    %563 = arith.mulf %520, %562 : vector<3x128xf32>
    %564 = arith.mulf %521, %561 : vector<1x128xf32>
    %565 = vector.extract_strided_slice %555 {offsets = [1, 128], sizes = [1, 128], strides = [1, 1]} : vector<3x384xf32> to vector<1x128xf32>
    %566 = arith.negf %565 : vector<1x128xf32>
    %567 = math.exp %566 : vector<1x128xf32>
    %cst_140 = arith.constant 1.000000e+00 : f32
    %568 = vector.broadcast %cst_140 : f32 to vector<1x128xf32>
    %569 = arith.addf %568, %567 : vector<1x128xf32>
    %570 = arith.divf %568, %569 : vector<1x128xf32>
    %571 = vector.broadcast %570 : vector<1x128xf32> to vector<3x128xf32>
    %572 = arith.mulf %529, %571 : vector<3x128xf32>
    %573 = arith.mulf %530, %570 : vector<1x128xf32>
    %574 = vector.extract_strided_slice %555 {offsets = [2, 256], sizes = [1, 128], strides = [1, 1]} : vector<3x384xf32> to vector<1x128xf32>
    %575 = arith.negf %574 : vector<1x128xf32>
    %576 = math.exp %575 : vector<1x128xf32>
    %cst_141 = arith.constant 1.000000e+00 : f32
    %577 = vector.broadcast %cst_141 : f32 to vector<1x128xf32>
    %578 = arith.addf %577, %576 : vector<1x128xf32>
    %579 = arith.divf %577, %578 : vector<1x128xf32>
    %580 = vector.broadcast %579 : vector<1x128xf32> to vector<3x128xf32>
    %581 = arith.mulf %538, %580 : vector<3x128xf32>
    %582 = arith.mulf %539, %579 : vector<1x128xf32>
    %c12 = arith.constant 12 : index
    %c0_142 = arith.constant 0 : index
    %c0_143 = arith.constant 0 : index
    %583 = vector.load %arg4[%c12, %c0_142, %c0_143] : memref<13x3x6xf32, #tpu.memory_space<vmem>>, vector<1x3x6xf32>
    %584 = vector.shape_cast %583 : vector<1x3x6xf32> to vector<3x6xf32>
    %585 = vector.extract_strided_slice %584 {offsets = [0, 0], sizes = [3, 1], strides = [1, 1]} : vector<3x6xf32> to vector<3x1xf32>
    %586 = vector.broadcast %585 : vector<3x1xf32> to vector<3x128xf32>
    %587 = arith.mulf %586, %563 : vector<3x128xf32>
    %588 = vector.extract_strided_slice %584 {offsets = [0, 1], sizes = [3, 1], strides = [1, 1]} : vector<3x6xf32> to vector<3x1xf32>
    %589 = vector.broadcast %588 : vector<3x1xf32> to vector<3x128xf32>
    %590 = arith.mulf %589, %572 : vector<3x128xf32>
    %591 = vector.extract_strided_slice %584 {offsets = [0, 2], sizes = [3, 1], strides = [1, 1]} : vector<3x6xf32> to vector<3x1xf32>
    %592 = vector.broadcast %591 : vector<3x1xf32> to vector<3x128xf32>
    %593 = arith.mulf %592, %581 : vector<3x128xf32>
    %594 = arith.addf %587, %590 : vector<3x128xf32>
    %595 = arith.addf %594, %593 : vector<3x128xf32>
    %c12_144 = arith.constant 12 : index
    %c0_145 = arith.constant 0 : index
    %c0_146 = arith.constant 0 : index
    %596 = vector.load %arg5[%c12_144, %c0_145, %c0_146] : memref<13x128x384xf32, #tpu.memory_space<vmem>>, vector<1x128x384xf32>
    %597 = vector.shape_cast %596 : vector<1x128x384xf32> to vector<128x384xf32>
    %cst_147 = arith.constant dense<0.000000e+00> : vector<3x384xf32>
    %598 = tpu.matmul %595, %597, %cst_147 {dimension_numbers = #tpu.dot_dimension_numbers<[1], [0], [0], [1], [0, 0, 1, 1], [], []>} : vector<3x128xf32>, vector<128x384xf32>, vector<3x384xf32> -> vector<3x384xf32>
    %599 = vector.extract_strided_slice %598 {offsets = [0, 0], sizes = [1, 128], strides = [1, 1]} : vector<3x384xf32> to vector<1x128xf32>
    %600 = arith.negf %599 : vector<1x128xf32>
    %601 = math.exp %600 : vector<1x128xf32>
    %cst_148 = arith.constant 1.000000e+00 : f32
    %602 = vector.broadcast %cst_148 : f32 to vector<1x128xf32>
    %603 = arith.addf %602, %601 : vector<1x128xf32>
    %604 = arith.divf %602, %603 : vector<1x128xf32>
    %605 = arith.mulf %564, %604 : vector<1x128xf32>
    %606 = vector.extract_strided_slice %598 {offsets = [1, 128], sizes = [1, 128], strides = [1, 1]} : vector<3x384xf32> to vector<1x128xf32>
    %607 = arith.negf %606 : vector<1x128xf32>
    %608 = math.exp %607 : vector<1x128xf32>
    %cst_149 = arith.constant 1.000000e+00 : f32
    %609 = vector.broadcast %cst_149 : f32 to vector<1x128xf32>
    %610 = arith.addf %609, %608 : vector<1x128xf32>
    %611 = arith.divf %609, %610 : vector<1x128xf32>
    %612 = arith.mulf %573, %611 : vector<1x128xf32>
    %613 = vector.extract_strided_slice %598 {offsets = [2, 256], sizes = [1, 128], strides = [1, 1]} : vector<3x384xf32> to vector<1x128xf32>
    %614 = arith.negf %613 : vector<1x128xf32>
    %615 = math.exp %614 : vector<1x128xf32>
    %cst_150 = arith.constant 1.000000e+00 : f32
    %616 = vector.broadcast %cst_150 : f32 to vector<1x128xf32>
    %617 = arith.addf %616, %615 : vector<1x128xf32>
    %618 = arith.divf %616, %617 : vector<1x128xf32>
    %619 = arith.mulf %582, %618 : vector<1x128xf32>
    %620 = vector.broadcast %605 : vector<1x128xf32> to vector<4x128xf32>
    %621 = arith.mulf %10, %620 : vector<4x128xf32>
    %622 = vector.broadcast %612 : vector<1x128xf32> to vector<4x128xf32>
    %623 = arith.mulf %21, %622 : vector<4x128xf32>
    %624 = vector.broadcast %619 : vector<1x128xf32> to vector<4x128xf32>
    %625 = arith.mulf %32, %624 : vector<4x128xf32>
    %626 = arith.addf %621, %623 : vector<4x128xf32>
    %627 = arith.addf %626, %625 : vector<4x128xf32>
    %c0_151 = arith.constant 0 : index
    %c0_152 = arith.constant 0 : index
    %628 = vector.load %arg6[%c0_151, %c0_152] : memref<128x5xf32, #tpu.memory_space<vmem>>, vector<128x5xf32>
    %cst_153 = arith.constant dense<0.000000e+00> : vector<4x5xf32>
    %629 = tpu.matmul %627, %628, %cst_153 {dimension_numbers = #tpu.dot_dimension_numbers<[1], [0], [0], [1], [0, 0, 1, 1], [], []>} : vector<4x128xf32>, vector<128x5xf32>, vector<4x5xf32> -> vector<4x5xf32>
    %c0_154 = arith.constant 0 : index
    %c0_155 = arith.constant 0 : index
    %630 = vector.load %arg7[%c0_154, %c0_155] : memref<1x5xf32, #tpu.memory_space<vmem>>, vector<1x5xf32>
    %631 = vector.broadcast %630 : vector<1x5xf32> to vector<4x5xf32>
    %632 = arith.addf %629, %631 : vector<4x5xf32>
    %633 = arith.negf %632 : vector<4x5xf32>
    %634 = math.exp %633 : vector<4x5xf32>
    %cst_156 = arith.constant 1.000000e+00 : f32
    %635 = vector.broadcast %cst_156 : f32 to vector<4x5xf32>
    %636 = arith.addf %635, %634 : vector<4x5xf32>
    %637 = arith.divf %635, %636 : vector<4x5xf32>
    %c0_157 = arith.constant 0 : index
    %c0_158 = arith.constant 0 : index
    %638 = vector.load %arg8[%c0_157, %c0_158] : memref<4x5xf32, #tpu.memory_space<vmem>>, vector<4x5xf32>
    tpu.vector_store %arg8[%c0_157, %c0_158], %637 {strides = array<i32>} : memref<4x5xf32, #tpu.memory_space<vmem>>, vector<4x5xf32>,
    return
  }
}

</mosaic_0001>

<bundles_post_ra>
// kernel: second_edition_forward.1
= control target key start
LH: loop header
LB: loop body
LE: loop exit
PB: predicated region body
PF: predicated region fallthrough
CT: control target
= control target key end

     0   :  { %13 = vsyncpa [#allocation3], 0  ;;  %s6678_s0 = inlined_call_operand.vmem [shape: f32[3,4,16], index: 0, kind: input, shape index: {}]   ;;  %s6679_s1 = inlined_call_operand.hbm [shape: f32[4,8], index: 1, kind: input, shape index: {}]   ;;  %s6680_s2 = inlined_call_operand.hbm [shape: f32[3,16,128], index: 2, kind: input, shape index: {}]   ;;  %s6681_s3 = inlined_call_operand.hbm [shape: f32[3,8,128], index: 3, kind: input, shape index: {}]   ;;  %s6682_s4 = inlined_call_operand.vmem [shape: f32[13,3,6], index: 4, kind: input, shape index: {}]   ;;  %s6683_s5 = inlined_call_operand.hbm [shape: f32[13,128,384], index: 5, kind: input, shape index: {}]   ;;  %s6684_s6 = inlined_call_operand.vmem [shape: f32[128,5], index: 6, kind: input, shape index: {}]   ;;  %s6685_s7 = inlined_call_operand.hbm [shape: f32[1,5], index: 7, kind: input, shape index: {}]   ;;  %s6686_s8 = inlined_call_operand.hbm [shape: f32[4,5], index: 8, kind: output, shape index: {}]  }
   0x1   :  { %14 = vsyncpa [#allocation6], 0 }
   0x2   :  { %15 = vsyncpa [#allocation9], 0 }
   0x3   :  { %16 = vsyncpa [#allocation4], 0  ;;  %s5891_s27 = smov [#allocation5]   ;;  %s5751_s9 = scalar_lea.hbm %s6680_s2, 768 }
   0x4   :  { %s34_s28 = sshll.u32 %s5891_s27, 4  ;;  %p5752_p0 = scmp.ne.s32.totalorder %s6680_s2, %s5751_s9  ;;  %s35_s28 = int_to_ptr.vmem [resolvable:$true] %s34_s28 }
   0x5   :  { %p5755_p1 = scmp.lt.u32.totalorder %s5751_s9, %s6680_s2 }
   0x7   :  { %p5757_p2 = pnand %p5755_p1, %p5752_p0 }
   0x9   :  { %5760 = shalt.err (!%p5757_p2)
}
   0xa   :  { %s5761_s14 = scalar_lea.vmem %s35_s28, 768  ;;  %p5766_p4 = scmp.lt.s32.totalorder %s35_s28, %s35_s28 }
   0xb   :  { %p5762_p3 = scmp.ne.s32.totalorder %s35_s28, %s5761_s14  ;;  %p5767_p5 = scmp.lt.s32.totalorder %s5761_s14, %s5761_s14 }
   0xd   :  { %p5768_p6 = por %p5767_p5, %p5766_p4 }
   0xf   :  { %p5769_p7 = pnand %p5768_p6, %p5762_p3 }
  0x11   :  { %5772 = shalt.err (!%p5769_p7)
}
  0x12   :  { %s5892_s15 = smov 128   ;;  %s5893_s16 = smov 8  }
  0x13   :  { %40 = dma.hbm_to_vmem [thread:$0]  %s6680_s2, 768, %s35_s28, [#allocation6], %s5892_s15, %s5892_s15, %s5893_s16  }
  0x14   :  { %s5894_s19 = smov [#allocation8]   ;;  %s5773_s23 = scalar_lea.hbm %s6683_s5, 79872 }
  0x15   :  { %s60_s20 = sshll.u32 %s5894_s19, 4  ;;  %p5774_p8 = scmp.ne.s32.totalorder %s6683_s5, %s5773_s23  ;;  %s61_s20 = int_to_ptr.vmem [resolvable:$true] %s60_s20 }
  0x16   :  { %p5777_p9 = scmp.lt.u32.totalorder %s5773_s23, %s6683_s5 }
  0x18   :  { %p5779_p10 = pnand %p5777_p9, %p5774_p8 }
  0x1a   :  { %5782 = shalt.err (!%p5779_p10)
}
  0x1b   :  { %s5783_s29 = scalar_lea.vmem %s61_s20, 79872  ;;  %p5788_p12 = scmp.lt.s32.totalorder %s61_s20, %s61_s20 }
  0x1c   :  { %p5784_p11 = scmp.ne.s32.totalorder %s61_s20, %s5783_s29  ;;  %p5789_p13 = scmp.lt.s32.totalorder %s5783_s29, %s5783_s29 }
  0x1e   :  { %p5790_p0 = por %p5789_p13, %p5788_p12 }
  0x20   :  { %p5791_p1 = pnand %p5790_p0, %p5784_p11 }
  0x22   :  { %5794 = shalt.err (!%p5791_p1)
}
  0x23   :  { %s5895_s2 = smov 384   ;;  %s5896_s28 = smov 24  }
  0x24   :  { %66 = dma.hbm_to_vmem [thread:$0]  %s6683_s5, 79872, %s61_s20, [#allocation9], %s5895_s2, %s5895_s2, %s5896_s28  }
  0x25   :  { %s5897_s10 = smov [#allocation2]   ;;  %s5898_s12 = smov [#allocation7]  }
  0x26   :  { %s25_s11 = sshll.u32 %s5897_s10, 4  ;;  %s46_s13 = sshll.u32 %s5898_s12, 4  ;;  %s26_s11 = int_to_ptr.vmem [resolvable:$true] %s25_s11  ;;  %s5982_s13 = int_to_ptr.vmem [resolvable:$true] %s46_s13 }
  0x27   :  { %s5795_s18 = scalar_lea.hbm %s6679_s1, 64 }
  0x28   :  { %p5796_p2 = scmp.ne.s32.totalorder %s6679_s1, %s5795_s18  ;;  %p5799_p3 = scmp.lt.u32.totalorder %s5795_s18, %s6679_s1 }
  0x2a   :  { %p5801_p4 = pnand %p5799_p3, %p5796_p2 }
  0x2c   :  { %5804 = shalt.err (!%p5801_p4)
}
  0x2d   :  { %s5805_s5 = scalar_lea.vmem %s26_s11, 64  ;;  %p5810_p6 = scmp.lt.s32.totalorder %s26_s11, %s26_s11 }
  0x2e   :  { %p5806_p5 = scmp.ne.s32.totalorder %s26_s11, %s5805_s5  ;;  %p5811_p7 = scmp.lt.s32.totalorder %s5805_s5, %s5805_s5 }
  0x30   :  { %p5812_p8 = por %p5811_p7, %p5810_p6 }
  0x32   :  { %p5813_p9 = pnand %p5812_p8, %p5806_p5 }
  0x34   :  { %5816 = shalt.err (!%p5813_p9)
}
  0x35   :  { %28 = dma.hbm_to_vmem [thread:$0]  %s6679_s1, 64, %s26_s11, [#allocation3]  }
  0x36   :  { %s5817_s27 = scalar_lea.hbm %s6681_s3, 384 }
  0x37   :  { %p5818_p10 = scmp.ne.s32.totalorder %s6681_s3, %s5817_s27  ;;  %p5821_p11 = scmp.lt.u32.totalorder %s5817_s27, %s6681_s3 }
  0x39   :  { %p5823_p12 = pnand %p5821_p11, %p5818_p10 }
  0x3b   :  { %5826 = shalt.err (!%p5823_p12)
}
  0x3c   :  { %s5827_s9 = scalar_lea.vmem %s5982_s13, 384  ;;  %p5832_p0 = scmp.lt.s32.totalorder %s5982_s13, %s5982_s13 }
  0x3d   :  { %p5828_p13 = scmp.ne.s32.totalorder %s5982_s13, %s5827_s9  ;;  %p5833_p1 = scmp.lt.s32.totalorder %s5827_s9, %s5827_s9 }
  0x3f   :  { %p5834_p2 = por %p5833_p1, %p5832_p0 }
  0x41   :  { %p5835_p3 = pnand %p5834_p2, %p5828_p13 }
  0x43   :  { %5838 = shalt.err (!%p5835_p3)
}
  0x44   :  { %52 = dma.hbm_to_vmem [thread:$0]  %s6681_s3, 384, %s5982_s13, [#allocation6], %s5892_s15, %s5892_s15, %s5893_s16  }
  0x45   :  { %s5899_s11 = smov [#allocation10]   ;;  %s5839_s18 = scalar_lea.hbm %s6685_s7, 16 }
  0x46   :  { %s75_s12 = sshll.u32 %s5899_s11, 4  ;;  %p5840_p4 = scmp.ne.s32.totalorder %s6685_s7, %s5839_s18  ;;  %s76_s12 = int_to_ptr.vmem [resolvable:$true] %s75_s12 }
  0x47   :  { %p5843_p5 = scmp.lt.u32.totalorder %s5839_s18, %s6685_s7 }
  0x49   :  { %p5845_p6 = pnand %p5843_p5, %p5840_p4 }
  0x4b   :  { %5848 = shalt.err (!%p5845_p6)
}
  0x4c   :  { %s5849_s5 = scalar_lea.vmem %s76_s12, 16  ;;  %s5853_s3 = scalar_lea.vmem %s76_s12, 32 }
  0x4d   :  { %p5850_p7 = scmp.ne.s32.totalorder %s76_s12, %s5849_s5  ;;  %p5854_p8 = scmp.lt.s32.totalorder %s76_s12, %s76_s12 }
  0x4e   :  { %p5855_p9 = scmp.lt.s32.totalorder %s5853_s3, %s5849_s5 }
  0x50   :  { %p5856_p10 = por %p5855_p9, %p5854_p8 }
  0x52   :  { %p5857_p11 = pnand %p5856_p10, %p5850_p7 }
  0x54   :  { %5860 = shalt.err (!%p5857_p11)
}
  0x55   :  { %78 = dma.hbm_to_vmem [thread:$0]  %s6685_s7, 16, %s76_s12, [#allocation9]  }
  0x56   :  { %5883 = dma.done.wait [#allocation3], 64  }
  0x57   :  { %5884 = vsyncadd [#allocation3], 4294967232 }
  0x58   :  { %5885 = dma.done.wait [#allocation6], 1152  }
  0x59   :  { %5886 = vsyncadd [#allocation6], 4294966144 }
  0x5a   :  { %5887 = dma.done.wait [#allocation9], 79888  }
  0x5b   :  { %5888 = vsyncadd [#allocation9], 4294887408  ;;  %v5900_v0 = vmov 0.0   ;;  %vm5901_vm0 = vmmov 0   ;;  %v5902_v1 = vmov 0   ;;  %v5903_v2 = vmov 2  }
  0x5c   :  { %4231 = vmatprep.subr.mxu0 %v5900_v0  ;;  %4233 = vmatprep.mubr.msk.f32.mxu0 %vm5901_vm0, %v5900_v0  ;;  %vm99_vm1 = vcmask 64512   ;;  %v98_v3 = vld [vmem:[#allocation7] sm:$0xff]  ;;  %v94_v4 = vld [vmem:[#allocation2] sm:$0xf]  ;;  %v96_v5 = vld [vmem:[#allocation5] sm:$0xff]  ;;  %v5904_v7 = vmov 0.0|0.0  }
  0x5d   :  { %5543 = vset.pattern.permute.xlu0 %v5902_v1  ;;  %5545 = vset.pattern.permute.xlu1 %v5903_v2  ;;  %v97_v6 = vld [vmem:[#allocation5 + $0x8] sm:$0xff]  ;;  %v550_v9 = vld [vmem:[%s6682_s4] sm:$0x7]  ;;  %vm173_vm2 = vcmask 130048   ;;  %v251_v12 = vld [vmem:[#allocation5 + $0x10] sm:$0xff]  ;;  %v5905_v14 = vmov 1  }
  0x5e   :  { %681 = vmatprep.mubr.f32.mxu1 %v5900_v0  ;;  %4232 = vmatpush3.msra.mxu0 %v98_v3  ;;  %v4758_v8 = vpack.c.bf16 %v97_v6, %v96_v5  ;;  %v95_v10 = vld [vmem:[%s6678_s0] sm:$0xf]  ;;  %v3919_v16 = vld [vmem:[%s6678_s0 + $0x4] sm:$0xf]  ;;  %v403_v19 = vld [vmem:[#allocation5 + $0x28] sm:$0xff]  ;;  %vm3898_vm3 = vcmask 35840  }
  0x5f   :  { %4234 = vmatmul.mubr.msk.f32.vlgmr.msra.gmra.mrb[0].mxu0 %vm99_vm1, %v94_v4  ;;  %4757 = vmatprep.subr.bf16.mxu0 %v5904_v7  ;;  %v254_v11 = vld [vmem:[#allocation7 + $0x8] sm:$0xff]  ;;  %v405_v17 = vld [vmem:[#allocation7 + $0x10] sm:$0xff]  ;;  %v570_v22 = vld [vmem:[#allocation8 + $0x8] sm:$0xff] }
  0x60   :  { %4240 = vmatprep.mubr.msk.f32.mxu0 %vm5901_vm0, %v5900_v0  ;;  %4759 = vmatpush3.bf16.msra.mxu0 %v4758_v8  ;;  %v252_v13 = vld [vmem:[#allocation5 + $0x18] sm:$0xff]  ;;  %v402_v18 = vld [vmem:[#allocation5 + $0x20] sm:$0xff]  ;;  %v573_v23 = vld [vmem:[#allocation8 + $0x20] sm:$0xff] }
  0x61   :  { %4243 = vmatprep.subr.mxu0 %v5900_v0  ;;  %553 = vperm.xlu0 %5543, %v550_v9   ;;  %v4761_v15 = vpack.c.bf16 %v252_v13, %v251_v12  ;;  %v4764_v20 = vpack.c.bf16 %v403_v19, %v402_v18  ;;  %v3922_v21 = vld [vmem:[%s6678_s0 + $0x8] sm:$0xf]  ;;  %v569_v24 = vld [vmem:[#allocation8] sm:$0xff]  ;;  %v4766_v25 = vpack.c.bf16 %v573_v23, %v570_v22  ;;  %v571_v27 = vld [vmem:[#allocation8 + $0x10] sm:$0xff] }
  0x62   :  { %563 = vperm.xlu1 %5545, %v550_v9   ;;  %v572_v26 = vld [vmem:[#allocation8 + $0x18] sm:$0xff]  ;;  %v574_v28 = vld [vmem:[#allocation8 + $0x28] sm:$0xff]  ;;  %v579_v32 = vld [vmem:[#allocation8 + $0x50] sm:$0xff] }
  0x63   :  { %v4768_v29 = vpack.c.bf16 %v572_v26, %v569_v24  ;;  %v4799_v30 = vpack.c.bf16 %v574_v28, %v571_v27  ;;  %4767 = vmatprep.subr.bf16.mxu1 %v4766_v25  ;;  %v576_v31 = vld [vmem:[#allocation8 + $0x38] sm:$0xff]  ;;  %v575_v34 = vld [vmem:[#allocation8 + $0x30] sm:$0xff]  ;;  %v578_v35 = vld [vmem:[#allocation8 + $0x48] sm:$0xff] }
  0x64   :  { %v4770_v33 = vpack.c.bf16 %v579_v32, %v576_v31  ;;  %v577_v36 = vld [vmem:[#allocation8 + $0x40] sm:$0xff]  ;;  %v4772_v37 = vpack.c.bf16 %v578_v35, %v575_v34  ;;  %v580_v38 = vld [vmem:[#allocation8 + $0x58] sm:$0xff]  ;;  %v582_v40 = vld [vmem:[#allocation8 + $0x68] sm:$0xff] }
  0x65   :  { %5544 = vset.pattern.permute.xlu0 %v5905_v14  ;;  %4769 = vmatpush1.bf16.msra.mxu1 %v4768_v29  ;;  %v4802_v39 = vpack.c.bf16 %v580_v38, %v577_v36  ;;  %v585_v41 = vld [vmem:[#allocation8 + $0x80] sm:$0xff]  ;;  %v584_v44 = vld [vmem:[#allocation8 + $0x78] sm:$0xff]  ;;  %v583_v45 = vld [vmem:[#allocation8 + $0x70] sm:$0xff] }
  0x66   :  { %558 = vperm.xlu0 %5544, %v550_v9   ;;  %5546 = vset.pattern.permute.xlu1 %v5902_v1  ;;  %v581_v42 = vld [vmem:[#allocation8 + $0x60] sm:$0xff]  ;;  %v4774_v43 = vpack.c.bf16 %v585_v41, %v582_v40  ;;  %v586_v46 = vld [vmem:[#allocation8 + $0x88] sm:$0xff]  ;;  %v588_v49 = vld [vmem:[#allocation8 + $0x98] sm:$0xff] }
  0x67   :  { %4241 = vmatmul.mubr.msk.f32.vlgmr.msra.gmra.mrb[0].mxu0 %vm173_vm2, %v95_v10  ;;  %4771 = vmatprep.subr.bf16.mxu1 %v4770_v33  ;;  %v4776_v47 = vpack.c.bf16 %v584_v44, %v581_v42  ;;  %v4805_v48 = vpack.c.bf16 %v586_v46, %v583_v45  ;;  %v591_v50 = vld [vmem:[#allocation8 + $0xb0] sm:$0xff]  ;;  %v590_v53 = vld [vmem:[#allocation8 + $0xa8] sm:$0xff]  ;;  %v589_v54 = vld [vmem:[#allocation8 + $0xa0] sm:$0xff] }
  0x68   :  { %4244 = vmatpush3.msra.mxu0 %v254_v11  ;;  %4245 = vmatprep.mubr.msk.f32.mxu0 %vm5901_vm0, %v5900_v0  ;;  %v587_v51 = vld [vmem:[#allocation8 + $0x90] sm:$0xff]  ;;  %v4778_v52 = vpack.c.bf16 %v591_v50, %v588_v49  ;;  %v592_v55 = vld [vmem:[#allocation8 + $0xb8] sm:$0xff]  ;;  %v594_v58 = vld [vmem:[#allocation8 + $0xc8] sm:$0xff] }
  0x69   :  { %4760 = vmatprep.subr.bf16.mxu0 %v5904_v7  ;;  %4773 = vmatpush1.bf16.msra.mxu1 %v4772_v37  ;;  %v4780_v56 = vpack.c.bf16 %v590_v53, %v587_v51  ;;  %v4808_v57 = vpack.c.bf16 %v592_v55, %v589_v54  ;;  %v597_v59 = vld [vmem:[#allocation8 + $0xe0] sm:$0xff]  ;;  %v596_v62 = vld [vmem:[#allocation8 + $0xd8] sm:$0xff]  ;;  %v595_v63 = vld [vmem:[#allocation8 + $0xd0] sm:$0xff] }
  0x6a   :  { %5548 = vset.pattern.permute.xlu0 %v5903_v2  ;;  %4775 = vmatprep.subr.bf16.mxu1 %v4774_v43  ;;  %v4782_v60 = vpack.c.bf16 %v597_v59, %v594_v58  ;;  %v593_v61 = vld [vmem:[#allocation8 + $0xc0] sm:$0xff]  ;;  %v600_v6 = vld [vmem:[#allocation8 + $0xf8] sm:$0xff]  ;;  %v603_v8 = vld [vmem:[#allocation8 + $0x110] sm:$0xff] }
  0x6b   :  { %4246 = vmatmul.mubr.msk.f32.vlgmr.msra.gmra.mrb[2].mxu0 %vm99_vm1, %v94_v4  ;;  %v4784_v3 = vpack.c.bf16 %v596_v62, %v593_v61  ;;  %v4786_v9 = vpack.c.bf16 %v603_v8, %v600_v6  ;;  %v599_v10 = vld [vmem:[#allocation8 + $0xf0] sm:$0xff]  ;;  %v602_v11 = vld [vmem:[#allocation8 + $0x108] sm:$0xff]  ;;  %v601_v12 = vld [vmem:[#allocation8 + $0x100] sm:$0xff] }
  0x6c   :  { %4762 = vmatpush3.bf16.msra.mxu0 %v4761_v15  ;;  %4252 = vmatprep.mubr.msk.f32.mxu0 %vm5901_vm0, %v5900_v0  ;;  %v4788_v13 = vpack.c.bf16 %v602_v11, %v599_v10  ;;  %v604_v15 = vld [vmem:[#allocation8 + $0x118] sm:$0xff]  ;;  %v607_v22 = vld [vmem:[#allocation8 + $0x130] sm:$0xff]  ;;  %v610_v24 = vld [vmem:[#allocation8 + $0x148] sm:$0xff] }
  0x6d   :  { %4255 = vmatprep.subr.mxu0 %v5900_v0  ;;  %4777 = vmatpush1.bf16.msra.mxu1 %v4776_v47  ;;  %v4814_v18 = vpack.c.bf16 %v604_v15, %v601_v12  ;;  %v4817_v25 = vpack.c.bf16 %v610_v24, %v607_v22  ;;  %v612_v26 = vld [vmem:[#allocation8 + $0x158] sm:$0xff]  ;;  %v615_v27 = vld [vmem:[#allocation8 + $0x170] sm:$0xff]  ;;  %v613_v31 = vld [vmem:[#allocation8 + $0x160] sm:$0xff] }
  0x6e   :  { %4779 = vmatprep.subr.bf16.mxu1 %v4778_v52  ;;  %v4794_v28 = vpack.c.bf16 %v615_v27, %v612_v26  ;;  %v611_v29 = vld [vmem:[#allocation8 + $0x150] sm:$0xff]  ;;  %v616_v33 = vld [vmem:[#allocation8 + $0x178] sm:$0xff]  ;;  %v3936_v37 = vld [vmem:[%s6682_s4 + $0xc] sm:$0x7] }
  0x6f   :  { %v4820_v34 = vpack.c.bf16 %v616_v33, %v613_v31  ;;  %v3928_v35 = vld [vmem:[%s6682_s4 + $0x4] sm:$0x7]  ;;  %v3932_v36 = vld [vmem:[%s6682_s4 + $0x8] sm:$0x7]  ;;  %v6096_v38 = vld [vmem:[%s6682_s4 + $0x10] sm:$0x7] }
  0x70   :  { %795 = vperm.xlu1 %5546, %v3928_v35   ;;  %805 = vperm.xlu0 %5548, %v3928_v35   ;;  %v812_v59 = vld [vmem:[#allocation8 + $0x180] sm:$0xff]  ;;  %v814_v61 = vld [vmem:[#allocation8 + $0x190] sm:$0xff]  ;;  %v823_v12 = vld [vmem:[#allocation8 + $0x1d8] sm:$0xff] }
  0x71   :  { %4781 = vmatpush1.bf16.msra.mxu1 %v4780_v56  ;;  %v813_v56 = vld [vmem:[#allocation8 + $0x188] sm:$0xff]  ;;  %v818_v8 = vld [vmem:[#allocation8 + $0x1b0] sm:$0xff]  ;;  %v820_v10 = vld [vmem:[#allocation8 + $0x1c0] sm:$0xff] }
  0x72   :  { %4783 = vmatprep.subr.bf16.mxu1 %v4782_v60  ;;  %v815_v60 = vld [vmem:[#allocation8 + $0x198] sm:$0xff]  ;;  %v825_v15 = vld [vmem:[#allocation8 + $0x1e8] sm:$0xff]  ;;  %v830_v27 = vld [vmem:[#allocation8 + $0x210] sm:$0xff] }
  0x73   :  { %4253 = vmatmul.mubr.msk.f32.vlgmr.msra.gmra.mrb[2].mxu0 %vm173_vm2, %v3919_v16  ;;  %v606_v16 = vld [vmem:[#allocation8 + $0x128] sm:$0xff]  ;;  %v4824_v62 = vpack.c.bf16 %v815_v60, %v812_v59  ;;  %v831_v24 = vld [vmem:[#allocation8 + $0x218] sm:$0xff]  ;;  %v850_v60 = vld [vmem:[#allocation8 + $0x2b0] sm:$0xff] }
  0x74   :  { %4256 = vmatpush3.msra.mxu0 %v405_v17  ;;  %4257 = vmatprep.mubr.msk.f32.mxu0 %vm5901_vm0, %v5900_v0  ;;  %v609_v17 = vld [vmem:[#allocation8 + $0x140] sm:$0xff]  ;;  %v829_v22 = vld [vmem:[#allocation8 + $0x208] sm:$0xff]  ;;  %v835_v31 = vld [vmem:[#allocation8 + $0x238] sm:$0xff] }
  0x75   :  { %4763 = vmatprep.subr.bf16.mxu0 %v5904_v7  ;;  %4785 = vmatpush1.bf16.msra.mxu1 %v4784_v3  ;;  %v4790_v19 = vpack.c.bf16 %v609_v17, %v606_v16  ;;  %v828_v16 = vld [vmem:[#allocation8 + $0x200] sm:$0xff]  ;;  %v837_v33 = vld [vmem:[#allocation8 + $0x248] sm:$0xff]  ;;  %v851_v59 = vld [vmem:[#allocation8 + $0x2b8] sm:$0xff] }
  0x76   :  { %4787 = vmatprep.subr.bf16.mxu1 %v4786_v9  ;;  %5547 = vset.pattern.permute.xlu1 %v5905_v14  ;;  %v821_v9 = vld [vmem:[#allocation8 + $0x1c8] sm:$0xff]  ;;  %v4830_v17 = vpack.c.bf16 %v828_v16, %v825_v15 }
  0x77   :  { %4258 = vmatmul.mubr.msk.f32.vlgmr.msra.gmra.mrb[4].mxu0 %vm99_vm1, %v94_v4  ;;  %v598_v4 = vld [vmem:[#allocation8 + $0xe8] sm:$0xff]  ;;  %1051 = vperm.xlu0 %5548, %v3932_v36   ;;  %v4828_v11 = vpack.c.bf16 %v821_v9, %v818_v8  ;;  %v856_v9 = vld [vmem:[#allocation8 + $0x2e0] sm:$0xff] }
  0x78   :  { %4765 = vmatpush3.bf16.msra.mxu0 %v4764_v20  ;;  %4264 = vmatprep.mubr.msk.f32.mxu0 %vm5901_vm0, %v5900_v0  ;;  %v4811_v5 = vpack.c.bf16 %v598_v4, %v595_v63  ;;  %v605_v20 = vld [vmem:[#allocation8 + $0x120] sm:$0xff]  ;;  %v817_v63 = vld [vmem:[#allocation8 + $0x1a8] sm:$0xff]  ;;  %v819_v4 = vld [vmem:[#allocation8 + $0x1b8] sm:$0xff] }
  0x79   :  { %4798 = vmatprep.subr.bf16.mxu0 %v5904_v7  ;;  %4789 = vmatpush1.bf16.msra.mxu1 %v4788_v13  ;;  %v4855_v3 = vpack.c.bf16 %v817_v63, %v814_v61  ;;  %v4858_v13 = vpack.c.bf16 %v823_v12, %v820_v10  ;;  %v857_v8 = vld [vmem:[#allocation8 + $0x2e8] sm:$0xff] }
  0x7a   :  { %4791 = vmatprep.subr.bf16.mxu1 %v4790_v19  ;;  %800 = vperm.xlu1 %5547, %v3928_v35   ;;  %v827_v19 = vld [vmem:[#allocation8 + $0x1f8] sm:$0xff] }
  0x7b   :  { %5552 = vset.pattern.permute.xlu0 %v5905_v14 }
  0x7c   :  { %1292 = vperm.xlu0 %5552, %v3936_v37  }
  0x7e   :  { %5549 = vset.pattern.permute.xlu1 %v5902_v1 }
  0x7f   :  { %4265 = vmatmul.mubr.msk.f32.vlgmr.msra.gmra.mrb[4].mxu0 %vm173_vm2, %v3922_v21  ;;  %v608_v21 = vld [vmem:[#allocation8 + $0x138] sm:$0xff]  ;;  %1041 = vperm.xlu1 %5549, %v3932_v36  }
  0x80   :  { %4299 = vmatprep.mubr.msk.f32.mxu0 %vm5901_vm0, %v5900_v0  ;;  %4800 = vmatpush3.bf16.msra.mxu0 %v4799_v30  ;;  %v4792_v23 = vpack.c.bf16 %v608_v21, %v605_v20  ;;  %v614_v30 = vld [vmem:[#allocation8 + $0x168] sm:$0xff]  ;;  %v826_v20 = vld [vmem:[#allocation8 + $0x1f0] sm:$0xff] }
  0x81   :  { %4801 = vmatprep.subr.bf16.mxu0 %v5904_v7  ;;  %v4796_v32 = vpack.c.bf16 %v614_v30, %v611_v29  ;;  %1538 = vperm.xlu0 %5552, %v6096_v38   ;;  %v832_v29 = vld [vmem:[#allocation8 + $0x220] sm:$0xff] }
  0x82   :  { %4793 = vmatpush1.bf16.msra.mxu1 %v4792_v23  ;;  %v4861_v23 = vpack.c.bf16 %v829_v22, %v826_v20 }
  0x83   :  { %4795 = vmatprep.subr.bf16.mxu1 %v4794_v28  ;;  %5550 = vset.pattern.permute.xlu1 %v5905_v14  ;;  %v833_v28 = vld [vmem:[#allocation8 + $0x228] sm:$0xff] }
  0x84   :  { %4803 = vmatpush3.bf16.msra.mxu0 %v4802_v39  ;;  %1046 = vperm.xlu1 %5550, %v3932_v36   ;;  %v4836_v30 = vpack.c.bf16 %v833_v28, %v830_v27  ;;  %v836_v36 = vld [vmem:[#allocation8 + $0x240] sm:$0xff] }
  0x85   :  { %4804 = vmatprep.subr.bf16.mxu0 %v5904_v7 }
  0x86   :  { %4797 = vmatpush1.bf16.msra.mxu1 %v4796_v32  ;;  %v4864_v32 = vpack.c.bf16 %v835_v31, %v832_v29 }
  0x88   :  { %4806 = vmatpush3.bf16.msra.mxu0 %v4805_v48  ;;  %5551 = vset.pattern.permute.xlu1 %v5902_v1 }
  0x89   :  { %4807 = vmatprep.subr.bf16.mxu0 %v5904_v7  ;;  %1287 = vperm.xlu1 %5551, %v3936_v37  }
  0x8c   :  { %4809 = vmatpush3.bf16.msra.mxu0 %v4808_v57  ;;  %v816_v57 = vld [vmem:[#allocation8 + $0x1a0] sm:$0xff] }
  0x8d   :  { %4810 = vmatprep.subr.bf16.mxu0 %v5904_v7  ;;  %5553 = vset.pattern.permute.xlu1 %v5903_v2  ;;  %v4822_v58 = vpack.c.bf16 %v816_v57, %v813_v56  ;;  %v852_v56 = vld [vmem:[#allocation8 + $0x2c0] sm:$0xff] }
  0x8e   :  { %1297 = vperm.xlu1 %5553, %v3936_v37   ;;  %v839_v37 = vld [vmem:[#allocation8 + $0x258] sm:$0xff] }
  0x8f   :  { %4823 = vmatprep.subr.bf16.mxu1 %v4822_v58  ;;  %v848_v58 = vld [vmem:[#allocation8 + $0x2a0] sm:$0xff] }
  0x90   :  { %4812 = vmatpush3.bf16.msra.mxu0 %v4811_v5  ;;  %v822_v5 = vld [vmem:[#allocation8 + $0x1d0] sm:$0xff]  ;;  %v4848_v61 = vpack.c.bf16 %v851_v59, %v848_v58 }
  0x91   :  { %4813 = vmatprep.subr.bf16.mxu0 %v5904_v7  ;;  %v4826_v6 = vpack.c.bf16 %v822_v5, %v819_v4  ;;  %v858_v4 = vld [vmem:[#allocation8 + $0x2f0] sm:$0xff] }
  0x92   :  { %5554 = vset.pattern.permute.xlu1 %v5902_v1  ;;  %v1060_v58 = vld [vmem:[#allocation8 + $0x310] sm:$0xff] }
  0x93   :  { %1533 = vperm.xlu1 %5554, %v6096_v38  }
  0x94   :  { %4815 = vmatpush3.bf16.msra.mxu0 %v4814_v18  ;;  %v824_v18 = vld [vmem:[#allocation8 + $0x1e0] sm:$0xff] }
  0x95   :  { %4816 = vmatprep.subr.bf16.mxu0 %v5904_v7  ;;  %v4832_v21 = vpack.c.bf16 %v827_v19, %v824_v18 }
  0x97   :  { %5555 = vset.pattern.permute.xlu1 %v5903_v2 }
  0x98   :  { %4818 = vmatpush3.bf16.msra.mxu0 %v4817_v25  ;;  %1543 = vperm.xlu1 %5555, %v6096_v38   ;;  %v834_v25 = vld [vmem:[#allocation8 + $0x230] sm:$0xff] }
  0x99   :  { %4819 = vmatprep.subr.bf16.mxu0 %v5904_v7  ;;  %v4834_v26 = vpack.c.bf16 %v834_v25, %v831_v24 }
  0x9c   :  { %4821 = vmatpush3.bf16.msra.mxu0 %v4820_v34  ;;  %v840_v34 = vld [vmem:[#allocation8 + $0x260] sm:$0xff] }
  0x9d   :  { %4854 = vmatprep.subr.bf16.mxu0 %v5904_v7  ;;  %v4838_v35 = vpack.c.bf16 %v840_v34, %v837_v33 }
  0xe0   :  { %v554_v44 = vpop.permute.xlu0 %553 }
  0xe1   :  { %v564_v50 = vpop.permute.xlu1 %563 }
  0xe5   :  { %v559_v47 = vpop.permute.xlu0 %558 }
  0xef   :  { %v796_v33 = vpop.permute.xlu1 %795 }
 0x13a   :  { %v243_v39 = vpop.f32.mrb[0].mxu0 }
 0x13b   :  { %v4242_v40 = vpop.f32.mrb[1].mxu0 }
 0x13c   :  { %v4840_v40 = vpack.c.bf16 %v839_v37, %v836_v36 }
 0x146   :  { %v394_v41 = vpop.f32.mrb[2].mxu0 }
 0x147   :  { %v4254_v42 = vpop.f32.mrb[3].mxu0  ;;  %5585 = vtanh.f32 %v394_v41  ;;  %v841_v41 = vld [vmem:[#allocation8 + $0x268] sm:$0xff] }
 0x148   :  { %5587 = vtanh.f32 %v243_v39  ;;  %v838_v39 = vld [vmem:[#allocation8 + $0x250] sm:$0xff] }
 0x149   :  { %v4867_v42 = vpack.c.bf16 %v841_v41, %v838_v39 }
 0x151   :  { %v6106_v46 = vpop.eup %5585 }
 0x152   :  { %v545_v43 = vpop.f32.mrb[4].mxu0  ;;  %v6108_v48 = vpop.eup %5587  ;;  %v561_v49 = vmul.f32 %v6106_v46, %v559_v47  ;;  %v842_v47 = vld [vmem:[#allocation8 + $0x270] sm:$0xff] }
 0x153   :  { %5589 = vtanh.f32 %v545_v43  ;;  %v4266_v45 = vpop.f32.mrb[5].mxu0  ;;  %v556_v51 = vmul.f32 %v6108_v48, %v554_v44  ;;  %v843_v43 = vld [vmem:[#allocation8 + $0x278] sm:$0xff]  ;;  %v846_v44 = vld [vmem:[#allocation8 + $0x290] sm:$0xff] }
 0x154   :  { %v4842_v45 = vpack.c.bf16 %v846_v44, %v843_v43  ;;  %v801_v44 = vpop.permute.xlu1 %800 }
 0x155   :  { %v567_v53 = vadd.f32 %v561_v49, %v556_v51  ;;  %v845_v49 = vld [vmem:[#allocation8 + $0x288] sm:$0xff] }
 0x156   :  { %v4844_v51 = vpack.c.bf16 %v845_v49, %v842_v47  ;;  %v806_v47 = vpop.permute.xlu0 %805 }
 0x15d   :  { %v6112_v52 = vpop.eup %5589 }
 0x15e   :  { %v566_v54 = vmul.f32 %v6112_v52, %v564_v50  ;;  %v844_v50 = vld [vmem:[#allocation8 + $0x280] sm:$0xff] }
 0x160   :  { %v568_v55 = vadd.f32 %v567_v53, %v566_v54  ;;  %v847_v53 = vld [vmem:[#allocation8 + $0x298] sm:$0xff] }
 0x161   :  { %v4870_v54 = vpack.c.bf16 %v847_v53, %v844_v50  ;;  %v1059_v53 = vld [vmem:[#allocation8 + $0x308] sm:$0xff] }
 0x162   :  { %682 = vmatmul.mubr.f32.vlgmr.msra.gmra.mrb[0].mxu1 %v568_v55  ;;  %4300 = vmatmul.mubr.f32.vlgmr.msra.gmra.mrb[6].mxu0 %v568_v55  ;;  %v849_v55 = vld [vmem:[#allocation8 + $0x2a8] sm:$0xff] }
 0x163   :  { %924 = vmatprep.mubr.f32.mxu1 %v5900_v0  ;;  %4334 = vmatprep.mubr.msk.f32.mxu0 %vm5901_vm0, %v5900_v0  ;;  %v4846_v57 = vpack.c.bf16 %v852_v56, %v849_v55  ;;  %v1058_v56 = vld [vmem:[#allocation8 + $0x300] sm:$0xff] }
 0x164   :  { %4825 = vmatpush1.bf16.msra.mxu1 %v4824_v62  ;;  %4856 = vmatpush3.bf16.msra.mxu0 %v4855_v3  ;;  %v853_v62 = vld [vmem:[#allocation8 + $0x2c8] sm:$0xff]  ;;  %v855_v3 = vld [vmem:[#allocation8 + $0x2d8] sm:$0xff] }
 0x165   :  { %4857 = vmatprep.subr.bf16.mxu0 %v5904_v7  ;;  %4827 = vmatprep.subr.bf16.mxu1 %v4826_v6  ;;  %v4873_v63 = vpack.c.bf16 %v853_v62, %v850_v60  ;;  %v4850_v5 = vpack.c.bf16 %v858_v4, %v855_v3  ;;  %v854_v6 = vld [vmem:[#allocation8 + $0x2d0] sm:$0xff]  ;;  %v1063_v60 = vld [vmem:[#allocation8 + $0x328] sm:$0xff]  ;;  %v1065_v62 = vld [vmem:[#allocation8 + $0x338] sm:$0xff] }
 0x166   :  { %v4852_v10 = vpack.c.bf16 %v857_v8, %v854_v6  ;;  %v1064_v4 = vld [vmem:[#allocation8 + $0x330] sm:$0xff]  ;;  %v1066_v6 = vld [vmem:[#allocation8 + $0x340] sm:$0xff] }
 0x168   :  { %4829 = vmatpush1.bf16.msra.mxu1 %v4828_v11  ;;  %4859 = vmatpush3.bf16.msra.mxu0 %v4858_v13  ;;  %v859_v11 = vld [vmem:[#allocation8 + $0x2f8] sm:$0xff] }
 0x169   :  { %4860 = vmatprep.subr.bf16.mxu0 %v5904_v7  ;;  %4831 = vmatprep.subr.bf16.mxu1 %v4830_v17  ;;  %v4876_v12 = vpack.c.bf16 %v859_v11, %v856_v9  ;;  %v1069_v9 = vld [vmem:[#allocation8 + $0x358] sm:$0xff]  ;;  %v1071_v11 = vld [vmem:[#allocation8 + $0x368] sm:$0xff] }
 0x16c   :  { %4833 = vmatpush1.bf16.msra.mxu1 %v4832_v21  ;;  %4862 = vmatpush3.bf16.msra.mxu0 %v4861_v23 }
 0x16d   :  { %4863 = vmatprep.subr.bf16.mxu0 %v5904_v7  ;;  %4835 = vmatprep.subr.bf16.mxu1 %v4834_v26  ;;  %v764_v26 = vlaneseq }
 0x16f   :  { %v765_v28 = vshrl.u32 %v764_v26, 7  ;;  %v1078_v26 = vld [vmem:[#allocation8 + $0x3a0] sm:$0xff] }
 0x170   :  { %4837 = vmatpush1.bf16.msra.mxu1 %v4836_v30  ;;  %4865 = vmatpush3.bf16.msra.mxu0 %v4864_v32 }
 0x171   :  { %4866 = vmatprep.subr.bf16.mxu0 %v5904_v7  ;;  %4839 = vmatprep.subr.bf16.mxu1 %v4838_v35  ;;  %v6126_v29 = vsub.s32 0, %v765_v28  ;;  %v6128_v30 = vsub.s32 2, %v765_v28  ;;  %v6130_v31 = vsub.s32 1, %v765_v28  ;;  %v1081_v28 = vld [vmem:[#allocation8 + $0x3b8] sm:$0xff] }
 0x174   :  { %4841 = vmatpush1.bf16.msra.mxu1 %v4840_v40  ;;  %4868 = vmatpush3.bf16.msra.mxu0 %v4867_v42 }
 0x175   :  { %4869 = vmatprep.subr.bf16.mxu0 %v5904_v7  ;;  %4843 = vmatprep.subr.bf16.mxu1 %v4842_v45 }
 0x178   :  { %4845 = vmatpush1.bf16.msra.mxu1 %v4844_v51  ;;  %4871 = vmatpush3.bf16.msra.mxu0 %v4870_v54  ;;  %v1062_v54 = vld [vmem:[#allocation8 + $0x320] sm:$0xff] }
 0x179   :  { %4872 = vmatprep.subr.bf16.mxu0 %v5904_v7  ;;  %4847 = vmatprep.subr.bf16.mxu1 %v4846_v57  ;;  %v4878_v55 = vpack.c.bf16 %v1062_v54, %v1059_v53  ;;  %v1061_v57 = vld [vmem:[#allocation8 + $0x318] sm:$0xff]  ;;  %v1092_v53 = vld [vmem:[#allocation8 + $0x410] sm:$0xff] }
 0x17a   :  { %v4880_v59 = vpack.c.bf16 %v1061_v57, %v1058_v56  ;;  %v1091_v56 = vld [vmem:[#allocation8 + $0x408] sm:$0xff]  ;;  %v1090_v57 = vld [vmem:[#allocation8 + $0x400] sm:$0xff] }
 0x17c   :  { %4849 = vmatpush1.bf16.msra.mxu1 %v4848_v61  ;;  %4874 = vmatpush3.bf16.msra.mxu0 %v4873_v63  ;;  %v4911_v61 = vpack.c.bf16 %v1063_v60, %v1060_v58  ;;  %v1068_v63 = vld [vmem:[#allocation8 + $0x350] sm:$0xff] }
 0x17d   :  { %4875 = vmatprep.subr.bf16.mxu0 %v5904_v7  ;;  %4851 = vmatprep.subr.bf16.mxu1 %v4850_v5  ;;  %v4882_v3 = vpack.c.bf16 %v1068_v63, %v1065_v62  ;;  %v1067_v5 = vld [vmem:[#allocation8 + $0x348] sm:$0xff]  ;;  %v1098_v62 = vld [vmem:[#allocation8 + $0x440] sm:$0xff] }
 0x17e   :  { %v4884_v8 = vpack.c.bf16 %v1067_v5, %v1064_v4  ;;  %v1097_v4 = vld [vmem:[#allocation8 + $0x438] sm:$0xff]  ;;  %v1096_v5 = vld [vmem:[#allocation8 + $0x430] sm:$0xff] }
 0x180   :  { %4853 = vmatpush1.bf16.msra.mxu1 %v4852_v10  ;;  %4877 = vmatpush3.bf16.msra.mxu0 %v4876_v12  ;;  %v4914_v10 = vpack.c.bf16 %v1069_v9, %v1066_v6  ;;  %v1074_v12 = vld [vmem:[#allocation8 + $0x380] sm:$0xff]  ;;  %v1101_v9 = vld [vmem:[#allocation8 + $0x458] sm:$0xff] }
 0x181   :  { %4910 = vmatprep.subr.bf16.mxu0 %v5904_v7  ;;  %4879 = vmatprep.subr.bf16.mxu1 %v4878_v55  ;;  %v1088_v55 = vld [vmem:[#allocation8 + $0x3f0] sm:$0xff] }
 0x182   :  { %v4900_v58 = vpack.c.bf16 %v1091_v56, %v1088_v55 }
 0x235   :  { %v683_v13 = vpop.f32.mrb[0].mxu1  ;;  %v754_v15 = vpop.f32.mrb[6].mxu0 }
 0x236   :  { %v3925_v16 = vmul.f32 -1.442695, %v683_v13  ;;  %v3927_v17 = vmul.f32 -1.442695, %v754_v15  ;;  %v685_v18 = vpop.f32.mrb[1].mxu1  ;;  %v4301_v19 = vpop.f32.mrb[7].mxu0  ;;  %v4886_v13 = vpack.c.bf16 %v1074_v12, %v1071_v11 }
 0x237   :  { %v3926_v20 = vmul.f32 -1.442695, %v685_v18  ;;  %v1070_v15 = vld [vmem:[#allocation8 + $0x360] sm:$0xff]  ;;  %v1075_v19 = vld [vmem:[#allocation8 + $0x388] sm:$0xff] }
 0x238   :  { %5591 = vpow2.f32 %v3925_v16  ;;  %v1073_v16 = vld [vmem:[#allocation8 + $0x378] sm:$0xff] }
 0x239   :  { %5593 = vpow2.f32 %v3927_v17  ;;  %v1072_v17 = vld [vmem:[#allocation8 + $0x370] sm:$0xff]  ;;  %v4888_v18 = vpack.c.bf16 %v1073_v16, %v1070_v15  ;;  %v1103_v15 = vld [vmem:[#allocation8 + $0x468] sm:$0xff]  ;;  %v1102_v16 = vld [vmem:[#allocation8 + $0x460] sm:$0xff] }
 0x23a   :  { %5595 = vpow2.f32 %v3926_v20  ;;  %v4917_v20 = vpack.c.bf16 %v1075_v19, %v1072_v17 }
 0x242   :  { %v5592_v21 = vpop.eup %5591 }
 0x243   :  { %v5594_v22 = vpop.eup %5593  ;;  %v761_v23 = vadd.f32 1.0, %v5592_v21  ;;  %v1077_v21 = vld [vmem:[#allocation8 + $0x398] sm:$0xff] }
 0x244   :  { %v5596_v24 = vpop.eup %5595  ;;  %v783_v25 = vadd.f32 1.0, %v5594_v22  ;;  %v1080_v22 = vld [vmem:[#allocation8 + $0x3b0] sm:$0xff] }
 0x245   :  { %5597 = vrcp.f32 %v761_v23  ;;  %v772_v27 = vadd.f32 1.0, %v5596_v24  ;;  %v4890_v23 = vpack.c.bf16 %v1080_v22, %v1077_v21  ;;  %v1076_v24 = vld [vmem:[#allocation8 + $0x390] sm:$0xff] }
 0x246   :  { %5599 = vrcp.f32 %v783_v25  ;;  %v1079_v25 = vld [vmem:[#allocation8 + $0x3a8] sm:$0xff] }
 0x247   :  { %5601 = vrcp.f32 %v772_v27  ;;  %v4892_v27 = vpack.c.bf16 %v1079_v25, %v1076_v24 }
 0x24f   :  { %v6132_v32 = vpop.eup %5597 }
 0x250   :  { %v6134_v34 = vpop.eup %5599  ;;  %v767_v35 = vrot.slane %v6132_v32, %v6126_v29 }
 0x251   :  { %v6138_v36 = vpop.eup %5601  ;;  %v789_v37 = vrot.slane %v6134_v34, %v6128_v30 }
 0x252   :  { %v6143_v39 = vmul.f32 %v6108_v48, %v767_v35  ;;  %v778_v40 = vrot.slane %v6138_v36, %v6130_v31  ;;  %v1083_v35 = vld [vmem:[#allocation8 + $0x3c8] sm:$0xff] }
 0x253   :  { %v6152_v43 = vmul.f32 %v6112_v52, %v789_v37  ;;  %v1086_v37 = vld [vmem:[#allocation8 + $0x3e0] sm:$0xff] }
 0x254   :  { %v798_v41 = vmul.f32 %v796_v33, %v6143_v39  ;;  %v6149_v42 = vmul.f32 %v6106_v46, %v778_v40  ;;  %v4920_v33 = vpack.c.bf16 %v1081_v28, %v1078_v26  ;;  %v4894_v40 = vpack.c.bf16 %v1086_v37, %v1083_v35 }
 0x255   :  { %v808_v50 = vmul.f32 %v806_v47, %v6152_v43 }
 0x256   :  { %v803_v45 = vmul.f32 %v801_v44, %v6149_v42  ;;  %v1085_v44 = vld [vmem:[#allocation8 + $0x3d8] sm:$0xff] }
 0x258   :  { %v809_v49 = vadd.f32 %v803_v45, %v798_v41  ;;  %v1082_v41 = vld [vmem:[#allocation8 + $0x3c0] sm:$0xff]  ;;  %v1084_v45 = vld [vmem:[#allocation8 + $0x3d0] sm:$0xff] }
 0x259   :  { %v4896_v47 = vpack.c.bf16 %v1085_v44, %v1082_v41  ;;  %v1042_v44 = vpop.permute.xlu1 %1041 }
 0x25a   :  { %v810_v51 = vadd.f32 %v809_v49, %v808_v50  ;;  %v1087_v49 = vld [vmem:[#allocation8 + $0x3e8] sm:$0xff] }
 0x25b   :  { %v4923_v50 = vpack.c.bf16 %v1087_v49, %v1084_v45 }
 0x25c   :  { %925 = vmatmul.mubr.f32.vlgmr.msra.gmra.mrb[2].mxu1 %v810_v51  ;;  %4335 = vmatmul.mubr.f32.vlgmr.msra.gmra.mrb[8].mxu0 %v810_v51  ;;  %v1089_v51 = vld [vmem:[#allocation8 + $0x3f8] sm:$0xff] }
 0x25d   :  { %1170 = vmatprep.mubr.f32.mxu1 %v5900_v0  ;;  %4369 = vmatprep.mubr.msk.f32.mxu0 %vm5901_vm0, %v5900_v0  ;;  %v4898_v54 = vpack.c.bf16 %v1092_v53, %v1089_v51 }
 0x25e   :  { %4881 = vmatpush1.bf16.msra.mxu1 %v4880_v59  ;;  %4912 = vmatpush3.bf16.msra.mxu0 %v4911_v61  ;;  %v1093_v59 = vld [vmem:[#allocation8 + $0x418] sm:$0xff]  ;;  %v1095_v61 = vld [vmem:[#allocation8 + $0x428] sm:$0xff] }
 0x25f   :  { %4913 = vmatprep.subr.bf16.mxu0 %v5904_v7  ;;  %4883 = vmatprep.subr.bf16.mxu1 %v4882_v3  ;;  %v4926_v60 = vpack.c.bf16 %v1093_v59, %v1090_v57  ;;  %v4902_v63 = vpack.c.bf16 %v1098_v62, %v1095_v61  ;;  %v1094_v3 = vld [vmem:[#allocation8 + $0x420] sm:$0xff]  ;;  %v1047_v57 = vpop.permute.xlu1 %1046  ;;  %v1052_v59 = vpop.permute.xlu0 %1051 }
 0x260   :  { %v4904_v6 = vpack.c.bf16 %v1097_v4, %v1094_v3  ;;  %v1308_v3 = vld [vmem:[#allocation8 + $0x4a0] sm:$0xff] }
 0x262   :  { %4885 = vmatpush1.bf16.msra.mxu1 %v4884_v8  ;;  %4915 = vmatpush3.bf16.msra.mxu0 %v4914_v10  ;;  %v1099_v8 = vld [vmem:[#allocation8 + $0x448] sm:$0xff]  ;;  %v1104_v10 = vld [vmem:[#allocation8 + $0x470] sm:$0xff] }
 0x263   :  { %4916 = vmatprep.subr.bf16.mxu0 %v5904_v7  ;;  %4887 = vmatprep.subr.bf16.mxu1 %v4886_v13  ;;  %v4929_v11 = vpack.c.bf16 %v1099_v8, %v1096_v5  ;;  %v4906_v12 = vpack.c.bf16 %v1104_v10, %v1101_v9  ;;  %v1100_v13 = vld [vmem:[#allocation8 + $0x450] sm:$0xff]  ;;  %v1304_v5 = vld [vmem:[#allocation8 + $0x480] sm:$0xff]  ;;  %v1309_v10 = vld [vmem:[#allocation8 + $0x4a8] sm:$0xff] }
 0x264   :  { %v4908_v17 = vpack.c.bf16 %v1103_v15, %v1100_v13  ;;  %v1306_v8 = vld [vmem:[#allocation8 + $0x490] sm:$0xff] }
 0x265   :  { %v1314_v13 = vld [vmem:[#allocation8 + $0x4d0] sm:$0xff] }
 0x266   :  { %4889 = vmatpush1.bf16.msra.mxu1 %v4888_v18  ;;  %4918 = vmatpush3.bf16.msra.mxu0 %v4917_v20  ;;  %v1105_v18 = vld [vmem:[#allocation8 + $0x478] sm:$0xff] }
 0x267   :  { %4919 = vmatprep.subr.bf16.mxu0 %v5904_v7  ;;  %4891 = vmatprep.subr.bf16.mxu1 %v4890_v23  ;;  %v4932_v19 = vpack.c.bf16 %v1105_v18, %v1102_v16  ;;  %v1310_v16 = vld [vmem:[#allocation8 + $0x4b0] sm:$0xff]  ;;  %v1312_v18 = vld [vmem:[#allocation8 + $0x4c0] sm:$0xff] }
 0x26a   :  { %4893 = vmatpush1.bf16.msra.mxu1 %v4892_v27  ;;  %4921 = vmatpush3.bf16.msra.mxu0 %v4920_v33 }
 0x26b   :  { %4922 = vmatprep.subr.bf16.mxu0 %v5904_v7  ;;  %4895 = vmatprep.subr.bf16.mxu1 %v4894_v40 }
 0x26e   :  { %4897 = vmatpush1.bf16.msra.mxu1 %v4896_v47  ;;  %4924 = vmatpush3.bf16.msra.mxu0 %v4923_v50 }
 0x26f   :  { %4925 = vmatprep.subr.bf16.mxu0 %v5904_v7  ;;  %4899 = vmatprep.subr.bf16.mxu1 %v4898_v54 }
 0x272   :  { %4901 = vmatpush1.bf16.msra.mxu1 %v4900_v58  ;;  %4927 = vmatpush3.bf16.msra.mxu0 %v4926_v60 }
 0x273   :  { %4928 = vmatprep.subr.bf16.mxu0 %v5904_v7  ;;  %4903 = vmatprep.subr.bf16.mxu1 %v4902_v63  ;;  %v1305_v63 = vld [vmem:[#allocation8 + $0x488] sm:$0xff] }
 0x274   :  { %v4934_v4 = vpack.c.bf16 %v1308_v3, %v1305_v63  ;;  %v1331_v63 = vld [vmem:[#allocation8 + $0x558] sm:$0xff]  ;;  %v1330_v3 = vld [vmem:[#allocation8 + $0x550] sm:$0xff] }
 0x276   :  { %4905 = vmatpush1.bf16.msra.mxu1 %v4904_v6  ;;  %4930 = vmatpush3.bf16.msra.mxu0 %v4929_v11  ;;  %v1307_v6 = vld [vmem:[#allocation8 + $0x498] sm:$0xff]  ;;  %v4967_v11 = vpack.c.bf16 %v1309_v10, %v1306_v8 }
 0x277   :  { %4907 = vmatprep.subr.bf16.mxu1 %v4906_v12  ;;  %4931 = vmatprep.subr.bf16.mxu0 %v5904_v7  ;;  %v4936_v9 = vpack.c.bf16 %v1307_v6, %v1304_v5  ;;  %v1311_v12 = vld [vmem:[#allocation8 + $0x4b8] sm:$0xff]  ;;  %v1333_v5 = vld [vmem:[#allocation8 + $0x568] sm:$0xff] }
 0x278   :  { %v4938_v15 = vpack.c.bf16 %v1314_v13, %v1311_v12  ;;  %v4979_v6 = vpack.c.bf16 %v1333_v5, %v1330_v3  ;;  %v1335_v8 = vld [vmem:[#allocation8 + $0x578] sm:$0xff]  ;;  %v1337_v12 = vld [vmem:[#allocation8 + $0x588] sm:$0xff]  ;;  %v1336_v13 = vld [vmem:[#allocation8 + $0x580] sm:$0xff] }
 0x27a   :  { %4909 = vmatpush1.bf16.msra.mxu1 %v4908_v17  ;;  %4933 = vmatpush3.bf16.msra.mxu0 %v4932_v19  ;;  %v1313_v17 = vld [vmem:[#allocation8 + $0x4c8] sm:$0xff] }
 0x27b   :  { %4966 = vmatprep.subr.bf16.mxu0 %v5904_v7  ;;  %4935 = vmatprep.subr.bf16.mxu1 %v4934_v4  ;;  %v4940_v19 = vpack.c.bf16 %v1313_v17, %v1310_v16  ;;  %v1339_v16 = vld [vmem:[#allocation8 + $0x598] sm:$0xff] }
 0x27c   :  { %v4982_v17 = vpack.c.bf16 %v1339_v16, %v1336_v13 }
 0x32f   :  { %v926_v20 = vpop.f32.mrb[2].mxu1  ;;  %v997_v21 = vpop.f32.mrb[8].mxu0 }
 0x330   :  { %v3929_v22 = vmul.f32 -1.442695, %v926_v20  ;;  %v3931_v23 = vmul.f32 -1.442695, %v997_v21  ;;  %v928_v24 = vpop.f32.mrb[3].mxu1  ;;  %v4336_v25 = vpop.f32.mrb[9].mxu0 }
 0x331   :  { %v3930_v26 = vmul.f32 -1.442695, %v928_v24  ;;  %v1315_v20 = vld [vmem:[#allocation8 + $0x4d8] sm:$0xff]  ;;  %v1316_v25 = vld [vmem:[#allocation8 + $0x4e0] sm:$0xff] }
 0x332   :  { %5603 = vpow2.f32 %v3929_v22  ;;  %v4970_v21 = vpack.c.bf16 %v1315_v20, %v1312_v18  ;;  %v1317_v22 = vld [vmem:[#allocation8 + $0x4e8] sm:$0xff] }
 0x333   :  { %5605 = vpow2.f32 %v3931_v23  ;;  %v1320_v23 = vld [vmem:[#allocation8 + $0x500] sm:$0xff]  ;;  %v1341_v18 = vld [vmem:[#allocation8 + $0x5a8] sm:$0xff] }
 0x334   :  { %5607 = vpow2.f32 %v3930_v26  ;;  %v4942_v24 = vpack.c.bf16 %v1320_v23, %v1317_v22  ;;  %v1319_v26 = vld [vmem:[#allocation8 + $0x4f8] sm:$0xff]  ;;  %v1342_v23 = vld [vmem:[#allocation8 + $0x5b0] sm:$0xff] }
 0x335   :  { %v1343_v22 = vld [vmem:[#allocation8 + $0x5b8] sm:$0xff] }
 0x33c   :  { %v5604_v27 = vpop.eup %5603 }
 0x33d   :  { %v5606_v28 = vpop.eup %5605  ;;  %v1004_v33 = vadd.f32 1.0, %v5604_v27  ;;  %v1318_v27 = vld [vmem:[#allocation8 + $0x4f0] sm:$0xff] }
 0x33e   :  { %v5608_v35 = vpop.eup %5607  ;;  %v1028_v37 = vadd.f32 1.0, %v5606_v28  ;;  %v4944_v28 = vpack.c.bf16 %v1319_v26, %v1316_v25  ;;  %v1345_v25 = vld [vmem:[#allocation8 + $0x5c8] sm:$0xff]  ;;  %v1347_v26 = vld [vmem:[#allocation8 + $0x5d8] sm:$0xff] }
 0x33f   :  { %5609 = vrcp.f32 %v1004_v33  ;;  %v1016_v40 = vadd.f32 1.0, %v5608_v35  ;;  %v1321_v33 = vld [vmem:[#allocation8 + $0x508] sm:$0xff] }
 0x340   :  { %5611 = vrcp.f32 %v1028_v37  ;;  %v4973_v35 = vpack.c.bf16 %v1321_v33, %v1318_v27  ;;  %v1323_v37 = vld [vmem:[#allocation8 + $0x518] sm:$0xff]  ;;  %v1350_v27 = vld [vmem:[#allocation8 + $0x5f0] sm:$0xff] }
 0x341   :  { %5613 = vrcp.f32 %v1016_v40  ;;  %v1326_v40 = vld [vmem:[#allocation8 + $0x530] sm:$0xff]  ;;  %v4962_v33 = vpack.c.bf16 %v1350_v27, %v1347_v26 }
 0x349   :  { %v6167_v41 = vpop.eup %5609 }
 0x34a   :  { %v6169_v45 = vpop.eup %5611  ;;  %v1010_v47 = vrot.slane %v6167_v41, %v6126_v29  ;;  %v1012_v13 = vmul.f32 %v6167_v41, %v6132_v32 }
 0x34b   :  { %v6173_v49 = vpop.eup %5613  ;;  %v1034_v50 = vrot.slane %v6169_v45, %v6128_v30  ;;  %v1036_v16 = vmul.f32 %v6169_v45, %v6134_v34 }
 0x34c   :  { %v1022_v51 = vrot.slane %v6173_v49, %v6130_v31  ;;  %v6180_v53 = vmul.f32 %v1010_v47, %v6143_v39  ;;  %v1322_v47 = vld [vmem:[#allocation8 + $0x510] sm:$0xff] }
 0x34d   :  { %v6186_v55 = vmul.f32 %v1034_v50, %v6152_v43  ;;  %v1325_v50 = vld [vmem:[#allocation8 + $0x528] sm:$0xff] }
 0x34e   :  { %v6183_v54 = vmul.f32 %v1022_v51, %v6149_v42  ;;  %v1044_v56 = vmul.f32 %v1042_v44, %v6180_v53  ;;  %v4946_v44 = vpack.c.bf16 %v1326_v40, %v1323_v37  ;;  %v1324_v51 = vld [vmem:[#allocation8 + $0x520] sm:$0xff]  ;;  %v1349_v37 = vld [vmem:[#allocation8 + $0x5e8] sm:$0xff] }
 0x34f   :  { %v1054_v60 = vmul.f32 %v1052_v59, %v6186_v55  ;;  %v1329_v59 = vld [vmem:[#allocation8 + $0x548] sm:$0xff]  ;;  %v1348_v40 = vld [vmem:[#allocation8 + $0x5e0] sm:$0xff] }
 0x350   :  { %v1049_v58 = vmul.f32 %v1047_v57, %v6183_v54  ;;  %v1327_v57 = vld [vmem:[#allocation8 + $0x538] sm:$0xff] }
 0x352   :  { %v1055_v61 = vadd.f32 %v1049_v58, %v1044_v56  ;;  %v4948_v56 = vpack.c.bf16 %v1325_v50, %v1322_v47  ;;  %v4976_v58 = vpack.c.bf16 %v1327_v57, %v1324_v51  ;;  %v1351_v47 = vld [vmem:[#allocation8 + $0x5f8] sm:$0xff]  ;;  %v5906_v51 = vmov 4  }
 0x353   :  { %v4988_v50 = vpack.c.bf16 %v1351_v47, %v1348_v40  ;;  %5557 = vset.pattern.permute.xlu1 %v5906_v51  ;;  %v5908_v57 = vmov 5   ;;  %v1571_v40 = vld [vmem:[#allocation8 + $0x618] sm:$0xff] }
 0x354   :  { %v1056_v62 = vadd.f32 %v1055_v61, %v1054_v60  ;;  %v1332_v60 = vld [vmem:[#allocation8 + $0x560] sm:$0xff]  ;;  %1553 = vperm.xlu1 %5557, %v6096_v38  }
 0x355   :  { %v4950_v61 = vpack.c.bf16 %v1332_v60, %v1329_v59  ;;  %v3948_v59 = vld [vmem:[%s6682_s4 + $0x18] sm:$0x7]  ;;  %v3952_v60 = vld [vmem:[%s6682_s4 + $0x1c] sm:$0x7] }
 0x356   :  { %1171 = vmatmul.mubr.f32.vlgmr.msra.gmra.mrb[4].mxu1 %v1056_v62  ;;  %4370 = vmatmul.mubr.f32.vlgmr.msra.gmra.mrb[10].mxu0 %v1056_v62  ;;  %v1328_v62 = vld [vmem:[#allocation8 + $0x540] sm:$0xff] }
 0x357   :  { %1416 = vmatprep.mubr.f32.mxu1 %v5900_v0  ;;  %4404 = vmatprep.mubr.msk.f32.mxu0 %vm5901_vm0, %v5900_v0  ;;  %v4952_v4 = vpack.c.bf16 %v1331_v63, %v1328_v62 }
 0x358   :  { %4937 = vmatpush1.bf16.msra.mxu1 %v4936_v9  ;;  %4968 = vmatpush3.bf16.msra.mxu0 %v4967_v11  ;;  %v1338_v9 = vld [vmem:[#allocation8 + $0x590] sm:$0xff] }
 0x359   :  { %4969 = vmatprep.subr.bf16.mxu0 %v5904_v7  ;;  %4939 = vmatprep.subr.bf16.mxu1 %v4938_v15  ;;  %v4954_v10 = vpack.c.bf16 %v1338_v9, %v1335_v8  ;;  %v1334_v11 = vld [vmem:[#allocation8 + $0x570] sm:$0xff] }
 0x35a   :  { %v4956_v15 = vpack.c.bf16 %v1337_v12, %v1334_v11  ;;  %5558 = vset.pattern.permute.xlu1 %v5908_v57 }
 0x35b   :  { %1558 = vperm.xlu1 %5558, %v6096_v38  }
 0x35c   :  { %4941 = vmatpush1.bf16.msra.mxu1 %v4940_v19  ;;  %4971 = vmatpush3.bf16.msra.mxu0 %v4970_v21  ;;  %v1344_v19 = vld [vmem:[#allocation8 + $0x5c0] sm:$0xff] }
 0x35d   :  { %4972 = vmatprep.subr.bf16.mxu0 %v5904_v7  ;;  %4943 = vmatprep.subr.bf16.mxu1 %v4942_v24  ;;  %v4958_v20 = vpack.c.bf16 %v1344_v19, %v1341_v18  ;;  %v1340_v21 = vld [vmem:[#allocation8 + $0x5a0] sm:$0xff]  ;;  %v1024_v18 = vmul.f32 %v6173_v49, %v6138_v36  ;;  %v1293_v49 = vpop.permute.xlu0 %1292 }
 0x35e   :  { %v4960_v24 = vpack.c.bf16 %v1343_v22, %v1340_v21  ;;  %v1288_v22 = vpop.permute.xlu1 %1287 }
 0x35f   :  { %5560 = vset.pattern.permute.xlu1 %v5905_v14 }
 0x360   :  { %4945 = vmatpush1.bf16.msra.mxu1 %v4944_v28  ;;  %4974 = vmatpush3.bf16.msra.mxu0 %v4973_v35  ;;  %v4985_v28 = vpack.c.bf16 %v1345_v25, %v1342_v23  ;;  %v1346_v35 = vld [vmem:[#allocation8 + $0x5d0] sm:$0xff] }
 0x361   :  { %4975 = vmatprep.subr.bf16.mxu0 %v5904_v7  ;;  %4947 = vmatprep.subr.bf16.mxu1 %v4946_v44  ;;  %v4964_v44 = vpack.c.bf16 %v1349_v37, %v1346_v35  ;;  %v1568_v37 = vld [vmem:[#allocation8 + $0x600] sm:$0xff] }
 0x362   :  { %v1298_v27 = vpop.permute.xlu1 %1297  ;;  %v4992_v47 = vpack.c.bf16 %v1571_v40, %v1568_v37  ;;  %v1599_v40 = vld [vmem:[#allocation8 + $0x6f8] sm:$0xff] }
 0x364   :  { %4949 = vmatpush1.bf16.msra.mxu1 %v4948_v56  ;;  %4977 = vmatpush3.bf16.msra.mxu0 %v4976_v58  ;;  %v5907_v56 = vmov 3   ;;  %v3944_v58 = vld [vmem:[%s6682_s4 + $0x14] sm:$0x7] }
 0x365   :  { %4978 = vmatprep.subr.bf16.mxu0 %v5904_v7  ;;  %4951 = vmatprep.subr.bf16.mxu1 %v4950_v61 }
 0x366   :  { %5556 = vset.pattern.permute.xlu0 %v5907_v56  ;;  %1802 = vperm.xlu1 %5560, %v3944_v58  }
 0x367   :  { %1548 = vperm.xlu0 %5556, %v6096_v38  }
 0x368   :  { %4953 = vmatpush1.bf16.msra.mxu1 %v4952_v4  ;;  %4980 = vmatpush3.bf16.msra.mxu0 %v4979_v6 }
 0x369   :  { %4981 = vmatprep.subr.bf16.mxu0 %v5904_v7  ;;  %4955 = vmatprep.subr.bf16.mxu1 %v4954_v10 }
 0x36a   :  { %5561 = vset.pattern.permute.xlu1 %v5903_v2 }
 0x36b   :  { %5559 = vset.pattern.permute.xlu0 %v5902_v1  ;;  %1807 = vperm.xlu1 %5561, %v3944_v58  }
 0x36c   :  { %4957 = vmatpush1.bf16.msra.mxu1 %v4956_v15  ;;  %4983 = vmatpush3.bf16.msra.mxu0 %v4982_v17 }
 0x36d   :  { %4984 = vmatprep.subr.bf16.mxu0 %v5904_v7  ;;  %4959 = vmatprep.subr.bf16.mxu1 %v4958_v20 }
 0x36e   :  { %1797 = vperm.xlu0 %5559, %v3944_v58  }
 0x36f   :  { %5562 = vset.pattern.permute.xlu1 %v5905_v14 }
 0x370   :  { %4961 = vmatpush1.bf16.msra.mxu1 %v4960_v24  ;;  %4986 = vmatpush3.bf16.msra.mxu0 %v4985_v28 }
 0x371   :  { %4963 = vmatprep.subr.bf16.mxu1 %v4962_v33  ;;  %4987 = vmatprep.subr.bf16.mxu0 %v5904_v7 }
 0x372   :  { %2043 = vperm.xlu0 %5559, %v3948_v59   ;;  %2048 = vperm.xlu1 %5562, %v3948_v59  }
 0x374   :  { %4965 = vmatpush1.bf16.msra.mxu1 %v4964_v44  ;;  %4989 = vmatpush3.bf16.msra.mxu0 %v4988_v50  ;;  %v1570_v44 = vld [vmem:[#allocation8 + $0x610] sm:$0xff]  ;;  %v1573_v50 = vld [vmem:[#allocation8 + $0x628] sm:$0xff] }
 0x375   :  { %5022 = vmatprep.subr.bf16.mxu0 %v5904_v7  ;;  %v5023_v58 = vpack.c.bf16 %v1573_v50, %v1570_v44  ;;  %v1602_v44 = vld [vmem:[#allocation8 + $0x710] sm:$0xff] }
 0x376   :  { %5563 = vset.pattern.permute.xlu0 %v5903_v2  ;;  %5564 = vset.pattern.permute.xlu1 %v5902_v1  ;;  %v1598_v50 = vld [vmem:[#allocation8 + $0x6f0] sm:$0xff] }
 0x377   :  { %2053 = vperm.xlu0 %5563, %v3948_v59   ;;  %2289 = vperm.xlu1 %5564, %v3952_v60   ;;  %v1575_v59 = vld [vmem:[#allocation8 + $0x638] sm:$0xff] }
 0x37b   :  { %2299 = vperm.xlu0 %5563, %v3952_v60   ;;  %5565 = vset.pattern.permute.xlu1 %v5905_v14 }
 0x37c   :  { %2294 = vperm.xlu1 %5565, %v3952_v60  }
 0x37f   :  { %5567 = vset.pattern.permute.xlu0 %v5906_v51 }
 0x380   :  { %2309 = vperm.xlu0 %5567, %v3952_v60   ;;  %5566 = vset.pattern.permute.xlu1 %v5907_v56 }
 0x381   :  { %2304 = vperm.xlu1 %5566, %v3952_v60  }
 0x384   :  { %5570 = vset.pattern.permute.xlu0 %v5905_v14 }
 0x385   :  { %5568 = vset.pattern.permute.xlu1 %v5908_v57 }
 0x386   :  { %2314 = vperm.xlu1 %5568, %v3952_v60   ;;  %v1578_v60 = vld [vmem:[#allocation8 + $0x650] sm:$0xff] }
 0x38a   :  { %5569 = vset.pattern.permute.xlu1 %v5902_v1 }
 0x429   :  { %v1172_v38 = vpop.f32.mrb[4].mxu1  ;;  %v1243_v61 = vpop.f32.mrb[10].mxu0 }
 0x42a   :  { %v3933_v62 = vmul.f32 -1.442695, %v1172_v38  ;;  %v3935_v63 = vmul.f32 -1.442695, %v1243_v61  ;;  %v1174_v3 = vpop.f32.mrb[5].mxu1  ;;  %v4371_v4 = vpop.f32.mrb[11].mxu0  ;;  %v4994_v38 = vpack.c.bf16 %v1578_v60, %v1575_v59 }
 0x42b   :  { %v3934_v5 = vmul.f32 -1.442695, %v1174_v3  ;;  %v1574_v61 = vld [vmem:[#allocation8 + $0x630] sm:$0xff]  ;;  %v1579_v4 = vld [vmem:[#allocation8 + $0x658] sm:$0xff]  ;;  %v1600_v59 = vld [vmem:[#allocation8 + $0x700] sm:$0xff] }
 0x42c   :  { %5615 = vpow2.f32 %v3933_v62  ;;  %v1577_v62 = vld [vmem:[#allocation8 + $0x648] sm:$0xff] }
 0x42d   :  { %5617 = vpow2.f32 %v3935_v63  ;;  %v1576_v63 = vld [vmem:[#allocation8 + $0x640] sm:$0xff]  ;;  %v4996_v3 = vpack.c.bf16 %v1577_v62, %v1574_v61  ;;  %v1605_v62 = vld [vmem:[#allocation8 + $0x728] sm:$0xff] }
 0x42e   :  { %5619 = vpow2.f32 %v3934_v5  ;;  %v5026_v5 = vpack.c.bf16 %v1579_v4, %v1576_v63  ;;  %v1608_v63 = vld [vmem:[#allocation8 + $0x740] sm:$0xff] }
 0x42f   :  { %v1604_v4 = vld [vmem:[#allocation8 + $0x720] sm:$0xff] }
 0x436   :  { %v5616_v6 = vpop.eup %5615 }
 0x437   :  { %v5618_v8 = vpop.eup %5617  ;;  %v1250_v9 = vadd.f32 1.0, %v5616_v6  ;;  %v1581_v6 = vld [vmem:[#allocation8 + $0x668] sm:$0xff] }
 0x438   :  { %v5620_v10 = vpop.eup %5619  ;;  %v1274_v11 = vadd.f32 1.0, %v5618_v8  ;;  %v1584_v8 = vld [vmem:[#allocation8 + $0x680] sm:$0xff] }
 0x439   :  { %5621 = vrcp.f32 %v1250_v9  ;;  %v1262_v12 = vadd.f32 1.0, %v5620_v10  ;;  %v4998_v9 = vpack.c.bf16 %v1584_v8, %v1581_v6  ;;  %v1580_v10 = vld [vmem:[#allocation8 + $0x660] sm:$0xff]  ;;  %v1606_v6 = vld [vmem:[#allocation8 + $0x730] sm:$0xff] }
 0x43a   :  { %5623 = vrcp.f32 %v1274_v11  ;;  %v1583_v11 = vld [vmem:[#allocation8 + $0x678] sm:$0xff] }
 0x43b   :  { %5625 = vrcp.f32 %v1262_v12  ;;  %v1582_v12 = vld [vmem:[#allocation8 + $0x670] sm:$0xff] }
 0x443   :  { %v5622_v15 = vpop.eup %5621 }
 0x444   :  { %v5624_v17 = vpop.eup %5623  ;;  %v6235_v19 = vmul.f32 %v5622_v15, %v1012_v13  ;;  %v1256_v20 = vrot.slane %v5622_v15, %v6126_v29  ;;  %v5000_v13 = vpack.c.bf16 %v1583_v11, %v1580_v10  ;;  %v1585_v15 = vld [vmem:[#allocation8 + $0x688] sm:$0xff]  ;;  %v1611_v11 = vld [vmem:[#allocation8 + $0x758] sm:$0xff] }
 0x445   :  { %v5626_v21 = vpop.eup %5625  ;;  %v6238_v23 = vmul.f32 %v5624_v17, %v1036_v16  ;;  %v1280_v24 = vrot.slane %v5624_v17, %v6128_v30  ;;  %v5029_v16 = vpack.c.bf16 %v1585_v15, %v1582_v12  ;;  %v1587_v17 = vld [vmem:[#allocation8 + $0x698] sm:$0xff]  ;;  %v1614_v12 = vld [vmem:[#allocation8 + $0x770] sm:$0xff] }
 0x446   :  { %v6241_v25 = vmul.f32 %v5626_v21, %v1024_v18  ;;  %v1268_v32 = vrot.slane %v5626_v21, %v6130_v31  ;;  %v6245_v34 = vmul.f32 %v1256_v20, %v6180_v53  ;;  %v1569_v53 = vld [vmem:[#allocation8 + $0x608] sm:$0xff]  ;;  %v1590_v18 = vld [vmem:[#allocation8 + $0x6b0] sm:$0xff] }
 0x447   :  { %v6251_v36 = vmul.f32 %v1280_v24, %v6186_v55  ;;  %v5002_v20 = vpack.c.bf16 %v1590_v18, %v1587_v17  ;;  %v1586_v21 = vld [vmem:[#allocation8 + $0x690] sm:$0xff]  ;;  %v1588_v24 = vld [vmem:[#allocation8 + $0x6a0] sm:$0xff] }
 0x448   :  { %v6248_v41 = vmul.f32 %v1268_v32, %v6183_v54  ;;  %v1290_v45 = vmul.f32 %v1288_v22, %v6245_v34  ;;  %v1572_v54 = vld [vmem:[#allocation8 + $0x620] sm:$0xff]  ;;  %v1589_v22 = vld [vmem:[#allocation8 + $0x6a8] sm:$0xff]  ;;  %v1610_v15 = vld [vmem:[#allocation8 + $0x750] sm:$0xff] }
 0x449   :  { %v1300_v28 = vmul.f32 %v1298_v27, %v6251_v36  ;;  %v4990_v55 = vpack.c.bf16 %v1572_v54, %v1569_v53  ;;  %v5004_v32 = vpack.c.bf16 %v1589_v22, %v1586_v21  ;;  %v1596_v27 = vld [vmem:[#allocation8 + $0x6e0] sm:$0xff]  ;;  %v1594_v53 = vld [vmem:[#allocation8 + $0x6d0] sm:$0xff] }
 0x44a   :  { %v1295_v26 = vmul.f32 %v1293_v49, %v6248_v41  ;;  %v1612_v17 = vld [vmem:[#allocation8 + $0x760] sm:$0xff] }
 0x44b   :  { %4991 = vmatprep.subr.bf16.mxu1 %v4990_v55  ;;  %v1597_v55 = vld [vmem:[#allocation8 + $0x6e8] sm:$0xff] }
 0x44c   :  { %v1301_v33 = vadd.f32 %v1295_v26, %v1290_v45  ;;  %v1591_v45 = vld [vmem:[#allocation8 + $0x6b8] sm:$0xff]  ;;  %v1593_v26 = vld [vmem:[#allocation8 + $0x6c8] sm:$0xff]  ;;  %v5035_v37 = vpack.c.bf16 %v1597_v55, %v1594_v53 }
 0x44d   :  { %v5032_v49 = vpack.c.bf16 %v1591_v45, %v1588_v24 }
 0x44e   :  { %v1302_v35 = vadd.f32 %v1301_v33, %v1300_v28  ;;  %v5006_v28 = vpack.c.bf16 %v1596_v27, %v1593_v26  ;;  %v1592_v33 = vld [vmem:[#allocation8 + $0x6c0] sm:$0xff] }
 0x450   :  { %1417 = vmatmul.mubr.f32.vlgmr.msra.gmra.mrb[6].mxu1 %v1302_v35  ;;  %4405 = vmatmul.mubr.f32.vlgmr.msra.gmra.mrb[12].mxu0 %v1302_v35  ;;  %v1595_v35 = vld [vmem:[#allocation8 + $0x6d8] sm:$0xff] }
 0x451   :  { %1680 = vmatprep.mubr.f32.mxu1 %v5900_v0  ;;  %4439 = vmatprep.mubr.msk.f32.mxu0 %vm5901_vm0, %v5900_v0  ;;  %v5008_v54 = vpack.c.bf16 %v1595_v35, %v1592_v33 }
 0x452   :  { %4993 = vmatpush1.bf16.msra.mxu1 %v4992_v47  ;;  %5024 = vmatpush3.bf16.msra.mxu0 %v5023_v58  ;;  %v5010_v47 = vpack.c.bf16 %v1602_v44, %v1599_v40  ;;  %v1601_v58 = vld [vmem:[#allocation8 + $0x708] sm:$0xff] }
 0x453   :  { %5025 = vmatprep.subr.bf16.mxu0 %v5904_v7  ;;  %4995 = vmatprep.subr.bf16.mxu1 %v4994_v38  ;;  %v5012_v60 = vpack.c.bf16 %v1601_v58, %v1598_v50  ;;  %v1603_v38 = vld [vmem:[#allocation8 + $0x718] sm:$0xff]  ;;  %v1539_v50 = vpop.permute.xlu0 %1538 }
 0x454   :  { %v5038_v61 = vpack.c.bf16 %v1603_v38, %v1600_v59 }
 0x456   :  { %4997 = vmatpush1.bf16.msra.mxu1 %v4996_v3  ;;  %5027 = vmatpush3.bf16.msra.mxu0 %v5026_v5  ;;  %v5014_v3 = vpack.c.bf16 %v1608_v63, %v1605_v62  ;;  %v1607_v5 = vld [vmem:[#allocation8 + $0x738] sm:$0xff] }
 0x457   :  { %5028 = vmatprep.subr.bf16.mxu0 %v5904_v7  ;;  %4999 = vmatprep.subr.bf16.mxu1 %v4998_v9  ;;  %v5016_v8 = vpack.c.bf16 %v1607_v5, %v1604_v4  ;;  %v1609_v9 = vld [vmem:[#allocation8 + $0x748] sm:$0xff] }
 0x458   :  { %v5041_v10 = vpack.c.bf16 %v1609_v9, %v1606_v6 }
 0x45a   :  { %5001 = vmatpush1.bf16.msra.mxu1 %v5000_v13  ;;  %5030 = vmatpush3.bf16.msra.mxu0 %v5029_v16  ;;  %v5018_v13 = vpack.c.bf16 %v1614_v12, %v1611_v11  ;;  %v1613_v16 = vld [vmem:[#allocation8 + $0x768] sm:$0xff] }
 0x45b   :  { %5031 = vmatprep.subr.bf16.mxu0 %v5904_v7  ;;  %5003 = vmatprep.subr.bf16.mxu1 %v5002_v20  ;;  %v5020_v18 = vpack.c.bf16 %v1613_v16, %v1610_v15  ;;  %v1615_v20 = vld [vmem:[#allocation8 + $0x778] sm:$0xff]  ;;  %v1814_v16 = vld [vmem:[#allocation8 + $0x780] sm:$0xff] }
 0x45c   :  { %v5044_v21 = vpack.c.bf16 %v1615_v20, %v1612_v17  ;;  %v1817_v17 = vld [vmem:[#allocation8 + $0x798] sm:$0xff] }
 0x45d   :  { %v5048_v20 = vpack.c.bf16 %v1817_v17, %v1814_v16  ;;  %v1844_v17 = vld [vmem:[#allocation8 + $0x870] sm:$0xff] }
 0x45e   :  { %5005 = vmatpush1.bf16.msra.mxu1 %v5004_v32  ;;  %5033 = vmatpush3.bf16.msra.mxu0 %v5032_v49 }
 0x45f   :  { %5034 = vmatprep.subr.bf16.mxu0 %v5904_v7  ;;  %5007 = vmatprep.subr.bf16.mxu1 %v5006_v28 }
 0x462   :  { %5009 = vmatpush1.bf16.msra.mxu1 %v5008_v54  ;;  %5036 = vmatpush3.bf16.msra.mxu0 %v5035_v37  ;;  %v1534_v54 = vpop.permute.xlu1 %1533 }
 0x463   :  { %5037 = vmatprep.subr.bf16.mxu0 %v5904_v7  ;;  %5011 = vmatprep.subr.bf16.mxu1 %v5010_v47 }
 0x466   :  { %5013 = vmatpush1.bf16.msra.mxu1 %v5012_v60  ;;  %5039 = vmatpush3.bf16.msra.mxu0 %v5038_v61  ;;  %v1544_v40 = vpop.permute.xlu1 %1543  ;;  %v1536_v61 = vmul.f32 %v1534_v54, %v6143_v39  ;;  %v1830_v54 = vld [vmem:[#allocation8 + $0x800] sm:$0xff] }
 0x467   :  { %5040 = vmatprep.subr.bf16.mxu0 %v5904_v7  ;;  %5015 = vmatprep.subr.bf16.mxu1 %v5014_v3  ;;  %v1541_v3 = vmul.f32 %v1539_v50, %v6149_v42  ;;  %v1546_v39 = vmul.f32 %v1544_v40, %v6152_v43  ;;  %v1815_v43 = vld [vmem:[#allocation8 + $0x788] sm:$0xff]  ;;  %v1829_v40 = vld [vmem:[#allocation8 + $0x7f8] sm:$0xff] }
 0x468   :  { %v1831_v50 = vld [vmem:[#allocation8 + $0x808] sm:$0xff] }
 0x46a   :  { %5017 = vmatpush1.bf16.msra.mxu1 %v5016_v8  ;;  %5042 = vmatpush3.bf16.msra.mxu0 %v5041_v10  ;;  %v1554_v44 = vpop.permute.xlu1 %1553  ;;  %v1549_v8 = vpop.permute.xlu0 %1548  ;;  %v1562_v10 = vadd.f32 %v1541_v3, %v1536_v61  ;;  %v1835_v3 = vld [vmem:[#allocation8 + $0x828] sm:$0xff] }
 0x46b   :  { %5043 = vmatprep.subr.bf16.mxu0 %v5904_v7  ;;  %5019 = vmatprep.subr.bf16.mxu1 %v5018_v13 }
 0x46e   :  { %5021 = vmatpush1.bf16.msra.mxu1 %v5020_v18  ;;  %5045 = vmatpush3.bf16.msra.mxu0 %v5044_v21  ;;  %v1559_v9 = vpop.permute.xlu1 %1558  ;;  %v1816_v18 = vld [vmem:[#allocation8 + $0x790] sm:$0xff]  ;;  %v1819_v21 = vld [vmem:[#allocation8 + $0x7a8] sm:$0xff] }
 0x46f   :  { %5078 = vmatprep.subr.bf16.mxu0 %v5904_v7 }
 0x523   :  { %v1418_v22 = vpop.f32.mrb[6].mxu1  ;;  %v1489_v24 = vpop.f32.mrb[12].mxu0 }
 0x524   :  { %v3937_v32 = vmul.f32 -1.442695, %v1418_v22  ;;  %v3939_v45 = vmul.f32 -1.442695, %v1489_v24  ;;  %v1420_v49 = vpop.f32.mrb[7].mxu1  ;;  %v4406_v26 = vpop.f32.mrb[13].mxu0  ;;  %v5079_v22 = vpack.c.bf16 %v1819_v21, %v1816_v18 }
 0x525   :  { %v3938_v27 = vmul.f32 -1.442695, %v1420_v49  ;;  %v1821_v24 = vld [vmem:[#allocation8 + $0x7b8] sm:$0xff]  ;;  %v1820_v49 = vld [vmem:[#allocation8 + $0x7b0] sm:$0xff]  ;;  %v1823_v26 = vld [vmem:[#allocation8 + $0x7c8] sm:$0xff] }
 0x526   :  { %5627 = vpow2.f32 %v3937_v32  ;;  %v1824_v32 = vld [vmem:[#allocation8 + $0x7d0] sm:$0xff]  ;;  %v1847_v18 = vld [vmem:[#allocation8 + $0x888] sm:$0xff] }
 0x527   :  { %5629 = vpow2.f32 %v3939_v45  ;;  %v5050_v45 = vpack.c.bf16 %v1824_v32, %v1821_v24  ;;  %v5068_v21 = vpack.c.bf16 %v1847_v18, %v1844_v17  ;;  %v1851_v32 = vld [vmem:[#allocation8 + $0x8a8] sm:$0xff] }
 0x528   :  { %5631 = vpow2.f32 %v3938_v27  ;;  %v1822_v27 = vld [vmem:[#allocation8 + $0x7c0] sm:$0xff] }
 0x530   :  { %v5628_v28 = vpop.eup %5627 }
 0x531   :  { %v5630_v33 = vpop.eup %5629  ;;  %v1496_v35 = vadd.f32 1.0, %v5628_v28  ;;  %v5052_v28 = vpack.c.bf16 %v1823_v26, %v1820_v49  ;;  %v1850_v26 = vld [vmem:[#allocation8 + $0x8a0] sm:$0xff] }
 0x532   :  { %v5632_v53 = vpop.eup %5631  ;;  %v1520_v55 = vadd.f32 1.0, %v5630_v33  ;;  %v1825_v33 = vld [vmem:[#allocation8 + $0x7d8] sm:$0xff] }
 0x533   :  { %5633 = vrcp.f32 %v1496_v35  ;;  %v1508_v37 = vadd.f32 1.0, %v5632_v53  ;;  %v5082_v35 = vpack.c.bf16 %v1825_v33, %v1822_v27  ;;  %v1827_v53 = vld [vmem:[#allocation8 + $0x7e8] sm:$0xff]  ;;  %v1853_v27 = vld [vmem:[#allocation8 + $0x8b8] sm:$0xff] }
 0x534   :  { %5635 = vrcp.f32 %v1520_v55  ;;  %v5054_v55 = vpack.c.bf16 %v1830_v54, %v1827_v53  ;;  %v5072_v33 = vpack.c.bf16 %v1853_v27, %v1850_v26  ;;  %v1857_v53 = vld [vmem:[#allocation8 + $0x8d8] sm:$0xff]  ;;  %v1860_v54 = vld [vmem:[#allocation8 + $0x8f0] sm:$0xff]  ;;  %v2061_v27 = vld [vmem:[#allocation8 + $0x908] sm:$0xff] }
 0x535   :  { %5637 = vrcp.f32 %v1508_v37  ;;  %v1826_v37 = vld [vmem:[#allocation8 + $0x7e0] sm:$0xff] }
 0x53d   :  { %v5634_v47 = vpop.eup %5633 }
 0x53e   :  { %v5636_v58 = vpop.eup %5635  ;;  %v6268_v59 = vmul.f32 %v5634_v47, %v6235_v19  ;;  %v1502_v60 = vrot.slane %v5634_v47, %v6126_v29  ;;  %v5056_v47 = vpack.c.bf16 %v1829_v40, %v1826_v37  ;;  %v5074_v37 = vpack.c.bf16 %v1860_v54, %v1857_v53  ;;  %v1856_v40 = vld [vmem:[#allocation8 + $0x8d0] sm:$0xff]  ;;  %v2063_v53 = vld [vmem:[#allocation8 + $0x918] sm:$0xff] }
 0x53f   :  { %v5638_v38 = vpop.eup %5637  ;;  %v6273_v62 = vmul.f32 %v5636_v58, %v6238_v23  ;;  %v1526_v63 = vrot.slane %v5636_v58, %v6128_v30  ;;  %v2062_v54 = vld [vmem:[#allocation8 + $0x910] sm:$0xff] }
 0x540   :  { %v6278_v4 = vmul.f32 %v5638_v38, %v6241_v25  ;;  %v1514_v5 = vrot.slane %v5638_v38, %v6130_v31  ;;  %v6282_v19 = vmul.f32 %v1502_v60, %v6245_v34  ;;  %v1833_v60 = vld [vmem:[#allocation8 + $0x818] sm:$0xff]  ;;  %v1836_v38 = vld [vmem:[#allocation8 + $0x830] sm:$0xff] }
 0x541   :  { %v6285_v6 = vmul.f32 %v1526_v63, %v6251_v36  ;;  %v5058_v61 = vpack.c.bf16 %v1836_v38, %v1833_v60  ;;  %v1832_v63 = vld [vmem:[#allocation8 + $0x810] sm:$0xff] }
 0x542   :  { %v6289_v23 = vmul.f32 %v1514_v5, %v6248_v41  ;;  %v1551_v42 = vmul.f32 %v1549_v8, %v6282_v19  ;;  %v1818_v41 = vld [vmem:[#allocation8 + $0x7a0] sm:$0xff]  ;;  %v5060_v8 = vpack.c.bf16 %v1835_v3, %v1832_v63 }
 0x543   :  { %v1561_v25 = vmul.f32 %v1559_v9, %v6285_v6  ;;  %v5046_v36 = vpack.c.bf16 %v1818_v41, %v1815_v43  ;;  %v1834_v5 = vld [vmem:[#allocation8 + $0x820] sm:$0xff]  ;;  %v1845_v41 = vld [vmem:[#allocation8 + $0x878] sm:$0xff] }
 0x544   :  { %v1556_v11 = vmul.f32 %v1554_v44, %v6289_v23  ;;  %v1563_v12 = vadd.f32 %v1551_v42, %v1546_v39  ;;  %v1828_v44 = vld [vmem:[#allocation8 + $0x7f0] sm:$0xff]  ;;  %v1837_v39 = vld [vmem:[#allocation8 + $0x838] sm:$0xff]  ;;  %v1839_v42 = vld [vmem:[#allocation8 + $0x848] sm:$0xff] }
 0x545   :  { %5047 = vmatprep.subr.bf16.mxu1 %v5046_v36  ;;  %v5085_v58 = vpack.c.bf16 %v1831_v50, %v1828_v44  ;;  %v5088_v9 = vpack.c.bf16 %v1837_v39, %v1834_v5  ;;  %v1848_v36 = vld [vmem:[#allocation8 + $0x890] sm:$0xff]  ;;  %v1859_v44 = vld [vmem:[#allocation8 + $0x8e8] sm:$0xff] }
 0x546   :  { %v1564_v34 = vadd.f32 %v1561_v25, %v1556_v11  ;;  %v1565_v13 = vadd.f32 %v1563_v12, %v1562_v10  ;;  %v1842_v25 = vld [vmem:[#allocation8 + $0x860] sm:$0xff]  ;;  %v1841_v12 = vld [vmem:[#allocation8 + $0x858] sm:$0xff]  ;;  %v5066_v16 = vpack.c.bf16 %v1848_v36, %v1845_v41  ;;  %v5076_v50 = vpack.c.bf16 %v1859_v44, %v1856_v40  ;;  %v1803_v36 = vpop.permute.xlu1 %1802 }
 0x547   :  { %v5062_v10 = vpack.c.bf16 %v1842_v25, %v1839_v42  ;;  %v1838_v11 = vld [vmem:[#allocation8 + $0x840] sm:$0xff]  ;;  %v2067_v44 = vld [vmem:[#allocation8 + $0x938] sm:$0xff] }
 0x548   :  { %v1566_v15 = vadd.f32 %v1565_v13, %v1564_v34  ;;  %v1840_v34 = vld [vmem:[#allocation8 + $0x850] sm:$0xff]  ;;  %v5064_v13 = vpack.c.bf16 %v1841_v12, %v1838_v11 }
 0x54a   :  { %1681 = vmatmul.mubr.f32.vlgmr.msra.gmra.mrb[8].mxu1 %v1566_v15  ;;  %4440 = vmatmul.mubr.f32.vlgmr.msra.gmra.mrb[14].mxu0 %v1566_v15  ;;  %v1843_v15 = vld [vmem:[#allocation8 + $0x868] sm:$0xff] }
 0x54b   :  { %1926 = vmatprep.mubr.f32.mxu1 %v5900_v0  ;;  %4474 = vmatprep.mubr.msk.f32.mxu0 %vm5901_vm0, %v5900_v0  ;;  %v5091_v43 = vpack.c.bf16 %v1843_v15, %v1840_v34 }
 0x54c   :  { %5049 = vmatpush1.bf16.msra.mxu1 %v5048_v20  ;;  %5080 = vmatpush3.bf16.msra.mxu0 %v5079_v22  ;;  %v1846_v20 = vld [vmem:[#allocation8 + $0x880] sm:$0xff]  ;;  %v1849_v22 = vld [vmem:[#allocation8 + $0x898] sm:$0xff] }
 0x54d   :  { %5081 = vmatprep.subr.bf16.mxu0 %v5904_v7  ;;  %5051 = vmatprep.subr.bf16.mxu1 %v5050_v45  ;;  %v5094_v24 = vpack.c.bf16 %v1849_v22, %v1846_v20  ;;  %v1854_v45 = vld [vmem:[#allocation8 + $0x8c0] sm:$0xff]  ;;  %v1798_v22 = vpop.permute.xlu0 %1797 }
 0x54e   :  { %v5070_v49 = vpack.c.bf16 %v1854_v45, %v1851_v32  ;;  %v1808_v45 = vpop.permute.xlu1 %1807 }
 0x550   :  { %5053 = vmatpush1.bf16.msra.mxu1 %v5052_v28  ;;  %5083 = vmatpush3.bf16.msra.mxu0 %v5082_v35  ;;  %v1852_v28 = vld [vmem:[#allocation8 + $0x8b0] sm:$0xff]  ;;  %v1855_v35 = vld [vmem:[#allocation8 + $0x8c8] sm:$0xff] }
 0x551   :  { %5084 = vmatprep.subr.bf16.mxu0 %v5904_v7  ;;  %5055 = vmatprep.subr.bf16.mxu1 %v5054_v55  ;;  %v5097_v55 = vpack.c.bf16 %v1855_v35, %v1852_v28  ;;  %v2064_v28 = vld [vmem:[#allocation8 + $0x920] sm:$0xff] }
 0x552   :  { %v2060_v35 = vld [vmem:[#allocation8 + $0x900] sm:$0xff] }
 0x554   :  { %5057 = vmatpush1.bf16.msra.mxu1 %v5056_v47  ;;  %5086 = vmatpush3.bf16.msra.mxu0 %v5085_v58  ;;  %v1858_v47 = vld [vmem:[#allocation8 + $0x8e0] sm:$0xff]  ;;  %v1861_v58 = vld [vmem:[#allocation8 + $0x8f8] sm:$0xff] }
 0x555   :  { %5087 = vmatprep.subr.bf16.mxu0 %v5904_v7  ;;  %5059 = vmatprep.subr.bf16.mxu1 %v5058_v61  ;;  %v5100_v60 = vpack.c.bf16 %v1861_v58, %v1858_v47  ;;  %v2070_v47 = vld [vmem:[#allocation8 + $0x950] sm:$0xff] }
 0x556   :  { %v2066_v58 = vld [vmem:[#allocation8 + $0x930] sm:$0xff] }
 0x558   :  { %5061 = vmatpush1.bf16.msra.mxu1 %v5060_v8  ;;  %5089 = vmatpush3.bf16.msra.mxu0 %v5088_v9 }
 0x559   :  { %5090 = vmatprep.subr.bf16.mxu0 %v5904_v7  ;;  %5063 = vmatprep.subr.bf16.mxu1 %v5062_v10 }
 0x55c   :  { %5065 = vmatpush1.bf16.msra.mxu1 %v5064_v13  ;;  %5092 = vmatpush3.bf16.msra.mxu0 %v5091_v43 }
 0x55d   :  { %5093 = vmatprep.subr.bf16.mxu0 %v5904_v7  ;;  %5067 = vmatprep.subr.bf16.mxu1 %v5066_v16 }
 0x560   :  { %5069 = vmatpush1.bf16.msra.mxu1 %v5068_v21  ;;  %5095 = vmatpush3.bf16.msra.mxu0 %v5094_v24 }
 0x561   :  { %5096 = vmatprep.subr.bf16.mxu0 %v5904_v7  ;;  %5071 = vmatprep.subr.bf16.mxu1 %v5070_v49 }
 0x564   :  { %5073 = vmatpush1.bf16.msra.mxu1 %v5072_v33  ;;  %5098 = vmatpush3.bf16.msra.mxu0 %v5097_v55  ;;  %v5102_v33 = vpack.c.bf16 %v2064_v28, %v2061_v27  ;;  %v5104_v55 = vpack.c.bf16 %v2063_v53, %v2060_v35  ;;  %v2086_v27 = vld [vmem:[#allocation8 + $0x9d0] sm:$0xff]  ;;  %v2091_v53 = vld [vmem:[#allocation8 + $0x9f8] sm:$0xff] }
 0x565   :  { %5075 = vmatprep.subr.bf16.mxu1 %v5074_v37  ;;  %5099 = vmatprep.subr.bf16.mxu0 %v5904_v7  ;;  %v2065_v37 = vld [vmem:[#allocation8 + $0x928] sm:$0xff] }
 0x566   :  { %v5135_v40 = vpack.c.bf16 %v2065_v37, %v2062_v54  ;;  %v2094_v54 = vld [vmem:[#allocation8 + $0xa10] sm:$0xff] }
 0x567   :  { %v2090_v37 = vld [vmem:[#allocation8 + $0x9f0] sm:$0xff] }
 0x568   :  { %5077 = vmatpush1.bf16.msra.mxu1 %v5076_v50  ;;  %5101 = vmatpush3.bf16.msra.mxu0 %v5100_v60  ;;  %v5106_v50 = vpack.c.bf16 %v2070_v47, %v2067_v44  ;;  %v2069_v60 = vld [vmem:[#allocation8 + $0x948] sm:$0xff]  ;;  %v2092_v44 = vld [vmem:[#allocation8 + $0xa00] sm:$0xff] }
 0x569   :  { %5134 = vmatprep.subr.bf16.mxu0 %v5904_v7  ;;  %5103 = vmatprep.subr.bf16.mxu1 %v5102_v33  ;;  %v2089_v33 = vld [vmem:[#allocation8 + $0x9e8] sm:$0xff] }
 0x56a   :  { %v5147_v35 = vpack.c.bf16 %v2089_v33, %v2086_v27 }
 0x61d   :  { %v1682_v38 = vpop.f32.mrb[8].mxu1  ;;  %v1753_v61 = vpop.f32.mrb[14].mxu0 }
 0x61e   :  { %v3941_v63 = vmul.f32 -1.442695, %v1682_v38  ;;  %v3943_v3 = vmul.f32 -1.442695, %v1753_v61  ;;  %v1684_v5 = vpop.f32.mrb[9].mxu1  ;;  %v4441_v8 = vpop.f32.mrb[15].mxu0  ;;  %v5108_v61 = vpack.c.bf16 %v2069_v60, %v2066_v58 }
 0x61f   :  { %v3942_v39 = vmul.f32 -1.442695, %v1684_v5  ;;  %v2068_v38 = vld [vmem:[#allocation8 + $0x940] sm:$0xff]  ;;  %v2073_v5 = vld [vmem:[#allocation8 + $0x968] sm:$0xff] }
 0x620   :  { %5639 = vpow2.f32 %v3941_v63  ;;  %v2071_v63 = vld [vmem:[#allocation8 + $0x958] sm:$0xff]  ;;  %v2076_v8 = vld [vmem:[#allocation8 + $0x980] sm:$0xff]  ;;  %v2097_v60 = vld [vmem:[#allocation8 + $0xa28] sm:$0xff] }
 0x621   :  { %5641 = vpow2.f32 %v3943_v3  ;;  %v5138_v3 = vpack.c.bf16 %v2071_v63, %v2068_v38  ;;  %v2100_v38 = vld [vmem:[#allocation8 + $0xa40] sm:$0xff] }
 0x622   :  { %5643 = vpow2.f32 %v3942_v39  ;;  %v5110_v39 = vpack.c.bf16 %v2076_v8, %v2073_v5  ;;  %v2096_v63 = vld [vmem:[#allocation8 + $0xa20] sm:$0xff]  ;;  %v2098_v5 = vld [vmem:[#allocation8 + $0xa30] sm:$0xff] }
 0x62a   :  { %v5640_v9 = vpop.eup %5639 }
 0x62b   :  { %v5642_v42 = vpop.eup %5641  ;;  %v1760_v25 = vadd.f32 1.0, %v5640_v9  ;;  %v2072_v9 = vld [vmem:[#allocation8 + $0x960] sm:$0xff] }
 0x62c   :  { %v5644_v10 = vpop.eup %5643  ;;  %v1784_v11 = vadd.f32 1.0, %v5642_v42  ;;  %v2075_v42 = vld [vmem:[#allocation8 + $0x978] sm:$0xff] }
 0x62d   :  { %5645 = vrcp.f32 %v1760_v25  ;;  %v1772_v12 = vadd.f32 1.0, %v5644_v10  ;;  %v2074_v25 = vld [vmem:[#allocation8 + $0x970] sm:$0xff]  ;;  %v5112_v10 = vpack.c.bf16 %v2075_v42, %v2072_v9  ;;  %v2103_v9 = vld [vmem:[#allocation8 + $0xa58] sm:$0xff] }
 0x62e   :  { %5647 = vrcp.f32 %v1784_v11  ;;  %v2077_v11 = vld [vmem:[#allocation8 + $0x988] sm:$0xff]  ;;  %v2106_v42 = vld [vmem:[#allocation8 + $0xa70] sm:$0xff] }
 0x62f   :  { %5649 = vrcp.f32 %v1772_v12  ;;  %v5141_v12 = vpack.c.bf16 %v2077_v11, %v2074_v25  ;;  %v2102_v11 = vld [vmem:[#allocation8 + $0xa50] sm:$0xff] }
 0x637   :  { %v5646_v34 = vpop.eup %5645 }
 0x638   :  { %v5648_v13 = vpop.eup %5647  ;;  %v6306_v15 = vmul.f32 %v5646_v34, %v6268_v59  ;;  %v1766_v43 = vrot.slane %v5646_v34, %v6126_v29  ;;  %v2079_v34 = vld [vmem:[#allocation8 + $0x998] sm:$0xff] }
 0x639   :  { %v5650_v41 = vpop.eup %5649  ;;  %v6310_v16 = vmul.f32 %v5648_v13, %v6273_v62  ;;  %v1790_v17 = vrot.slane %v5648_v13, %v6128_v30  ;;  %v2082_v13 = vld [vmem:[#allocation8 + $0x9b0] sm:$0xff] }
 0x63a   :  { %v6314_v18 = vmul.f32 %v5650_v41, %v6278_v4  ;;  %v1778_v20 = vrot.slane %v5650_v41, %v6130_v31  ;;  %v6318_v21 = vmul.f32 %v1766_v43, %v6282_v19  ;;  %v5114_v43 = vpack.c.bf16 %v2082_v13, %v2079_v34  ;;  %v2078_v41 = vld [vmem:[#allocation8 + $0x990] sm:$0xff]  ;;  %v2104_v34 = vld [vmem:[#allocation8 + $0xa60] sm:$0xff] }
 0x63b   :  { %v6324_v24 = vmul.f32 %v1790_v17, %v6285_v6  ;;  %v2080_v17 = vld [vmem:[#allocation8 + $0x9a0] sm:$0xff] }
 0x63c   :  { %v6321_v59 = vmul.f32 %v1778_v20, %v6289_v23  ;;  %v1800_v62 = vmul.f32 %v1798_v22, %v6318_v21  ;;  %v2083_v22 = vld [vmem:[#allocation8 + $0x9b8] sm:$0xff] }
 0x63d   :  { %v1810_v4 = vmul.f32 %v1808_v45, %v6324_v24  ;;  %v2088_v45 = vld [vmem:[#allocation8 + $0x9e0] sm:$0xff] }
 0x63e   :  { %v1805_v32 = vmul.f32 %v1803_v36, %v6321_v59  ;;  %v2081_v36 = vld [vmem:[#allocation8 + $0x9a8] sm:$0xff] }
 0x63f   :  { %v5116_v20 = vpack.c.bf16 %v2081_v36, %v2078_v41  ;;  %v3956_v36 = vld [vmem:[%s6682_s4 + $0x20] sm:$0x7] }
 0x640   :  { %v1811_v49 = vadd.f32 %v1805_v32, %v1800_v62  ;;  %v5144_v62 = vpack.c.bf16 %v2083_v22, %v2080_v17  ;;  %v2085_v32 = vld [vmem:[#allocation8 + $0x9c8] sm:$0xff]  ;;  %2553 = vperm.xlu1 %5569, %v3956_v36   ;;  %2558 = vperm.xlu0 %5570, %v3956_v36   ;;  %v3960_v17 = vld [vmem:[%s6682_s4 + $0x24] sm:$0x7] }
 0x642   :  { %v1812_v26 = vadd.f32 %v1811_v49, %v1810_v4  ;;  %v5118_v4 = vpack.c.bf16 %v2088_v45, %v2085_v32  ;;  %v2084_v49 = vld [vmem:[#allocation8 + $0x9c0] sm:$0xff] }
 0x644   :  { %1927 = vmatmul.mubr.f32.vlgmr.msra.gmra.mrb[10].mxu1 %v1812_v26  ;;  %4475 = vmatmul.mubr.f32.vlgmr.msra.gmra.mrb[16].mxu0 %v1812_v26  ;;  %v2087_v26 = vld [vmem:[#allocation8 + $0x9d8] sm:$0xff] }
 0x645   :  { %2172 = vmatprep.mubr.f32.mxu1 %v5900_v0  ;;  %4509 = vmatprep.mubr.msk.f32.mxu0 %vm5901_vm0, %v5900_v0  ;;  %v5120_v28 = vpack.c.bf16 %v2087_v26, %v2084_v49 }
 0x646   :  { %5105 = vmatpush1.bf16.msra.mxu1 %v5104_v55  ;;  %5136 = vmatpush3.bf16.msra.mxu0 %v5135_v40  ;;  %v5122_v55 = vpack.c.bf16 %v2094_v54, %v2091_v53  ;;  %v2093_v40 = vld [vmem:[#allocation8 + $0xa08] sm:$0xff] }
 0x647   :  { %5137 = vmatprep.subr.bf16.mxu0 %v5904_v7  ;;  %5107 = vmatprep.subr.bf16.mxu1 %v5106_v50  ;;  %v5124_v47 = vpack.c.bf16 %v2093_v40, %v2090_v37  ;;  %v2095_v50 = vld [vmem:[#allocation8 + $0xa18] sm:$0xff]  ;;  %v2044_v37 = vpop.permute.xlu0 %2043 }
 0x648   :  { %v5150_v58 = vpack.c.bf16 %v2095_v50, %v2092_v44  ;;  %5571 = vset.pattern.permute.xlu1 %v5903_v2  ;;  %2804 = vperm.xlu0 %5570, %v3960_v17  }
 0x649   :  { %2563 = vperm.xlu1 %5571, %v3956_v36  }
 0x64a   :  { %5109 = vmatpush1.bf16.msra.mxu1 %v5108_v61  ;;  %5139 = vmatpush3.bf16.msra.mxu0 %v5138_v3  ;;  %v5126_v61 = vpack.c.bf16 %v2100_v38, %v2097_v60  ;;  %v2099_v3 = vld [vmem:[#allocation8 + $0xa38] sm:$0xff] }
 0x64b   :  { %5140 = vmatprep.subr.bf16.mxu0 %v5904_v7  ;;  %5111 = vmatprep.subr.bf16.mxu1 %v5110_v39  ;;  %v5128_v8 = vpack.c.bf16 %v2099_v3, %v2096_v63  ;;  %v2101_v39 = vld [vmem:[#allocation8 + $0xa48] sm:$0xff]  ;;  %v2054_v63 = vpop.permute.xlu0 %2053 }
 0x64c   :  { %v5153_v25 = vpack.c.bf16 %v2101_v39, %v2098_v5  ;;  %5574 = vset.pattern.permute.xlu0 %v5902_v1  ;;  %v2327_v39 = vld [vmem:[#allocation8 + $0xa98] sm:$0xff] }
 0x64d   :  { %5572 = vset.pattern.permute.xlu1 %v5902_v1 }
 0x64e   :  { %5113 = vmatpush1.bf16.msra.mxu1 %v5112_v10  ;;  %5142 = vmatpush3.bf16.msra.mxu0 %v5141_v12  ;;  %v5130_v10 = vpack.c.bf16 %v2106_v42, %v2103_v9  ;;  %v2105_v12 = vld [vmem:[#allocation8 + $0xa68] sm:$0xff]  ;;  %v2326_v9 = vld [vmem:[#allocation8 + $0xa90] sm:$0xff] }
 0x64f   :  { %5143 = vmatprep.subr.bf16.mxu0 %v5904_v7  ;;  %5115 = vmatprep.subr.bf16.mxu1 %v5114_v43  ;;  %v5132_v13 = vpack.c.bf16 %v2105_v12, %v2102_v11  ;;  %v2107_v43 = vld [vmem:[#allocation8 + $0xa78] sm:$0xff]  ;;  %v2334_v12 = vld [vmem:[#allocation8 + $0xad0] sm:$0xff] }
 0x650   :  { %v5156_v41 = vpack.c.bf16 %v2107_v43, %v2104_v34  ;;  %2799 = vperm.xlu1 %5572, %v3960_v17   ;;  %v2331_v11 = vld [vmem:[#allocation8 + $0xab8] sm:$0xff]  ;;  %v2333_v43 = vld [vmem:[#allocation8 + $0xac8] sm:$0xff] }
 0x651   :  { %v5162_v34 = vpack.c.bf16 %v2334_v12, %v2331_v11  ;;  %v2361_v11 = vld [vmem:[#allocation8 + $0xba8] sm:$0xff]  ;;  %v2364_v12 = vld [vmem:[#allocation8 + $0xbc0] sm:$0xff] }
 0x652   :  { %5117 = vmatpush1.bf16.msra.mxu1 %v5116_v20  ;;  %5145 = vmatpush3.bf16.msra.mxu0 %v5144_v62  ;;  %v3964_v20 = vld [vmem:[%s6682_s4 + $0x28] sm:$0x7] }
 0x653   :  { %5146 = vmatprep.subr.bf16.mxu0 %v5904_v7  ;;  %5119 = vmatprep.subr.bf16.mxu1 %v5118_v4 }
 0x654   :  { %3045 = vperm.xlu0 %5574, %v3964_v20   ;;  %5573 = vset.pattern.permute.xlu1 %v5903_v2 }
 0x655   :  { %2809 = vperm.xlu1 %5573, %v3960_v17   ;;  %v2335_v17 = vld [vmem:[#allocation8 + $0xad8] sm:$0xff] }
 0x656   :  { %5121 = vmatpush1.bf16.msra.mxu1 %v5120_v28  ;;  %5148 = vmatpush3.bf16.msra.mxu0 %v5147_v35 }
 0x657   :  { %5149 = vmatprep.subr.bf16.mxu0 %v5904_v7  ;;  %5123 = vmatprep.subr.bf16.mxu1 %v5122_v55 }
 0x658   :  { %5577 = vset.pattern.permute.xlu0 %v5907_v56 }
 0x659   :  { %3060 = vperm.xlu0 %5577, %v3964_v20   ;;  %5575 = vset.pattern.permute.xlu1 %v5905_v14 }
 0x65a   :  { %5125 = vmatpush1.bf16.msra.mxu1 %v5124_v47  ;;  %5151 = vmatpush3.bf16.msra.mxu0 %v5150_v58 }
 0x65b   :  { %5152 = vmatprep.subr.bf16.mxu0 %v5904_v7  ;;  %5127 = vmatprep.subr.bf16.mxu1 %v5126_v61 }
 0x65c   :  { %3050 = vperm.xlu1 %5575, %v3964_v20  }
 0x65d   :  { %5580 = vset.pattern.permute.xlu0 %v5902_v1 }
 0x65e   :  { %5129 = vmatpush1.bf16.msra.mxu1 %v5128_v8  ;;  %5154 = vmatpush3.bf16.msra.mxu0 %v5153_v25  ;;  %v2324_v8 = vld [vmem:[#allocation8 + $0xa80] sm:$0xff]  ;;  %v2329_v25 = vld [vmem:[#allocation8 + $0xaa8] sm:$0xff] }
 0x65f   :  { %5131 = vmatprep.subr.bf16.mxu1 %v5130_v10  ;;  %5155 = vmatprep.subr.bf16.mxu0 %v5904_v7  ;;  %v5160_v42 = vpack.c.bf16 %v2327_v39, %v2324_v8  ;;  %v5191_v10 = vpack.c.bf16 %v2329_v25, %v2326_v9  ;;  %v2354_v8 = vld [vmem:[#allocation8 + $0xb70] sm:$0xff]  ;;  %v2357_v39 = vld [vmem:[#allocation8 + $0xb88] sm:$0xff]  ;;  %v2356_v9 = vld [vmem:[#allocation8 + $0xb80] sm:$0xff] }
 0x660   :  { %5576 = vset.pattern.permute.xlu1 %v5903_v2  ;;  %v2359_v25 = vld [vmem:[#allocation8 + $0xb98] sm:$0xff] }
 0x661   :  { %3055 = vperm.xlu1 %5576, %v3964_v20  }
 0x662   :  { %5133 = vmatpush1.bf16.msra.mxu1 %v5132_v13  ;;  %5157 = vmatpush3.bf16.msra.mxu0 %v5156_v41  ;;  %v2330_v13 = vld [vmem:[#allocation8 + $0xab0] sm:$0xff]  ;;  %v2332_v41 = vld [vmem:[#allocation8 + $0xac0] sm:$0xff] }
 0x663   :  { %5190 = vmatprep.subr.bf16.mxu0 %v5904_v7  ;;  %v5164_v36 = vpack.c.bf16 %v2333_v43, %v2330_v13  ;;  %v2360_v13 = vld [vmem:[#allocation8 + $0xba0] sm:$0xff]  ;;  %v2363_v43 = vld [vmem:[#allocation8 + $0xbb8] sm:$0xff] }
 0x665   :  { %5578 = vset.pattern.permute.xlu1 %v5906_v51 }
 0x666   :  { %3065 = vperm.xlu1 %5578, %v3964_v20  }
 0x66a   :  { %5579 = vset.pattern.permute.xlu1 %v5908_v57 }
 0x66b   :  { %3070 = vperm.xlu1 %5579, %v3964_v20   ;;  %v5194_v20 = vpack.c.bf16 %v2335_v17, %v2332_v41  ;;  %v2362_v41 = vld [vmem:[#allocation8 + $0xbb0] sm:$0xff]  ;;  %v2365_v17 = vld [vmem:[#allocation8 + $0xbc8] sm:$0xff] }
 0x66f   :  { %5581 = vset.pattern.permute.xlu1 %v5905_v14 }
 0x717   :  { %v1928_v56 = vpop.f32.mrb[10].mxu1  ;;  %v1999_v22 = vpop.f32.mrb[16].mxu0 }
 0x718   :  { %v3945_v62 = vmul.f32 -1.442695, %v1928_v56  ;;  %v3947_v32 = vmul.f32 -1.442695, %v1999_v22  ;;  %v1930_v45 = vpop.f32.mrb[11].mxu1  ;;  %v4476_v1 = vpop.f32.mrb[17].mxu0 }
 0x719   :  { %v3946_v4 = vmul.f32 -1.442695, %v1930_v45  ;;  %v2337_v56 = vld [vmem:[#allocation8 + $0xae8] sm:$0xff]  ;;  %v2340_v22 = vld [vmem:[#allocation8 + $0xb00] sm:$0xff]  ;;  %v2339_v45 = vld [vmem:[#allocation8 + $0xaf8] sm:$0xff] }
 0x71a   :  { %5651 = vpow2.f32 %v3945_v62  ;;  %v5166_v62 = vpack.c.bf16 %v2340_v22, %v2337_v56  ;;  %v2338_v1 = vld [vmem:[#allocation8 + $0xaf0] sm:$0xff]  ;;  %v2367_v56 = vld [vmem:[#allocation8 + $0xbd8] sm:$0xff] }
 0x71b   :  { %5653 = vpow2.f32 %v3947_v32  ;;  %v2336_v32 = vld [vmem:[#allocation8 + $0xae0] sm:$0xff]  ;;  %v2370_v22 = vld [vmem:[#allocation8 + $0xbf0] sm:$0xff] }
 0x71c   :  { %5655 = vpow2.f32 %v3946_v4  ;;  %v5168_v4 = vpack.c.bf16 %v2339_v45, %v2336_v32  ;;  %v2366_v32 = vld [vmem:[#allocation8 + $0xbd0] sm:$0xff]  ;;  %v2369_v45 = vld [vmem:[#allocation8 + $0xbe8] sm:$0xff] }
 0x724   :  { %v5652_v49 = vpop.eup %5651 }
 0x725   :  { %v5654_v26 = vpop.eup %5653  ;;  %v2006_v27 = vadd.f32 1.0, %v5652_v49  ;;  %v2341_v49 = vld [vmem:[#allocation8 + $0xb08] sm:$0xff] }
 0x726   :  { %v5656_v51 = vpop.eup %5655  ;;  %v2030_v28 = vadd.f32 1.0, %v5654_v26  ;;  %v5197_v26 = vpack.c.bf16 %v2341_v49, %v2338_v1  ;;  %v2368_v1 = vld [vmem:[#allocation8 + $0xbe0] sm:$0xff]  ;;  %v2371_v49 = vld [vmem:[#allocation8 + $0xbf8] sm:$0xff] }
 0x727   :  { %5657 = vrcp.f32 %v2006_v27  ;;  %v2018_v57 = vadd.f32 1.0, %v5656_v51  ;;  %v2343_v27 = vld [vmem:[#allocation8 + $0xb18] sm:$0xff]  ;;  %v2346_v51 = vld [vmem:[#allocation8 + $0xb30] sm:$0xff] }
 0x728   :  { %5659 = vrcp.f32 %v2030_v28  ;;  %v5170_v28 = vpack.c.bf16 %v2346_v51, %v2343_v27 }
 0x729   :  { %5661 = vrcp.f32 %v2018_v57  ;;  %v2342_v57 = vld [vmem:[#allocation8 + $0xb10] sm:$0xff] }
 0x731   :  { %v5658_v33 = vpop.eup %5657 }
 0x732   :  { %v5660_v35 = vpop.eup %5659  ;;  %v6361_v53 = vmul.f32 %v5658_v33, %v6306_v15  ;;  %v2012_v54 = vrot.slane %v5658_v33, %v6126_v29  ;;  %v2345_v33 = vld [vmem:[#allocation8 + $0xb28] sm:$0xff] }
 0x733   :  { %v5662_v55 = vpop.eup %5661  ;;  %v6365_v40 = vmul.f32 %v5660_v35, %v6310_v16  ;;  %v2036_v44 = vrot.slane %v5660_v35, %v6128_v30  ;;  %v2049_v16 = vpop.permute.xlu1 %2048  ;;  %v2344_v35 = vld [vmem:[#allocation8 + $0xb20] sm:$0xff] }
 0x734   :  { %v6369_v47 = vmul.f32 %v5662_v55, %v6314_v18  ;;  %v2024_v50 = vrot.slane %v5662_v55, %v6130_v31  ;;  %v6373_v58 = vmul.f32 %v2012_v54, %v6318_v21  ;;  %v2325_v21 = vld [vmem:[#allocation8 + $0xa88] sm:$0xff]  ;;  %v5172_v54 = vpack.c.bf16 %v2345_v33, %v2342_v57  ;;  %v2347_v55 = vld [vmem:[#allocation8 + $0xb38] sm:$0xff] }
 0x735   :  { %v6379_v60 = vmul.f32 %v2036_v44, %v6324_v24  ;;  %v2349_v44 = vld [vmem:[#allocation8 + $0xb48] sm:$0xff] }
 0x736   :  { %v6376_v15 = vmul.f32 %v2024_v50, %v6321_v59  ;;  %v2046_v38 = vmul.f32 %v2044_v37, %v6373_v58  ;;  %v2328_v59 = vld [vmem:[#allocation8 + $0xaa0] sm:$0xff]  ;;  %v5200_v37 = vpack.c.bf16 %v2347_v55, %v2344_v35 }
 0x737   :  { %v2056_v18 = vmul.f32 %v2054_v63, %v6379_v60  ;;  %v5158_v24 = vpack.c.bf16 %v2328_v59, %v2325_v21  ;;  %v2352_v50 = vld [vmem:[#allocation8 + $0xb60] sm:$0xff]  ;;  %v2350_v63 = vld [vmem:[#allocation8 + $0xb50] sm:$0xff]  ;;  %v2355_v21 = vld [vmem:[#allocation8 + $0xb78] sm:$0xff] }
 0x738   :  { %v2051_v61 = vmul.f32 %v2049_v16, %v6376_v15  ;;  %v2348_v16 = vld [vmem:[#allocation8 + $0xb40] sm:$0xff]  ;;  %v2358_v59 = vld [vmem:[#allocation8 + $0xb90] sm:$0xff] }
 0x739   :  { %5159 = vmatprep.subr.bf16.mxu1 %v5158_v24  ;;  %v5178_v24 = vpack.c.bf16 %v2358_v59, %v2355_v21 }
 0x73a   :  { %v2057_v3 = vadd.f32 %v2051_v61, %v2046_v38  ;;  %v5174_v38 = vpack.c.bf16 %v2352_v50, %v2349_v44  ;;  %v2351_v61 = vld [vmem:[#allocation8 + $0xb58] sm:$0xff] }
 0x73c   :  { %v2058_v5 = vadd.f32 %v2057_v3, %v2056_v18  ;;  %v5176_v18 = vpack.c.bf16 %v2351_v61, %v2348_v16  ;;  %v2353_v3 = vld [vmem:[#allocation8 + $0xb68] sm:$0xff] }
 0x73e   :  { %2173 = vmatmul.mubr.f32.vlgmr.msra.gmra.mrb[12].mxu1 %v2058_v5  ;;  %4510 = vmatmul.mubr.f32.vlgmr.msra.gmra.mrb[18].mxu0 %v2058_v5  ;;  %v5203_v5 = vpack.c.bf16 %v2353_v3, %v2350_v63 }
 0x73f   :  { %2436 = vmatprep.mubr.f32.mxu1 %v5900_v0  ;;  %4544 = vmatprep.mubr.msk.f32.mxu0 %vm5901_vm0, %v5900_v0 }
 0x740   :  { %5161 = vmatpush1.bf16.msra.mxu1 %v5160_v42  ;;  %5192 = vmatpush3.bf16.msra.mxu0 %v5191_v10  ;;  %v5180_v42 = vpack.c.bf16 %v2357_v39, %v2354_v8  ;;  %v5206_v10 = vpack.c.bf16 %v2359_v25, %v2356_v9  ;;  %v2300_v39 = vpop.permute.xlu0 %2299 }
 0x741   :  { %5193 = vmatprep.subr.bf16.mxu0 %v5904_v7  ;;  %5163 = vmatprep.subr.bf16.mxu1 %v5162_v34  ;;  %v5182_v34 = vpack.c.bf16 %v2364_v12, %v2361_v11 }
 0x744   :  { %5165 = vmatpush1.bf16.msra.mxu1 %v5164_v36  ;;  %5195 = vmatpush3.bf16.msra.mxu0 %v5194_v20  ;;  %v5184_v36 = vpack.c.bf16 %v2363_v43, %v2360_v13  ;;  %v5209_v20 = vpack.c.bf16 %v2365_v17, %v2362_v41 }
 0x745   :  { %5196 = vmatprep.subr.bf16.mxu0 %v5904_v7  ;;  %5167 = vmatprep.subr.bf16.mxu1 %v5166_v62  ;;  %v5186_v62 = vpack.c.bf16 %v2370_v22, %v2367_v56  ;;  %v2570_v56 = vld [vmem:[#allocation8 + $0xc00] sm:$0xff]  ;;  %v2573_v22 = vld [vmem:[#allocation8 + $0xc18] sm:$0xff] }
 0x748   :  { %5169 = vmatpush1.bf16.msra.mxu1 %v5168_v4  ;;  %5198 = vmatpush3.bf16.msra.mxu0 %v5197_v26  ;;  %v5188_v4 = vpack.c.bf16 %v2369_v45, %v2366_v32  ;;  %v5212_v26 = vpack.c.bf16 %v2371_v49, %v2368_v1  ;;  %v5216_v32 = vpack.c.bf16 %v2573_v22, %v2570_v56  ;;  %v2575_v45 = vld [vmem:[#allocation8 + $0xc28] sm:$0xff]  ;;  %v2580_v49 = vld [vmem:[#allocation8 + $0xc50] sm:$0xff]  ;;  %v2605_v22 = vld [vmem:[#allocation8 + $0xd18] sm:$0xff] }
 0x749   :  { %5199 = vmatprep.subr.bf16.mxu0 %v5904_v7  ;;  %5171 = vmatprep.subr.bf16.mxu1 %v5170_v28 }
 0x74c   :  { %5173 = vmatpush1.bf16.msra.mxu1 %v5172_v54  ;;  %5201 = vmatpush3.bf16.msra.mxu0 %v5200_v37 }
 0x74d   :  { %5202 = vmatprep.subr.bf16.mxu0 %v5904_v7  ;;  %5175 = vmatprep.subr.bf16.mxu1 %v5174_v38  ;;  %v2290_v38 = vpop.permute.xlu1 %2289 }
 0x74e   :  { %v2292_v8 = vmul.f32 %v2290_v38, %v6282_v19  ;;  %v2302_v19 = vmul.f32 %v2300_v39, %v6285_v6  ;;  %v2571_v6 = vld [vmem:[#allocation8 + $0xc08] sm:$0xff]  ;;  %v2584_v38 = vld [vmem:[#allocation8 + $0xc70] sm:$0xff] }
 0x750   :  { %5177 = vmatpush1.bf16.msra.mxu1 %v5176_v18  ;;  %5204 = vmatpush3.bf16.msra.mxu0 %v5203_v5 }
 0x751   :  { %5205 = vmatprep.subr.bf16.mxu0 %v5904_v7  ;;  %5179 = vmatprep.subr.bf16.mxu1 %v5178_v24  ;;  %v2295_v63 = vpop.permute.xlu1 %2294 }
 0x752   :  { %v2297_v25 = vmul.f32 %v2295_v63, %v6289_v23 }
 0x754   :  { %5181 = vmatpush1.bf16.msra.mxu1 %v5180_v42  ;;  %5207 = vmatpush3.bf16.msra.mxu0 %v5206_v10  ;;  %v2318_v43 = vadd.f32 %v2297_v25, %v2292_v8  ;;  %v2590_v8 = vld [vmem:[#allocation8 + $0xca0] sm:$0xff] }
 0x755   :  { %5208 = vmatprep.subr.bf16.mxu0 %v5904_v7  ;;  %5183 = vmatprep.subr.bf16.mxu1 %v5182_v34  ;;  %v2305_v18 = vpop.permute.xlu1 %2304 }
 0x758   :  { %5185 = vmatpush1.bf16.msra.mxu1 %v5184_v36  ;;  %5210 = vmatpush3.bf16.msra.mxu0 %v5209_v20 }
 0x759   :  { %5211 = vmatprep.subr.bf16.mxu0 %v5904_v7  ;;  %5187 = vmatprep.subr.bf16.mxu1 %v5186_v62  ;;  %v2315_v34 = vpop.permute.xlu1 %2314  ;;  %v2572_v62 = vld [vmem:[#allocation8 + $0xc10] sm:$0xff] }
 0x75a   :  { %v5247_v1 = vpack.c.bf16 %v2575_v45, %v2572_v62  ;;  %v2610_v45 = vld [vmem:[#allocation8 + $0xd40] sm:$0xff] }
 0x75c   :  { %5189 = vmatpush1.bf16.msra.mxu1 %v5188_v4  ;;  %5213 = vmatpush3.bf16.msra.mxu0 %v5212_v26  ;;  %v2577_v4 = vld [vmem:[#allocation8 + $0xc38] sm:$0xff] }
 0x75d   :  { %5246 = vmatprep.subr.bf16.mxu0 %v5904_v7  ;;  %v5218_v26 = vpack.c.bf16 %v2580_v49, %v2577_v4  ;;  %v2606_v4 = vld [vmem:[#allocation8 + $0xd20] sm:$0xff]  ;;  %v2609_v49 = vld [vmem:[#allocation8 + $0xd38] sm:$0xff] }
 0x811   :  { %v2174_v27 = vpop.f32.mrb[12].mxu1  ;;  %v2245_v51 = vpop.f32.mrb[18].mxu0 }
 0x812   :  { %v3949_v28 = vmul.f32 -1.442695, %v2174_v27  ;;  %v3951_v57 = vmul.f32 -1.442695, %v2245_v51  ;;  %v2176_v33 = vpop.f32.mrb[13].mxu1  ;;  %v4511_v35 = vpop.f32.mrb[19].mxu0 }
 0x813   :  { %v3950_v54 = vmul.f32 -1.442695, %v2176_v33  ;;  %v2576_v27 = vld [vmem:[#allocation8 + $0xc30] sm:$0xff]  ;;  %v2579_v51 = vld [vmem:[#allocation8 + $0xc48] sm:$0xff]  ;;  %v2581_v33 = vld [vmem:[#allocation8 + $0xc58] sm:$0xff] }
 0x814   :  { %5663 = vpow2.f32 %v3949_v28  ;;  %v2578_v28 = vld [vmem:[#allocation8 + $0xc40] sm:$0xff] }
 0x815   :  { %5665 = vpow2.f32 %v3951_v57  ;;  %v5220_v57 = vpack.c.bf16 %v2579_v51, %v2576_v27  ;;  %v5250_v35 = vpack.c.bf16 %v2581_v33, %v2578_v28  ;;  %v5240_v27 = vpack.c.bf16 %v2609_v49, %v2606_v4  ;;  %v2611_v51 = vld [vmem:[#allocation8 + $0xd48] sm:$0xff]  ;;  %v2613_v28 = vld [vmem:[#allocation8 + $0xd58] sm:$0xff]  ;;  %v2816_v4 = vld [vmem:[#allocation8 + $0xd80] sm:$0xff] }
 0x816   :  { %5667 = vpow2.f32 %v3950_v54  ;;  %v2583_v54 = vld [vmem:[#allocation8 + $0xc68] sm:$0xff]  ;;  %v2819_v49 = vld [vmem:[#allocation8 + $0xd98] sm:$0xff] }
 0x81e   :  { %v5664_v55 = vpop.eup %5663 }
 0x81f   :  { %v5666_v37 = vpop.eup %5665  ;;  %v2252_v44 = vadd.f32 1.0, %v5664_v55  ;;  %v2586_v55 = vld [vmem:[#allocation8 + $0xc80] sm:$0xff] }
 0x820   :  { %v5668_v50 = vpop.eup %5667  ;;  %v2276_v16 = vadd.f32 1.0, %v5666_v37  ;;  %v5222_v37 = vpack.c.bf16 %v2586_v55, %v2583_v54  ;;  %v2612_v54 = vld [vmem:[#allocation8 + $0xd50] sm:$0xff]  ;;  %v2615_v55 = vld [vmem:[#allocation8 + $0xd68] sm:$0xff] }
 0x821   :  { %5669 = vrcp.f32 %v2252_v44  ;;  %v2264_v61 = vadd.f32 1.0, %v5668_v50  ;;  %v2582_v44 = vld [vmem:[#allocation8 + $0xc60] sm:$0xff]  ;;  %v2585_v50 = vld [vmem:[#allocation8 + $0xc78] sm:$0xff] }
 0x822   :  { %5671 = vrcp.f32 %v2276_v16  ;;  %v5224_v16 = vpack.c.bf16 %v2585_v50, %v2582_v44  ;;  %v5244_v44 = vpack.c.bf16 %v2615_v55, %v2612_v54  ;;  %v2617_v50 = vld [vmem:[#allocation8 + $0xd78] sm:$0xff]  ;;  %v2822_v54 = vld [vmem:[#allocation8 + $0xdb0] sm:$0xff]  ;;  %v2825_v55 = vld [vmem:[#allocation8 + $0xdc8] sm:$0xff] }
 0x823   :  { %5673 = vrcp.f32 %v2264_v61  ;;  %v2587_v61 = vld [vmem:[#allocation8 + $0xc88] sm:$0xff] }
 0x824   :  { %v5253_v63 = vpack.c.bf16 %v2587_v61, %v2584_v38 }
 0x82b   :  { %v5670_v3 = vpop.eup %5669 }
 0x82c   :  { %v5672_v5 = vpop.eup %5671  ;;  %v6396_v21 = vmul.f32 %v5670_v3, %v6361_v53  ;;  %v2258_v59 = vrot.slane %v5670_v3, %v6126_v29  ;;  %v2592_v3 = vld [vmem:[#allocation8 + $0xcb0] sm:$0xff] }
 0x82d   :  { %v5674_v24 = vpop.eup %5673  ;;  %v6401_v9 = vmul.f32 %v5672_v5, %v6365_v40  ;;  %v2282_v42 = vrot.slane %v5672_v5, %v6128_v30 }
 0x82e   :  { %v6406_v10 = vmul.f32 %v5674_v24, %v6369_v47  ;;  %v6409_v11 = vmul.f32 %v2258_v59, %v6373_v58  ;;  %v2270_v53 = vrot.slane %v5674_v24, %v6130_v31  ;;  %v2310_v47 = vpop.permute.xlu0 %2309  ;;  %v2588_v59 = vld [vmem:[#allocation8 + $0xc90] sm:$0xff]  ;;  %v2591_v24 = vld [vmem:[#allocation8 + $0xca8] sm:$0xff] }
 0x82f   :  { %v6413_v12 = vmul.f32 %v2282_v42, %v6379_v60  ;;  %v5228_v39 = vpack.c.bf16 %v2591_v24, %v2588_v59  ;;  %v2593_v42 = vld [vmem:[#allocation8 + $0xcb8] sm:$0xff] }
 0x830   :  { %v2307_v40 = vmul.f32 %v2305_v18, %v6409_v11  ;;  %v6418_v13 = vmul.f32 %v2270_v53, %v6376_v15  ;;  %v2574_v15 = vld [vmem:[#allocation8 + $0xc20] sm:$0xff]  ;;  %v2589_v18 = vld [vmem:[#allocation8 + $0xc98] sm:$0xff]  ;;  %v5256_v25 = vpack.c.bf16 %v2593_v42, %v2590_v8  ;;  %v2595_v53 = vld [vmem:[#allocation8 + $0xcc8] sm:$0xff] }
 0x831   :  { %v2317_v23 = vmul.f32 %v2315_v34, %v6413_v12  ;;  %v5214_v60 = vpack.c.bf16 %v2574_v15, %v2571_v6  ;;  %v5226_v5 = vpack.c.bf16 %v2592_v3, %v2589_v18  ;;  %v2594_v34 = vld [vmem:[#allocation8 + $0xcc0] sm:$0xff]  ;;  %v2600_v6 = vld [vmem:[#allocation8 + $0xcf0] sm:$0xff]  ;;  %v2603_v15 = vld [vmem:[#allocation8 + $0xd08] sm:$0xff] }
 0x832   :  { %v2319_v41 = vadd.f32 %v2307_v40, %v2302_v19  ;;  %v2312_v58 = vmul.f32 %v2310_v47, %v6418_v13  ;;  %v2598_v19 = vld [vmem:[#allocation8 + $0xce0] sm:$0xff]  ;;  %v2596_v47 = vld [vmem:[#allocation8 + $0xcd0] sm:$0xff]  ;;  %v5236_v56 = vpack.c.bf16 %v2603_v15, %v2600_v6 }
 0x833   :  { %5215 = vmatprep.subr.bf16.mxu1 %v5214_v60  ;;  %v5230_v40 = vpack.c.bf16 %v2598_v19, %v2595_v53  ;;  %v2602_v60 = vld [vmem:[#allocation8 + $0xd00] sm:$0xff] }
 0x834   :  { %v2321_v36 = vadd.f32 %v2319_v41, %v2318_v43  ;;  %v2320_v17 = vadd.f32 %v2317_v23, %v2312_v58  ;;  %v2597_v23 = vld [vmem:[#allocation8 + $0xcd8] sm:$0xff]  ;;  %v2599_v41 = vld [vmem:[#allocation8 + $0xce8] sm:$0xff]  ;;  %v5262_v62 = vpack.c.bf16 %v2605_v22, %v2602_v60 }
 0x835   :  { %v5232_v43 = vpack.c.bf16 %v2597_v23, %v2594_v34  ;;  %v5259_v58 = vpack.c.bf16 %v2599_v41, %v2596_v47 }
 0x836   :  { %v2322_v20 = vadd.f32 %v2321_v36, %v2320_v17  ;;  %v2601_v36 = vld [vmem:[#allocation8 + $0xcf8] sm:$0xff]  ;;  %v2604_v17 = vld [vmem:[#allocation8 + $0xd10] sm:$0xff] }
 0x838   :  { %2437 = vmatmul.mubr.f32.vlgmr.msra.gmra.mrb[14].mxu1 %v2322_v20  ;;  %4545 = vmatmul.mubr.f32.vlgmr.msra.gmra.mrb[20].mxu0 %v2322_v20  ;;  %v5234_v20 = vpack.c.bf16 %v2604_v17, %v2601_v36 }
 0x839   :  { %2682 = vmatprep.mubr.f32.mxu1 %v5900_v0  ;;  %4579 = vmatprep.mubr.msk.f32.mxu0 %vm5901_vm0, %v5900_v0 }
 0x83a   :  { %5217 = vmatpush1.bf16.msra.mxu1 %v5216_v32  ;;  %5248 = vmatpush3.bf16.msra.mxu0 %v5247_v1  ;;  %v2607_v32 = vld [vmem:[#allocation8 + $0xd28] sm:$0xff] }
 0x83b   :  { %5249 = vmatprep.subr.bf16.mxu0 %v5904_v7  ;;  %5219 = vmatprep.subr.bf16.mxu1 %v5218_v26  ;;  %v5238_v1 = vpack.c.bf16 %v2610_v45, %v2607_v32  ;;  %v2608_v26 = vld [vmem:[#allocation8 + $0xd30] sm:$0xff]  ;;  %v2817_v32 = vld [vmem:[#allocation8 + $0xd88] sm:$0xff]  ;;  %v2820_v45 = vld [vmem:[#allocation8 + $0xda0] sm:$0xff] }
 0x83c   :  { %v5265_v33 = vpack.c.bf16 %v2611_v51, %v2608_v26  ;;  %v2818_v26 = vld [vmem:[#allocation8 + $0xd90] sm:$0xff]  ;;  %v2821_v51 = vld [vmem:[#allocation8 + $0xda8] sm:$0xff] }
 0x83e   :  { %5221 = vmatpush1.bf16.msra.mxu1 %v5220_v57  ;;  %5251 = vmatpush3.bf16.msra.mxu0 %v5250_v35  ;;  %v2616_v57 = vld [vmem:[#allocation8 + $0xd70] sm:$0xff] }
 0x83f   :  { %5252 = vmatprep.subr.bf16.mxu0 %v5904_v7  ;;  %5223 = vmatprep.subr.bf16.mxu1 %v5222_v37  ;;  %v5242_v35 = vpack.c.bf16 %v2616_v57, %v2613_v28  ;;  %v2614_v37 = vld [vmem:[#allocation8 + $0xd60] sm:$0xff]  ;;  %v5303_v28 = vpack.c.bf16 %v2821_v51, %v2818_v26  ;;  %v2823_v57 = vld [vmem:[#allocation8 + $0xdb8] sm:$0xff] }
 0x840   :  { %v5268_v38 = vpack.c.bf16 %v2617_v50, %v2614_v37  ;;  %v2824_v37 = vld [vmem:[#allocation8 + $0xdc0] sm:$0xff]  ;;  %v2827_v50 = vld [vmem:[#allocation8 + $0xdd8] sm:$0xff] }
 0x841   :  { %v2848_v26 = vld [vmem:[#allocation8 + $0xe80] sm:$0xff]  ;;  %v2851_v51 = vld [vmem:[#allocation8 + $0xe98] sm:$0xff] }
 0x842   :  { %5225 = vmatpush1.bf16.msra.mxu1 %v5224_v16  ;;  %5254 = vmatpush3.bf16.msra.mxu0 %v5253_v63 }
 0x843   :  { %5255 = vmatprep.subr.bf16.mxu0 %v5904_v7  ;;  %5227 = vmatprep.subr.bf16.mxu1 %v5226_v5 }
 0x846   :  { %5229 = vmatpush1.bf16.msra.mxu1 %v5228_v39  ;;  %5257 = vmatpush3.bf16.msra.mxu0 %v5256_v25 }
 0x847   :  { %5258 = vmatprep.subr.bf16.mxu0 %v5904_v7  ;;  %5231 = vmatprep.subr.bf16.mxu1 %v5230_v40 }
 0x84a   :  { %5233 = vmatpush1.bf16.msra.mxu1 %v5232_v43  ;;  %5260 = vmatpush3.bf16.msra.mxu0 %v5259_v58  ;;  %v2554_v43 = vpop.permute.xlu1 %2553 }
 0x84b   :  { %5261 = vmatprep.subr.bf16.mxu0 %v5904_v7  ;;  %5235 = vmatprep.subr.bf16.mxu1 %v5234_v20 }
 0x84e   :  { %5237 = vmatpush1.bf16.msra.mxu1 %v5236_v56  ;;  %5263 = vmatpush3.bf16.msra.mxu0 %v5262_v62  ;;  %v2564_v56 = vpop.permute.xlu1 %2563 }
 0x84f   :  { %5264 = vmatprep.subr.bf16.mxu0 %v5904_v7  ;;  %5239 = vmatprep.subr.bf16.mxu1 %v5238_v1  ;;  %v5270_v1 = vpack.c.bf16 %v2820_v45, %v2817_v32  ;;  %v2847_v32 = vld [vmem:[#allocation8 + $0xe78] sm:$0xff]  ;;  %v2850_v45 = vld [vmem:[#allocation8 + $0xe90] sm:$0xff] }
 0x852   :  { %5241 = vmatpush1.bf16.msra.mxu1 %v5240_v27  ;;  %5266 = vmatpush3.bf16.msra.mxu0 %v5265_v33  ;;  %v5272_v27 = vpack.c.bf16 %v2819_v49, %v2816_v4  ;;  %v2826_v33 = vld [vmem:[#allocation8 + $0xdd0] sm:$0xff]  ;;  %v2849_v49 = vld [vmem:[#allocation8 + $0xe88] sm:$0xff] }
 0x853   :  { %5243 = vmatprep.subr.bf16.mxu1 %v5242_v35  ;;  %5267 = vmatprep.subr.bf16.mxu0 %v5904_v7  ;;  %v5274_v35 = vpack.c.bf16 %v2826_v33, %v2823_v57  ;;  %v2846_v4 = vld [vmem:[#allocation8 + $0xe70] sm:$0xff]  ;;  %v2853_v57 = vld [vmem:[#allocation8 + $0xea8] sm:$0xff]  ;;  %v2856_v33 = vld [vmem:[#allocation8 + $0xec0] sm:$0xff] }
 0x856   :  { %5245 = vmatpush1.bf16.msra.mxu1 %v5244_v44  ;;  %5269 = vmatpush3.bf16.msra.mxu0 %v5268_v38  ;;  %v5276_v44 = vpack.c.bf16 %v2825_v55, %v2822_v54  ;;  %v5306_v38 = vpack.c.bf16 %v2827_v50, %v2824_v37  ;;  %v2852_v54 = vld [vmem:[#allocation8 + $0xea0] sm:$0xff]  ;;  %v2855_v55 = vld [vmem:[#allocation8 + $0xeb8] sm:$0xff]  ;;  %v2854_v37 = vld [vmem:[#allocation8 + $0xeb0] sm:$0xff] }
 0x857   :  { %5302 = vmatprep.subr.bf16.mxu0 %v5904_v7  ;;  %5271 = vmatprep.subr.bf16.mxu1 %v5270_v1  ;;  %v5290_v1 = vpack.c.bf16 %v2850_v45, %v2847_v32  ;;  %v2857_v50 = vld [vmem:[#allocation8 + $0xec8] sm:$0xff]  ;;  %v2800_v32 = vpop.permute.xlu1 %2799 }
 0x90b   :  { %v2438_v16 = vpop.f32.mrb[14].mxu1  ;;  %v2509_v61 = vpop.f32.mrb[20].mxu0 }
 0x90c   :  { %v3953_v63 = vmul.f32 -1.442695, %v2438_v16  ;;  %v3955_v18 = vmul.f32 -1.442695, %v2509_v61  ;;  %v2440_v3 = vpop.f32.mrb[15].mxu1  ;;  %v4546_v5 = vpop.f32.mrb[21].mxu0 }
 0x90d   :  { %v3954_v59 = vmul.f32 -1.442695, %v2440_v3  ;;  %v2829_v16 = vld [vmem:[#allocation8 + $0xde8] sm:$0xff]  ;;  %v2832_v61 = vld [vmem:[#allocation8 + $0xe00] sm:$0xff]  ;;  %v2831_v3 = vld [vmem:[#allocation8 + $0xdf8] sm:$0xff] }
 0x90e   :  { %5675 = vpow2.f32 %v3953_v63  ;;  %v5278_v63 = vpack.c.bf16 %v2832_v61, %v2829_v16  ;;  %v2830_v5 = vld [vmem:[#allocation8 + $0xdf0] sm:$0xff]  ;;  %v5321_v61 = vpack.c.bf16 %v2857_v50, %v2854_v37  ;;  %v3085_v50 = vld [vmem:[#allocation8 + $0xf28] sm:$0xff] }
 0x90f   :  { %5677 = vpow2.f32 %v3955_v18  ;;  %v2828_v18 = vld [vmem:[#allocation8 + $0xde0] sm:$0xff]  ;;  %v2862_v16 = vld [vmem:[#allocation8 + $0xef0] sm:$0xff] }
 0x910   :  { %5679 = vpow2.f32 %v3954_v59  ;;  %v5280_v59 = vpack.c.bf16 %v2831_v3, %v2828_v18  ;;  %v2858_v18 = vld [vmem:[#allocation8 + $0xed0] sm:$0xff]  ;;  %v2861_v3 = vld [vmem:[#allocation8 + $0xee8] sm:$0xff] }
 0x911   :  { %v3082_v37 = vld [vmem:[#allocation8 + $0xf10] sm:$0xff] }
 0x918   :  { %v5676_v24 = vpop.eup %5675 }
 0x919   :  { %v5678_v8 = vpop.eup %5677  ;;  %v2516_v39 = vadd.f32 1.0, %v5676_v24  ;;  %v2833_v24 = vld [vmem:[#allocation8 + $0xe08] sm:$0xff] }
 0x91a   :  { %v5680_v42 = vpop.eup %5679  ;;  %v2540_v25 = vadd.f32 1.0, %v5678_v8  ;;  %v5309_v8 = vpack.c.bf16 %v2833_v24, %v2830_v5  ;;  %v2860_v5 = vld [vmem:[#allocation8 + $0xee0] sm:$0xff]  ;;  %v2863_v24 = vld [vmem:[#allocation8 + $0xef8] sm:$0xff] }
 0x91b   :  { %5681 = vrcp.f32 %v2516_v39  ;;  %v2528_v53 = vadd.f32 1.0, %v5680_v42  ;;  %v2835_v39 = vld [vmem:[#allocation8 + $0xe18] sm:$0xff]  ;;  %v2838_v42 = vld [vmem:[#allocation8 + $0xe30] sm:$0xff] }
 0x91c   :  { %5683 = vrcp.f32 %v2540_v25  ;;  %v5282_v25 = vpack.c.bf16 %v2838_v42, %v2835_v39 }
 0x91d   :  { %5685 = vrcp.f32 %v2528_v53  ;;  %v2834_v53 = vld [vmem:[#allocation8 + $0xe10] sm:$0xff] }
 0x925   :  { %v5682_v19 = vpop.eup %5681 }
 0x926   :  { %v5684_v40 = vpop.eup %5683  ;;  %v6434_v34 = vmul.f32 %v5682_v19, %v6396_v21  ;;  %v2522_v23 = vrot.slane %v5682_v19, %v6126_v29  ;;  %v2837_v19 = vld [vmem:[#allocation8 + $0xe28] sm:$0xff] }
 0x927   :  { %v5686_v47 = vpop.eup %5685  ;;  %v6438_v41 = vmul.f32 %v5684_v40, %v6401_v9  ;;  %v2546_v58 = vrot.slane %v5684_v40, %v6128_v30  ;;  %v2559_v9 = vpop.permute.xlu0 %2558  ;;  %v2836_v40 = vld [vmem:[#allocation8 + $0xe20] sm:$0xff] }
 0x928   :  { %v6442_v36 = vmul.f32 %v5686_v47, %v6406_v10  ;;  %v2534_v17 = vrot.slane %v5686_v47, %v6130_v31  ;;  %v6446_v20 = vmul.f32 %v2522_v23, %v6409_v11  ;;  %v5284_v23 = vpack.c.bf16 %v2837_v19, %v2834_v53  ;;  %v2839_v47 = vld [vmem:[#allocation8 + $0xe38] sm:$0xff] }
 0x929   :  { %v6452_v6 = vmul.f32 %v2546_v58, %v6413_v12  ;;  %v2841_v58 = vld [vmem:[#allocation8 + $0xe48] sm:$0xff] }
 0x92a   :  { %v6449_v21 = vmul.f32 %v2534_v17, %v6418_v13  ;;  %v2556_v15 = vmul.f32 %v2554_v43, %v6446_v20  ;;  %v5312_v43 = vpack.c.bf16 %v2839_v47, %v2836_v40  ;;  %v2844_v17 = vld [vmem:[#allocation8 + $0xe60] sm:$0xff] }
 0x92b   :  { %v2566_v10 = vmul.f32 %v2564_v56, %v6452_v6  ;;  %v2842_v56 = vld [vmem:[#allocation8 + $0xe50] sm:$0xff] }
 0x92c   :  { %v2561_v60 = vmul.f32 %v2559_v9, %v6449_v21  ;;  %v2840_v9 = vld [vmem:[#allocation8 + $0xe40] sm:$0xff] }
 0x92e   :  { %v2567_v22 = vadd.f32 %v2561_v60, %v2556_v15  ;;  %v5286_v15 = vpack.c.bf16 %v2844_v17, %v2841_v58  ;;  %v2843_v60 = vld [vmem:[#allocation8 + $0xe58] sm:$0xff] }
 0x930   :  { %v2568_v62 = vadd.f32 %v2567_v22, %v2566_v10  ;;  %v5288_v10 = vpack.c.bf16 %v2843_v60, %v2840_v9  ;;  %v2845_v22 = vld [vmem:[#allocation8 + $0xe68] sm:$0xff] }
 0x932   :  { %2683 = vmatmul.mubr.f32.vlgmr.msra.gmra.mrb[16].mxu1 %v2568_v62  ;;  %4580 = vmatmul.mubr.f32.vlgmr.msra.gmra.mrb[22].mxu0 %v2568_v62  ;;  %v5315_v62 = vpack.c.bf16 %v2845_v22, %v2842_v56 }
 0x933   :  { %2928 = vmatprep.mubr.f32.mxu1 %v5900_v0  ;;  %4614 = vmatprep.mubr.msk.f32.mxu0 %vm5901_vm0, %v5900_v0 }
 0x934   :  { %5273 = vmatpush1.bf16.msra.mxu1 %v5272_v27  ;;  %5304 = vmatpush3.bf16.msra.mxu0 %v5303_v28  ;;  %v5292_v27 = vpack.c.bf16 %v2849_v49, %v2846_v4  ;;  %v5318_v28 = vpack.c.bf16 %v2851_v51, %v2848_v26 }
 0x935   :  { %5305 = vmatprep.subr.bf16.mxu0 %v5904_v7  ;;  %5275 = vmatprep.subr.bf16.mxu1 %v5274_v35  ;;  %v5294_v35 = vpack.c.bf16 %v2856_v33, %v2853_v57  ;;  %v2810_v57 = vpop.permute.xlu1 %2809 }
 0x938   :  { %5277 = vmatpush1.bf16.msra.mxu1 %v5276_v44  ;;  %5307 = vmatpush3.bf16.msra.mxu0 %v5306_v38  ;;  %v5296_v44 = vpack.c.bf16 %v2855_v55, %v2852_v54  ;;  %v2859_v38 = vld [vmem:[#allocation8 + $0xed8] sm:$0xff]  ;;  %v3080_v54 = vld [vmem:[#allocation8 + $0xf00] sm:$0xff] }
 0x939   :  { %5308 = vmatprep.subr.bf16.mxu0 %v5904_v7  ;;  %5279 = vmatprep.subr.bf16.mxu1 %v5278_v63  ;;  %v5298_v63 = vpack.c.bf16 %v2862_v16, %v2859_v38  ;;  %v3083_v55 = vld [vmem:[#allocation8 + $0xf18] sm:$0xff]  ;;  %v5359_v38 = vpack.c.bf16 %v3085_v50, %v3082_v37  ;;  %v3112_v37 = vld [vmem:[#allocation8 + $0x1000] sm:$0xff] }
 0x93a   :  { %v3087_v16 = vld [vmem:[#allocation8 + $0xf38] sm:$0xff] }
 0x93b   :  { %v3115_v50 = vld [vmem:[#allocation8 + $0x1018] sm:$0xff] }
 0x93c   :  { %5281 = vmatpush1.bf16.msra.mxu1 %v5280_v59  ;;  %5310 = vmatpush3.bf16.msra.mxu0 %v5309_v8  ;;  %v5300_v59 = vpack.c.bf16 %v2861_v3, %v2858_v18  ;;  %v5324_v8 = vpack.c.bf16 %v2863_v24, %v2860_v5  ;;  %v3086_v18 = vld [vmem:[#allocation8 + $0xf30] sm:$0xff]  ;;  %v3089_v3 = vld [vmem:[#allocation8 + $0xf48] sm:$0xff]  ;;  %v3088_v5 = vld [vmem:[#allocation8 + $0xf40] sm:$0xff] }
 0x93d   :  { %5311 = vmatprep.subr.bf16.mxu0 %v5904_v7  ;;  %5283 = vmatprep.subr.bf16.mxu1 %v5282_v25  ;;  %v3091_v24 = vld [vmem:[#allocation8 + $0xf58] sm:$0xff] }
 0x940   :  { %5285 = vmatpush1.bf16.msra.mxu1 %v5284_v23  ;;  %5313 = vmatpush3.bf16.msra.mxu0 %v5312_v43 }
 0x941   :  { %5314 = vmatprep.subr.bf16.mxu0 %v5904_v7  ;;  %5287 = vmatprep.subr.bf16.mxu1 %v5286_v15 }
 0x944   :  { %5289 = vmatpush1.bf16.msra.mxu1 %v5288_v10  ;;  %5316 = vmatpush3.bf16.msra.mxu0 %v5315_v62 }
 0x945   :  { %5317 = vmatprep.subr.bf16.mxu0 %v5904_v7  ;;  %5291 = vmatprep.subr.bf16.mxu1 %v5290_v1 }
 0x948   :  { %5293 = vmatpush1.bf16.msra.mxu1 %v5292_v27  ;;  %5319 = vmatpush3.bf16.msra.mxu0 %v5318_v28 }
 0x949   :  { %5320 = vmatprep.subr.bf16.mxu0 %v5904_v7  ;;  %5295 = vmatprep.subr.bf16.mxu1 %v5294_v35 }
 0x94c   :  { %5297 = vmatpush1.bf16.msra.mxu1 %v5296_v44  ;;  %5322 = vmatpush3.bf16.msra.mxu0 %v5321_v61  ;;  %v5328_v44 = vpack.c.bf16 %v3083_v55, %v3080_v54  ;;  %v3090_v61 = vld [vmem:[#allocation8 + $0xf50] sm:$0xff]  ;;  %v3113_v55 = vld [vmem:[#allocation8 + $0x1008] sm:$0xff] }
 0x94d   :  { %5299 = vmatprep.subr.bf16.mxu1 %v5298_v63  ;;  %5323 = vmatprep.subr.bf16.mxu0 %v5904_v7  ;;  %v5330_v63 = vpack.c.bf16 %v3090_v61, %v3087_v16  ;;  %v3110_v54 = vld [vmem:[#allocation8 + $0xff0] sm:$0xff]  ;;  %v3117_v16 = vld [vmem:[#allocation8 + $0x1028] sm:$0xff]  ;;  %v3120_v61 = vld [vmem:[#allocation8 + $0x1040] sm:$0xff] }
 0x950   :  { %5301 = vmatpush1.bf16.msra.mxu1 %v5300_v59  ;;  %5325 = vmatpush3.bf16.msra.mxu0 %v5324_v8  ;;  %v5332_v59 = vpack.c.bf16 %v3089_v3, %v3086_v18  ;;  %v5362_v8 = vpack.c.bf16 %v3091_v24, %v3088_v5  ;;  %v3116_v18 = vld [vmem:[#allocation8 + $0x1020] sm:$0xff]  ;;  %v3119_v3 = vld [vmem:[#allocation8 + $0x1038] sm:$0xff]  ;;  %v3118_v5 = vld [vmem:[#allocation8 + $0x1030] sm:$0xff] }
 0x951   :  { %5358 = vmatprep.subr.bf16.mxu0 %v5904_v7  ;;  %v3121_v24 = vld [vmem:[#allocation8 + $0x1048] sm:$0xff] }
 0xa05   :  { %v2684_v39 = vpop.f32.mrb[16].mxu1  ;;  %v2755_v42 = vpop.f32.mrb[22].mxu0 }
 0xa06   :  { %v3957_v25 = vmul.f32 -1.442695, %v2684_v39  ;;  %v3959_v53 = vmul.f32 -1.442695, %v2755_v42  ;;  %v2686_v19 = vpop.f32.mrb[17].mxu1  ;;  %v4581_v40 = vpop.f32.mrb[23].mxu0 }
 0xa07   :  { %v3958_v23 = vmul.f32 -1.442695, %v2686_v19  ;;  %v3093_v39 = vld [vmem:[#allocation8 + $0xf68] sm:$0xff]  ;;  %v3096_v42 = vld [vmem:[#allocation8 + $0xf80] sm:$0xff]  ;;  %v3095_v19 = vld [vmem:[#allocation8 + $0xf78] sm:$0xff] }
 0xa08   :  { %5687 = vpow2.f32 %v3957_v25  ;;  %v5334_v25 = vpack.c.bf16 %v3096_v42, %v3093_v39  ;;  %v3094_v40 = vld [vmem:[#allocation8 + $0xf70] sm:$0xff]  ;;  %v3123_v39 = vld [vmem:[#allocation8 + $0x1058] sm:$0xff] }
 0xa09   :  { %5689 = vpow2.f32 %v3959_v53  ;;  %v3092_v53 = vld [vmem:[#allocation8 + $0xf60] sm:$0xff]  ;;  %v3126_v42 = vld [vmem:[#allocation8 + $0x1070] sm:$0xff] }
 0xa0a   :  { %5691 = vpow2.f32 %v3958_v23  ;;  %v5336_v23 = vpack.c.bf16 %v3095_v19, %v3092_v53  ;;  %v3122_v53 = vld [vmem:[#allocation8 + $0x1050] sm:$0xff]  ;;  %v3125_v19 = vld [vmem:[#allocation8 + $0x1068] sm:$0xff] }
 0xa12   :  { %v5688_v47 = vpop.eup %5687 }
 0xa13   :  { %v5690_v43 = vpop.eup %5689  ;;  %v2762_v58 = vadd.f32 1.0, %v5688_v47  ;;  %v3097_v47 = vld [vmem:[#allocation8 + $0xf88] sm:$0xff] }
 0xa14   :  { %v5692_v17 = vpop.eup %5691  ;;  %v2786_v15 = vadd.f32 1.0, %v5690_v43  ;;  %v5365_v43 = vpack.c.bf16 %v3097_v47, %v3094_v40  ;;  %v3124_v40 = vld [vmem:[#allocation8 + $0x1060] sm:$0xff]  ;;  %v3127_v47 = vld [vmem:[#allocation8 + $0x1078] sm:$0xff] }
 0xa15   :  { %5693 = vrcp.f32 %v2762_v58  ;;  %v2774_v9 = vadd.f32 1.0, %v5692_v17  ;;  %v3099_v58 = vld [vmem:[#allocation8 + $0xf98] sm:$0xff]  ;;  %v3102_v17 = vld [vmem:[#allocation8 + $0xfb0] sm:$0xff] }
 0xa16   :  { %5695 = vrcp.f32 %v2786_v15  ;;  %v5338_v15 = vpack.c.bf16 %v3102_v17, %v3099_v58  ;;  %v3968_v58 = vld [vmem:[%s6682_s4 + $0x2c] sm:$0x7]  ;;  %v3972_v17 = vld [vmem:[%s6682_s4 + $0x30] sm:$0x7] }
 0xa17   :  { %5697 = vrcp.f32 %v2774_v9  ;;  %v3098_v9 = vld [vmem:[#allocation8 + $0xf90] sm:$0xff]  ;;  %3314 = vperm.xlu1 %5581, %v3968_v58   ;;  %3309 = vperm.xlu0 %5580, %v3968_v58  }
 0xa1b   :  { %5582 = vset.pattern.permute.xlu1 %v5903_v2  ;;  %3555 = vperm.xlu0 %5580, %v3972_v17  }
 0xa1c   :  { %3319 = vperm.xlu1 %5582, %v3968_v58   ;;  %v3332_v58 = vld [vmem:[#allocation8 + $0x10b0] sm:$0xff] }
 0xa1f   :  { %v5694_v60 = vpop.eup %5693  ;;  %5584 = vset.pattern.permute.xlu0 %v5903_v2 }
 0xa20   :  { %v5696_v56 = vpop.eup %5695  ;;  %v6469_v10 = vmul.f32 %v5694_v60, %v6434_v34  ;;  %v2768_v22 = vrot.slane %v5694_v60, %v6126_v29  ;;  %v3101_v60 = vld [vmem:[#allocation8 + $0xfa8] sm:$0xff]  ;;  %5583 = vset.pattern.permute.xlu1 %v5905_v14  ;;  %3565 = vperm.xlu0 %5584, %v3972_v17  }
 0xa21   :  { %v5698_v62 = vpop.eup %5697  ;;  %v6473_v45 = vmul.f32 %v5696_v56, %v6438_v41  ;;  %v2792_v1 = vrot.slane %v5696_v56, %v6128_v30  ;;  %v2805_v41 = vpop.permute.xlu0 %2804  ;;  %v3100_v56 = vld [vmem:[#allocation8 + $0xfa0] sm:$0xff]  ;;  %3560 = vperm.xlu1 %5583, %v3972_v17   ;;  %v3335_v17 = vld [vmem:[#allocation8 + $0x10c8] sm:$0xff] }
 0xa22   :  { %v6477_v4 = vmul.f32 %v5698_v62, %v6442_v36  ;;  %v2780_v49 = vrot.slane %v5698_v62, %v6130_v31  ;;  %v6481_v26 = vmul.f32 %v2768_v22, %v6446_v20  ;;  %v3081_v20 = vld [vmem:[#allocation8 + $0xf08] sm:$0xff]  ;;  %v5340_v22 = vpack.c.bf16 %v3101_v60, %v3098_v9  ;;  %v3103_v62 = vld [vmem:[#allocation8 + $0xfb8] sm:$0xff] }
 0xa23   :  { %v6487_v27 = vmul.f32 %v2792_v1, %v6452_v6  ;;  %v3105_v1 = vld [vmem:[#allocation8 + $0xfc8] sm:$0xff] }
 0xa24   :  { %v6484_v34 = vmul.f32 %v2780_v49, %v6449_v21  ;;  %v2802_v51 = vmul.f32 %v2800_v32, %v6481_v26  ;;  %v3084_v21 = vld [vmem:[#allocation8 + $0xf20] sm:$0xff]  ;;  %v5368_v32 = vpack.c.bf16 %v3103_v62, %v3100_v56 }
 0xa25   :  { %v2812_v36 = vmul.f32 %v2810_v57, %v6487_v27  ;;  %v5326_v6 = vpack.c.bf16 %v3084_v21, %v3081_v20  ;;  %v3108_v49 = vld [vmem:[#allocation8 + $0xfe0] sm:$0xff]  ;;  %v3106_v57 = vld [vmem:[#allocation8 + $0xfd0] sm:$0xff]  ;;  %v3111_v20 = vld [vmem:[#allocation8 + $0xff8] sm:$0xff] }
 0xa26   :  { %v2807_v28 = vmul.f32 %v2805_v41, %v6484_v34  ;;  %v3104_v41 = vld [vmem:[#allocation8 + $0xfc0] sm:$0xff]  ;;  %v3114_v21 = vld [vmem:[#allocation8 + $0x1010] sm:$0xff] }
 0xa27   :  { %5327 = vmatprep.subr.bf16.mxu1 %v5326_v6  ;;  %v5346_v6 = vpack.c.bf16 %v3114_v21, %v3111_v20 }
 0xa28   :  { %v2813_v33 = vadd.f32 %v2807_v28, %v2802_v51  ;;  %v5342_v51 = vpack.c.bf16 %v3108_v49, %v3105_v1  ;;  %v3107_v28 = vld [vmem:[#allocation8 + $0xfd8] sm:$0xff]  ;;  %v3051_v49 = vpop.permute.xlu1 %3050 }
 0xa2a   :  { %v2814_v35 = vadd.f32 %v2813_v33, %v2812_v36  ;;  %v5344_v36 = vpack.c.bf16 %v3107_v28, %v3104_v41  ;;  %v3109_v33 = vld [vmem:[#allocation8 + $0xfe8] sm:$0xff] }
 0xa2c   :  { %2929 = vmatmul.mubr.f32.vlgmr.msra.gmra.mrb[18].mxu1 %v2814_v35  ;;  %4615 = vmatmul.mubr.f32.vlgmr.msra.gmra.mrb[24].mxu0 %v2814_v35  ;;  %v5371_v35 = vpack.c.bf16 %v3109_v33, %v3106_v57  ;;  %v3056_v57 = vpop.permute.xlu1 %3055  ;;  %v3046_v33 = vpop.permute.xlu0 %3045 }
 0xa2d   :  { %3192 = vmatprep.mubr.f32.mxu1 %v5900_v0  ;;  %4649 = vmatprep.mubr.msk.f32.mxu0 %vm5901_vm0, %v5900_v0 }
 0xa2e   :  { %5329 = vmatpush1.bf16.msra.mxu1 %v5328_v44  ;;  %5360 = vmatpush3.bf16.msra.mxu0 %v5359_v38  ;;  %v5348_v44 = vpack.c.bf16 %v3113_v55, %v3110_v54  ;;  %v5374_v38 = vpack.c.bf16 %v3115_v50, %v3112_v37  ;;  %v3048_v55 = vmul.f32 %v3046_v33, %v6409_v11  ;;  %v3344_v33 = vld [vmem:[#allocation8 + $0x1110] sm:$0xff] }
 0xa2f   :  { %5361 = vmatprep.subr.bf16.mxu0 %v5904_v7  ;;  %5331 = vmatprep.subr.bf16.mxu1 %v5330_v63  ;;  %v5350_v63 = vpack.c.bf16 %v3120_v61, %v3117_v16  ;;  %v3058_v11 = vmul.f32 %v3056_v57, %v6413_v12  ;;  %v3327_v12 = vld [vmem:[#allocation8 + $0x1088] sm:$0xff]  ;;  %v3348_v57 = vld [vmem:[#allocation8 + $0x1130] sm:$0xff] }
 0xa30   :  { %v3061_v50 = vpop.permute.xlu0 %3060 }
 0xa32   :  { %5333 = vmatpush1.bf16.msra.mxu1 %v5332_v59  ;;  %5363 = vmatpush3.bf16.msra.mxu0 %v5362_v8  ;;  %v5352_v59 = vpack.c.bf16 %v3119_v3, %v3116_v18  ;;  %v5377_v8 = vpack.c.bf16 %v3121_v24, %v3118_v5 }
 0xa33   :  { %5364 = vmatprep.subr.bf16.mxu0 %v5904_v7  ;;  %5335 = vmatprep.subr.bf16.mxu1 %v5334_v25  ;;  %v5354_v25 = vpack.c.bf16 %v3126_v42, %v3123_v39  ;;  %v3326_v39 = vld [vmem:[#allocation8 + $0x1080] sm:$0xff]  ;;  %v3329_v42 = vld [vmem:[#allocation8 + $0x1098] sm:$0xff] }
 0xa36   :  { %5337 = vmatpush1.bf16.msra.mxu1 %v5336_v23  ;;  %5366 = vmatpush3.bf16.msra.mxu0 %v5365_v43  ;;  %v5356_v23 = vpack.c.bf16 %v3125_v19, %v3122_v53  ;;  %v5380_v43 = vpack.c.bf16 %v3127_v47, %v3124_v40  ;;  %v5384_v53 = vpack.c.bf16 %v3329_v42, %v3326_v39  ;;  %v3331_v19 = vld [vmem:[#allocation8 + $0x10a8] sm:$0xff]  ;;  %v3336_v47 = vld [vmem:[#allocation8 + $0x10d0] sm:$0xff] }
 0xa37   :  { %5367 = vmatprep.subr.bf16.mxu0 %v5904_v7  ;;  %5339 = vmatprep.subr.bf16.mxu1 %v5338_v15  ;;  %v3363_v42 = vld [vmem:[#allocation8 + $0x11a8] sm:$0xff] }
 0xa3a   :  { %5341 = vmatpush1.bf16.msra.mxu1 %v5340_v22  ;;  %5369 = vmatpush3.bf16.msra.mxu0 %v5368_v32 }
 0xa3b   :  { %5370 = vmatprep.subr.bf16.mxu0 %v5904_v7  ;;  %5343 = vmatprep.subr.bf16.mxu1 %v5342_v51 }
 0xa3e   :  { %5345 = vmatpush1.bf16.msra.mxu1 %v5344_v36  ;;  %5372 = vmatpush3.bf16.msra.mxu0 %v5371_v35  ;;  %v3066_v36 = vpop.permute.xlu1 %3065 }
 0xa3f   :  { %5373 = vmatprep.subr.bf16.mxu0 %v5904_v7  ;;  %5347 = vmatprep.subr.bf16.mxu1 %v5346_v6 }
 0xa42   :  { %5349 = vmatpush1.bf16.msra.mxu1 %v5348_v44  ;;  %5375 = vmatpush3.bf16.msra.mxu0 %v5374_v38  ;;  %v3053_v38 = vmul.f32 %v3051_v49, %v6418_v13  ;;  %v3341_v49 = vld [vmem:[#allocation8 + $0x10f8] sm:$0xff] }
 0xa43   :  { %5376 = vmatprep.subr.bf16.mxu0 %v5904_v7  ;;  %5351 = vmatprep.subr.bf16.mxu1 %v5350_v63 }
 0xa46   :  { %5353 = vmatpush1.bf16.msra.mxu1 %v5352_v59  ;;  %5378 = vmatpush3.bf16.msra.mxu0 %v5377_v8 }
 0xa47   :  { %5379 = vmatprep.subr.bf16.mxu0 %v5904_v7  ;;  %5355 = vmatprep.subr.bf16.mxu1 %v5354_v25  ;;  %v3328_v25 = vld [vmem:[#allocation8 + $0x1090] sm:$0xff] }
 0xa48   :  { %v5415_v40 = vpack.c.bf16 %v3331_v19, %v3328_v25  ;;  %v3366_v25 = vld [vmem:[#allocation8 + $0x11c0] sm:$0xff] }
 0xa49   :  { %v3362_v19 = vld [vmem:[#allocation8 + $0x11a0] sm:$0xff] }
 0xa4a   :  { %5357 = vmatpush1.bf16.msra.mxu1 %v5356_v23  ;;  %5381 = vmatpush3.bf16.msra.mxu0 %v5380_v43  ;;  %v3333_v23 = vld [vmem:[#allocation8 + $0x10b8] sm:$0xff] }
 0xa4b   :  { %5414 = vmatprep.subr.bf16.mxu0 %v5904_v7  ;;  %v5386_v43 = vpack.c.bf16 %v3336_v47, %v3333_v23  ;;  %v3364_v23 = vld [vmem:[#allocation8 + $0x11b0] sm:$0xff] }
 0xaff   :  { %v2930_v15 = vpop.f32.mrb[18].mxu1  ;;  %v3001_v9 = vpop.f32.mrb[24].mxu0 }
 0xb00   :  { %v3961_v60 = vmul.f32 -1.442695, %v2930_v15  ;;  %v3963_v56 = vmul.f32 -1.442695, %v3001_v9  ;;  %v2932_v22 = vpop.f32.mrb[19].mxu1  ;;  %v4616_v62 = vpop.f32.mrb[25].mxu0  ;;  %v5388_v9 = vpack.c.bf16 %v3335_v17, %v3332_v58 }
 0xb01   :  { %v3962_v32 = vmul.f32 -1.442695, %v2932_v22  ;;  %v3334_v15 = vld [vmem:[#allocation8 + $0x10c0] sm:$0xff]  ;;  %v3339_v22 = vld [vmem:[#allocation8 + $0x10e8] sm:$0xff]  ;;  %v3369_v17 = vld [vmem:[#allocation8 + $0x11d8] sm:$0xff] }
 0xb02   :  { %5699 = vpow2.f32 %v3961_v60  ;;  %v3337_v60 = vld [vmem:[#allocation8 + $0x10d8] sm:$0xff]  ;;  %v3342_v62 = vld [vmem:[#allocation8 + $0x1100] sm:$0xff] }
 0xb03   :  { %5701 = vpow2.f32 %v3963_v56  ;;  %v5418_v56 = vpack.c.bf16 %v3337_v60, %v3334_v15  ;;  %v3372_v15 = vld [vmem:[#allocation8 + $0x11f0] sm:$0xff] }
 0xb04   :  { %5703 = vpow2.f32 %v3962_v32  ;;  %v5390_v32 = vpack.c.bf16 %v3342_v62, %v3339_v22  ;;  %v3368_v60 = vld [vmem:[#allocation8 + $0x11d0] sm:$0xff]  ;;  %v3370_v22 = vld [vmem:[#allocation8 + $0x11e0] sm:$0xff] }
 0xb0c   :  { %v5700_v1 = vpop.eup %5699 }
 0xb0d   :  { %v5702_v51 = vpop.eup %5701  ;;  %v3008_v41 = vadd.f32 1.0, %v5700_v1  ;;  %v3338_v1 = vld [vmem:[#allocation8 + $0x10e0] sm:$0xff] }
 0xb0e   :  { %v5704_v28 = vpop.eup %5703  ;;  %v3032_v2 = vadd.f32 1.0, %v5702_v51  ;;  %v3340_v51 = vld [vmem:[#allocation8 + $0x10f0] sm:$0xff] }
 0xb0f   :  { %5705 = vrcp.f32 %v3008_v41  ;;  %v3020_v14 = vadd.f32 1.0, %v5704_v28  ;;  %v5392_v41 = vpack.c.bf16 %v3341_v49, %v3338_v1  ;;  %v3343_v28 = vld [vmem:[#allocation8 + $0x1108] sm:$0xff] }
 0xb10   :  { %5707 = vrcp.f32 %v3032_v2  ;;  %v5421_v2 = vpack.c.bf16 %v3343_v28, %v3340_v51 }
 0xb11   :  { %5709 = vrcp.f32 %v3020_v14  ;;  %v3345_v14 = vld [vmem:[#allocation8 + $0x1118] sm:$0xff] }
 0xb19   :  { %v5706_v35 = vpop.eup %5705 }
 0xb1a   :  { %v5708_v20 = vpop.eup %5707  ;;  %v6513_v21 = vmul.f32 %v5706_v35, %v6469_v10  ;;  %v3014_v6 = vrot.slane %v5706_v35, %v6126_v29  ;;  %v3071_v10 = vpop.permute.xlu1 %3070  ;;  %v3347_v35 = vld [vmem:[#allocation8 + $0x1128] sm:$0xff] }
 0xb1b   :  { %v5710_v54 = vpop.eup %5709  ;;  %v6518_v37 = vmul.f32 %v5708_v20, %v6473_v45  ;;  %v3038_v44 = vrot.slane %v5708_v20, %v6128_v30  ;;  %v3346_v20 = vld [vmem:[#allocation8 + $0x1120] sm:$0xff] }
 0xb1c   :  { %v6523_v16 = vmul.f32 %v5710_v54, %v6477_v4  ;;  %v3026_v61 = vrot.slane %v5710_v54, %v6130_v31  ;;  %v6527_v63 = vmul.f32 %v3014_v6, %v6481_v26  ;;  %v3074_v4 = vadd.f32 %v3053_v38, %v3048_v55  ;;  %v3349_v54 = vld [vmem:[#allocation8 + $0x1138] sm:$0xff] }
 0xb1d   :  { %v6530_v18 = vmul.f32 %v3038_v44, %v6487_v27  ;;  %v5396_v6 = vpack.c.bf16 %v3347_v35, %v3344_v33  ;;  %v5424_v55 = vpack.c.bf16 %v3349_v54, %v3346_v20  ;;  %v3351_v44 = vld [vmem:[#allocation8 + $0x1148] sm:$0xff] }
 0xb1e   :  { %v6534_v45 = vmul.f32 %v3026_v61, %v6484_v34  ;;  %v3063_v3 = vmul.f32 %v3061_v50, %v6527_v63  ;;  %v3330_v34 = vld [vmem:[#allocation8 + $0x10a0] sm:$0xff] }
 0xb1f   :  { %v3073_v13 = vmul.f32 %v3071_v10, %v6530_v18  ;;  %v5382_v27 = vpack.c.bf16 %v3330_v34, %v3327_v12  ;;  %v3354_v50 = vld [vmem:[#allocation8 + $0x1160] sm:$0xff]  ;;  %v3353_v10 = vld [vmem:[#allocation8 + $0x1158] sm:$0xff] }
 0xb20   :  { %v3068_v5 = vmul.f32 %v3066_v36, %v6534_v45  ;;  %v3075_v59 = vadd.f32 %v3063_v3, %v3058_v11  ;;  %v5394_v36 = vpack.c.bf16 %v3348_v57, %v3345_v14  ;;  %v5398_v38 = vpack.c.bf16 %v3354_v50, %v3351_v44  ;;  %v3350_v61 = vld [vmem:[#allocation8 + $0x1140] sm:$0xff]  ;;  %v3352_v11 = vld [vmem:[#allocation8 + $0x1150] sm:$0xff]  ;;  %v3315_v44 = vpop.permute.xlu1 %3314 }
 0xb21   :  { %5383 = vmatprep.subr.bf16.mxu1 %v5382_v27  ;;  %v5400_v3 = vpack.c.bf16 %v3353_v10, %v3350_v61  ;;  %v3358_v12 = vld [vmem:[#allocation8 + $0x1180] sm:$0xff]  ;;  %v3361_v27 = vld [vmem:[#allocation8 + $0x1198] sm:$0xff] }
 0xb22   :  { %v3076_v24 = vadd.f32 %v3073_v13, %v3068_v5  ;;  %v3077_v8 = vadd.f32 %v3075_v59, %v3074_v4  ;;  %v3355_v13 = vld [vmem:[#allocation8 + $0x1168] sm:$0xff]  ;;  %v3357_v5 = vld [vmem:[#allocation8 + $0x1178] sm:$0xff]  ;;  %v3360_v59 = vld [vmem:[#allocation8 + $0x1190] sm:$0xff]  ;;  %v5430_v39 = vpack.c.bf16 %v3361_v27, %v3358_v12 }
 0xb23   :  { %v5427_v4 = vpack.c.bf16 %v3355_v13, %v3352_v11 }
 0xb24   :  { %v3078_v26 = vadd.f32 %v3077_v8, %v3076_v24  ;;  %v5402_v24 = vpack.c.bf16 %v3360_v59, %v3357_v5  ;;  %v3356_v8 = vld [vmem:[#allocation8 + $0x1170] sm:$0xff]  ;;  %v3310_v59 = vpop.permute.xlu0 %3309 }
 0xb26   :  { %3193 = vmatmul.mubr.f32.vlgmr.msra.gmra.mrb[20].mxu1 %v3078_v26  ;;  %4650 = vmatmul.mubr.f32.vlgmr.msra.gmra.mrb[26].mxu0 %v3078_v26  ;;  %v3359_v26 = vld [vmem:[#allocation8 + $0x1188] sm:$0xff] }
 0xb27   :  { %3438 = vmatprep.mubr.f32.mxu1 %v5900_v0  ;;  %4684 = vmatprep.mubr.msk.f32.mxu0 %vm5901_vm0, %v5900_v0  ;;  %v5404_v34 = vpack.c.bf16 %v3359_v26, %v3356_v8 }
 0xb28   :  { %5385 = vmatpush1.bf16.msra.mxu1 %v5384_v53  ;;  %5416 = vmatpush3.bf16.msra.mxu0 %v5415_v40  ;;  %v5406_v53 = vpack.c.bf16 %v3366_v25, %v3363_v42  ;;  %v3365_v40 = vld [vmem:[#allocation8 + $0x11b8] sm:$0xff]  ;;  %v3574_v42 = vld [vmem:[#allocation8 + $0x1210] sm:$0xff] }
 0xb29   :  { %5417 = vmatprep.subr.bf16.mxu0 %v5904_v7  ;;  %5387 = vmatprep.subr.bf16.mxu1 %v5386_v43  ;;  %v5408_v47 = vpack.c.bf16 %v3365_v40, %v3362_v19  ;;  %v3367_v43 = vld [vmem:[#allocation8 + $0x11c8] sm:$0xff]  ;;  %v3579_v40 = vld [vmem:[#allocation8 + $0x1238] sm:$0xff] }
 0xb2a   :  { %v5433_v58 = vpack.c.bf16 %v3367_v43, %v3364_v23  ;;  %v3582_v23 = vld [vmem:[#allocation8 + $0x1250] sm:$0xff] }
 0xb2b   :  { %v3578_v43 = vld [vmem:[#allocation8 + $0x1230] sm:$0xff] }
 0xb2c   :  { %5389 = vmatpush1.bf16.msra.mxu1 %v5388_v9  ;;  %5419 = vmatpush3.bf16.msra.mxu0 %v5418_v56  ;;  %v5410_v9 = vpack.c.bf16 %v3372_v15, %v3369_v17  ;;  %v3371_v56 = vld [vmem:[#allocation8 + $0x11e8] sm:$0xff]  ;;  %v3580_v17 = vld [vmem:[#allocation8 + $0x1240] sm:$0xff] }
 0xb2d   :  { %5420 = vmatprep.subr.bf16.mxu0 %v5904_v7  ;;  %5391 = vmatprep.subr.bf16.mxu1 %v5390_v32  ;;  %v5412_v62 = vpack.c.bf16 %v3371_v56, %v3368_v60  ;;  %v3373_v32 = vld [vmem:[#allocation8 + $0x11f8] sm:$0xff]  ;;  %v3585_v56 = vld [vmem:[#allocation8 + $0x1268] sm:$0xff] }
 0xb2e   :  { %v5436_v1 = vpack.c.bf16 %v3373_v32, %v3370_v22  ;;  %v3588_v22 = vld [vmem:[#allocation8 + $0x1280] sm:$0xff] }
 0xb2f   :  { %v3584_v32 = vld [vmem:[#allocation8 + $0x1260] sm:$0xff] }
 0xb30   :  { %5393 = vmatpush1.bf16.msra.mxu1 %v5392_v41  ;;  %5422 = vmatpush3.bf16.msra.mxu0 %v5421_v2 }
 0xb31   :  { %5423 = vmatprep.subr.bf16.mxu0 %v5904_v7  ;;  %5395 = vmatprep.subr.bf16.mxu1 %v5394_v36 }
 0xb34   :  { %5397 = vmatpush1.bf16.msra.mxu1 %v5396_v6  ;;  %5425 = vmatpush3.bf16.msra.mxu0 %v5424_v55 }
 0xb35   :  { %5426 = vmatprep.subr.bf16.mxu0 %v5904_v7  ;;  %5399 = vmatprep.subr.bf16.mxu1 %v5398_v38 }
 0xb38   :  { %5401 = vmatpush1.bf16.msra.mxu1 %v5400_v3  ;;  %5428 = vmatpush3.bf16.msra.mxu0 %v5427_v4 }
 0xb39   :  { %5429 = vmatprep.subr.bf16.mxu0 %v5904_v7  ;;  %5403 = vmatprep.subr.bf16.mxu1 %v5402_v24 }
 0xb3c   :  { %5405 = vmatpush1.bf16.msra.mxu1 %v5404_v34  ;;  %5431 = vmatpush3.bf16.msra.mxu0 %v5430_v39  ;;  %v3572_v39 = vld [vmem:[#allocation8 + $0x1200] sm:$0xff] }
 0xb3d   :  { %5432 = vmatprep.subr.bf16.mxu0 %v5904_v7  ;;  %5407 = vmatprep.subr.bf16.mxu1 %v5406_v53  ;;  %v3577_v53 = vld [vmem:[#allocation8 + $0x1228] sm:$0xff] }
 0xb3e   :  { %v5471_v19 = vpack.c.bf16 %v3577_v53, %v3574_v42  ;;  %v3612_v42 = vld [vmem:[#allocation8 + $0x1340] sm:$0xff] }
 0xb3f   :  { %v3608_v53 = vld [vmem:[#allocation8 + $0x1320] sm:$0xff] }
 0xb40   :  { %5409 = vmatpush1.bf16.msra.mxu1 %v5408_v47  ;;  %5434 = vmatpush3.bf16.msra.mxu0 %v5433_v58  ;;  %v5442_v47 = vpack.c.bf16 %v3582_v23, %v3579_v40  ;;  %v3581_v58 = vld [vmem:[#allocation8 + $0x1248] sm:$0xff]  ;;  %v3610_v40 = vld [vmem:[#allocation8 + $0x1330] sm:$0xff] }
 0xb41   :  { %5435 = vmatprep.subr.bf16.mxu0 %v5904_v7  ;;  %5411 = vmatprep.subr.bf16.mxu1 %v5410_v9  ;;  %v5444_v15 = vpack.c.bf16 %v3581_v58, %v3578_v43  ;;  %v3583_v9 = vld [vmem:[#allocation8 + $0x1258] sm:$0xff] }
 0xb42   :  { %v5474_v60 = vpack.c.bf16 %v3583_v9, %v3580_v17  ;;  %v3615_v58 = vld [vmem:[#allocation8 + $0x1358] sm:$0xff]  ;;  %v3618_v17 = vld [vmem:[#allocation8 + $0x1370] sm:$0xff] }
 0xb43   :  { %v3614_v9 = vld [vmem:[#allocation8 + $0x1350] sm:$0xff] }
 0xb44   :  { %5413 = vmatpush1.bf16.msra.mxu1 %v5412_v62  ;;  %5437 = vmatpush3.bf16.msra.mxu0 %v5436_v1  ;;  %v5446_v62 = vpack.c.bf16 %v3588_v22, %v3585_v56  ;;  %v3587_v1 = vld [vmem:[#allocation8 + $0x1278] sm:$0xff]  ;;  %v3616_v56 = vld [vmem:[#allocation8 + $0x1360] sm:$0xff] }
 0xb45   :  { %5470 = vmatprep.subr.bf16.mxu0 %v5904_v7 }
 0xbf9   :  { %v3194_v49 = vpop.f32.mrb[20].mxu1  ;;  %v3265_v51 = vpop.f32.mrb[26].mxu0 }
 0xbfa   :  { %v3965_v41 = vmul.f32 -1.442695, %v3194_v49  ;;  %v3967_v28 = vmul.f32 -1.442695, %v3265_v51  ;;  %v3196_v2 = vpop.f32.mrb[21].mxu1  ;;  %v4651_v14 = vpop.f32.mrb[27].mxu0  ;;  %v5448_v51 = vpack.c.bf16 %v3587_v1, %v3584_v32 }
 0xbfb   :  { %v3966_v57 = vmul.f32 -1.442695, %v3196_v2  ;;  %v3586_v49 = vld [vmem:[#allocation8 + $0x1270] sm:$0xff]  ;;  %v3591_v2 = vld [vmem:[#allocation8 + $0x1298] sm:$0xff] }
 0xbfc   :  { %5711 = vpow2.f32 %v3965_v41  ;;  %v3589_v41 = vld [vmem:[#allocation8 + $0x1288] sm:$0xff]  ;;  %v3594_v14 = vld [vmem:[#allocation8 + $0x12b0] sm:$0xff] }
 0xbfd   :  { %5713 = vpow2.f32 %v3967_v28  ;;  %v5477_v28 = vpack.c.bf16 %v3589_v41, %v3586_v49 }
 0xbfe   :  { %5715 = vpow2.f32 %v3966_v57  ;;  %v5450_v57 = vpack.c.bf16 %v3594_v14, %v3591_v2 }
 0xc06   :  { %v5712_v36 = vpop.eup %5711 }
 0xc07   :  { %v5714_v33 = vpop.eup %5713  ;;  %v3272_v35 = vadd.f32 1.0, %v5712_v36  ;;  %v3590_v36 = vld [vmem:[#allocation8 + $0x1290] sm:$0xff] }
 0xc08   :  { %v5716_v20 = vpop.eup %5715  ;;  %v3296_v6 = vadd.f32 1.0, %v5714_v33  ;;  %v3593_v33 = vld [vmem:[#allocation8 + $0x12a8] sm:$0xff] }
 0xc09   :  { %5717 = vrcp.f32 %v3272_v35  ;;  %v3284_v54 = vadd.f32 1.0, %v5716_v20  ;;  %v3592_v35 = vld [vmem:[#allocation8 + $0x12a0] sm:$0xff]  ;;  %v5452_v20 = vpack.c.bf16 %v3593_v33, %v3590_v36 }
 0xc0a   :  { %5719 = vrcp.f32 %v3296_v6  ;;  %v3595_v6 = vld [vmem:[#allocation8 + $0x12b8] sm:$0xff] }
 0xc0b   :  { %5721 = vrcp.f32 %v3284_v54  ;;  %v5480_v54 = vpack.c.bf16 %v3595_v6, %v3592_v35 }
 0xc13   :  { %v5718_v55 = vpop.eup %5717 }
 0xc14   :  { %v5720_v50 = vpop.eup %5719  ;;  %v6551_v38 = vmul.f32 %v5718_v55, %v6513_v21  ;;  %v3278_v61 = vrot.slane %v5718_v55, %v6126_v29  ;;  %v3597_v55 = vld [vmem:[#allocation8 + $0x12c8] sm:$0xff] }
 0xc15   :  { %v5722_v10 = vpop.eup %5721  ;;  %v6555_v11 = vmul.f32 %v5720_v50, %v6518_v37  ;;  %v3302_v3 = vrot.slane %v5720_v50, %v6128_v30  ;;  %v3320_v37 = vpop.permute.xlu1 %3319 }
 0xc16   :  { %v6559_v13 = vmul.f32 %v5722_v10, %v6523_v16  ;;  %v3290_v4 = vrot.slane %v5722_v10, %v6130_v31  ;;  %v6563_v5 = vmul.f32 %v3278_v61, %v6527_v63  ;;  %v3573_v63 = vld [vmem:[#allocation8 + $0x1208] sm:$0xff]  ;;  %v3596_v61 = vld [vmem:[#allocation8 + $0x12c0] sm:$0xff]  ;;  %v3599_v10 = vld [vmem:[#allocation8 + $0x12d8] sm:$0xff] }
 0xc17   :  { %v6570_v8 = vmul.f32 %v3302_v3, %v6530_v18  ;;  %v3575_v18 = vld [vmem:[#allocation8 + $0x1218] sm:$0xff]  ;;  %v3598_v3 = vld [vmem:[#allocation8 + $0x12d0] sm:$0xff] }
 0xc18   :  { %v6566_v21 = vmul.f32 %v3290_v4, %v6534_v45  ;;  %v3312_v24 = vmul.f32 %v3310_v59, %v6563_v5  ;;  %v3576_v45 = vld [vmem:[#allocation8 + $0x1220] sm:$0xff]  ;;  %v5440_v25 = vpack.c.bf16 %v3575_v18, %v3572_v39  ;;  %v5456_v4 = vpack.c.bf16 %v3599_v10, %v3596_v61  ;;  %v3601_v59 = vld [vmem:[#allocation8 + $0x12e8] sm:$0xff]  ;;  %v3556_v10 = vpop.permute.xlu0 %3555 }
 0xc19   :  { %v3322_v16 = vmul.f32 %v3320_v37, %v6570_v8  ;;  %v5438_v27 = vpack.c.bf16 %v3576_v45, %v3573_v63  ;;  %v3603_v37 = vld [vmem:[#allocation8 + $0x12f8] sm:$0xff]  ;;  %v3604_v63 = vld [vmem:[#allocation8 + $0x1300] sm:$0xff]  ;;  %v3609_v18 = vld [vmem:[#allocation8 + $0x1328] sm:$0xff] }
 0xc1a   :  { %v3317_v26 = vmul.f32 %v3315_v44, %v6566_v21  ;;  %v3600_v44 = vld [vmem:[#allocation8 + $0x12e0] sm:$0xff] }
 0xc1b   :  { %5439 = vmatprep.subr.bf16.mxu1 %v5438_v27  ;;  %v5454_v50 = vpack.c.bf16 %v3600_v44, %v3597_v55  ;;  %v3607_v27 = vld [vmem:[#allocation8 + $0x1318] sm:$0xff] }
 0xc1c   :  { %v3323_v12 = vadd.f32 %v3317_v26, %v3312_v24  ;;  %v5483_v24 = vpack.c.bf16 %v3601_v59, %v3598_v3  ;;  %v3606_v26 = vld [vmem:[#allocation8 + $0x1310] sm:$0xff]  ;;  %v5486_v39 = vpack.c.bf16 %v3607_v27, %v3604_v63 }
 0xc1e   :  { %v3324_v34 = vadd.f32 %v3323_v12, %v3322_v16  ;;  %v5458_v12 = vpack.c.bf16 %v3606_v26, %v3603_v37  ;;  %v3602_v16 = vld [vmem:[#allocation8 + $0x12f0] sm:$0xff]  ;;  %v3561_v26 = vpop.permute.xlu1 %3560 }
 0xc20   :  { %3439 = vmatmul.mubr.f32.vlgmr.msra.gmra.mrb[22].mxu1 %v3324_v34  ;;  %4685 = vmatmul.mubr.f32.vlgmr.msra.gmra.mrb[28].mxu0 %v3324_v34  ;;  %v3605_v34 = vld [vmem:[#allocation8 + $0x1308] sm:$0xff] }
 0xc21   :  { %3684 = vmatprep.mubr.f32.mxu1 %v5900_v0  ;;  %4719 = vmatprep.mubr.msk.f32.mxu0 %vm5901_vm0, %v5900_v0  ;;  %v5460_v45 = vpack.c.bf16 %v3605_v34, %v3602_v16  ;;  %v3566_v34 = vpop.permute.xlu0 %3565 }
 0xc22   :  { %5441 = vmatpush1.bf16.msra.mxu1 %v5440_v25  ;;  %5472 = vmatpush3.bf16.msra.mxu0 %v5471_v19  ;;  %v5462_v25 = vpack.c.bf16 %v3612_v42, %v3609_v18  ;;  %v3611_v19 = vld [vmem:[#allocation8 + $0x1338] sm:$0xff] }
 0xc23   :  { %5473 = vmatprep.subr.bf16.mxu0 %v5904_v7  ;;  %5443 = vmatprep.subr.bf16.mxu1 %v5442_v47  ;;  %v5464_v23 = vpack.c.bf16 %v3611_v19, %v3608_v53  ;;  %v3613_v47 = vld [vmem:[#allocation8 + $0x1348] sm:$0xff]  ;;  %v3803_v18 = vld [vmem:[%s6684_s6 + $0x20] sm:$0xff]  ;;  %v3804_v42 = vld [vmem:[%s6684_s6 + $0x28] sm:$0xff] }
 0xc24   :  { %v5489_v43 = vpack.c.bf16 %v3613_v47, %v3610_v40  ;;  %v3805_v53 = vld [vmem:[%s6684_s6 + $0x30] sm:$0xff]  ;;  %v3806_v19 = vld [vmem:[%s6684_s6 + $0x38] sm:$0xff]  ;;  %v3808_v47 = vld [vmem:[%s6684_s6 + $0x48] sm:$0xff] }
 0xc25   :  { %v5504_v40 = vpack.c.bf16 %v3806_v19, %v3805_v53 }
 0xc26   :  { %5445 = vmatpush1.bf16.msra.mxu1 %v5444_v15  ;;  %5475 = vmatpush3.bf16.msra.mxu0 %v5474_v60  ;;  %v5466_v15 = vpack.c.bf16 %v3618_v17, %v3615_v58  ;;  %v3617_v60 = vld [vmem:[#allocation8 + $0x1368] sm:$0xff] }
 0xc27   :  { %5476 = vmatprep.subr.bf16.mxu0 %v5904_v7  ;;  %5447 = vmatprep.subr.bf16.mxu1 %v5446_v62  ;;  %v5468_v22 = vpack.c.bf16 %v3617_v60, %v3614_v9  ;;  %v3619_v62 = vld [vmem:[#allocation8 + $0x1378] sm:$0xff]  ;;  %v3809_v58 = vld [vmem:[%s6684_s6 + $0x50] sm:$0xff]  ;;  %v3810_v17 = vld [vmem:[%s6684_s6 + $0x58] sm:$0xff] }
 0xc28   :  { %v5492_v32 = vpack.c.bf16 %v3619_v62, %v3616_v56  ;;  %v3811_v9 = vld [vmem:[%s6684_s6 + $0x60] sm:$0xff]  ;;  %v3812_v60 = vld [vmem:[%s6684_s6 + $0x68] sm:$0xff]  ;;  %v3813_v56 = vld [vmem:[%s6684_s6 + $0x70] sm:$0xff] }
 0xc29   :  { %v3814_v62 = vld [vmem:[%s6684_s6 + $0x78] sm:$0xff] }
 0xc2a   :  { %5449 = vmatpush1.bf16.msra.mxu1 %v5448_v51  ;;  %5478 = vmatpush3.bf16.msra.mxu0 %v5477_v28 }
 0xc2b   :  { %5479 = vmatprep.subr.bf16.mxu0 %v5904_v7  ;;  %5451 = vmatprep.subr.bf16.mxu1 %v5450_v57 }
 0xc2e   :  { %5453 = vmatpush1.bf16.msra.mxu1 %v5452_v20  ;;  %5481 = vmatpush3.bf16.msra.mxu0 %v5480_v54 }
 0xc2f   :  { %5482 = vmatprep.subr.bf16.mxu0 %v5904_v7  ;;  %5455 = vmatprep.subr.bf16.mxu1 %v5454_v50 }
 0xc32   :  { %5457 = vmatpush1.bf16.msra.mxu1 %v5456_v4  ;;  %5484 = vmatpush3.bf16.msra.mxu0 %v5483_v24 }
 0xc33   :  { %5485 = vmatprep.subr.bf16.mxu0 %v5904_v7  ;;  %5459 = vmatprep.subr.bf16.mxu1 %v5458_v12 }
 0xc36   :  { %5461 = vmatpush1.bf16.msra.mxu1 %v5460_v45  ;;  %5487 = vmatpush3.bf16.msra.mxu0 %v5486_v39 }
 0xc37   :  { %5488 = vmatprep.subr.bf16.mxu0 %v5904_v7  ;;  %5463 = vmatprep.subr.bf16.mxu1 %v5462_v25  ;;  %v5501_v25 = vpack.c.bf16 %v3804_v42, %v3803_v18 }
 0xc3a   :  { %5465 = vmatpush1.bf16.msra.mxu1 %v5464_v23  ;;  %5490 = vmatpush3.bf16.msra.mxu0 %v5489_v43  ;;  %v3807_v23 = vld [vmem:[%s6684_s6 + $0x40] sm:$0xff] }
 0xc3b   :  { %5491 = vmatprep.subr.bf16.mxu0 %v5904_v7  ;;  %5467 = vmatprep.subr.bf16.mxu1 %v5466_v15  ;;  %v5507_v43 = vpack.c.bf16 %v3808_v47, %v3807_v23  ;;  %v5510_v15 = vpack.c.bf16 %v3810_v17, %v3809_v58 }
 0xc3e   :  { %5469 = vmatpush1.bf16.msra.mxu1 %v5468_v22  ;;  %5493 = vmatpush3.bf16.msra.mxu0 %v5492_v32  ;;  %v5513_v22 = vpack.c.bf16 %v3812_v60, %v3811_v9  ;;  %v5516_v32 = vpack.c.bf16 %v3814_v62, %v3813_v56 }
 0xc3f   :  { %5494 = vmatprep.subr.bf16.mxu1 %v5904_v7 }
 0xcf3   :  { %v3440_v1 = vpop.f32.mrb[22].mxu1  ;;  %v3511_v49 = vpop.f32.mrb[28].mxu0 }
 0xcf4   :  { %v3969_v51 = vmul.f32 -1.442695, %v3440_v1  ;;  %v3971_v41 = vmul.f32 -1.442695, %v3511_v49  ;;  %v3442_v28 = vpop.f32.mrb[23].mxu1  ;;  %v4686_v2 = vpop.f32.mrb[29].mxu0 }
 0xcf5   :  { %v3970_v14 = vmul.f32 -1.442695, %v3442_v28 }
 0xcf6   :  { %5723 = vpow2.f32 %v3969_v51 }
 0xcf7   :  { %5725 = vpow2.f32 %v3971_v41 }
 0xcf8   :  { %5727 = vpow2.f32 %v3970_v14 }
 0xd00   :  { %v5724_v57 = vpop.eup %5723 }
 0xd01   :  { %v5726_v36 = vpop.eup %5725  ;;  %v3518_v33 = vadd.f32 1.0, %v5724_v57 }
 0xd02   :  { %v5728_v35 = vpop.eup %5727  ;;  %v3542_v20 = vadd.f32 1.0, %v5726_v36 }
 0xd03   :  { %5729 = vrcp.f32 %v3518_v33  ;;  %v3530_v6 = vadd.f32 1.0, %v5728_v35 }
 0xd04   :  { %5731 = vrcp.f32 %v3542_v20 }
 0xd05   :  { %5733 = vrcp.f32 %v3530_v6 }
 0xd0d   :  { %v5730_v54 = vpop.eup %5729 }
 0xd0e   :  { %v5732_v55 = vpop.eup %5731  ;;  %v6586_v44 = vmul.f32 %v5730_v54, %v6551_v38  ;;  %v3524_v50 = vrot.slane %v5730_v54, %v6126_v29 }
 0xd0f   :  { %v5734_v61 = vpop.eup %5733  ;;  %v6590_v3 = vmul.f32 %v5732_v55, %v6555_v11  ;;  %v3548_v4 = vrot.slane %v5732_v55, %v6128_v30 }
 0xd10   :  { %v6594_v59 = vmul.f32 %v5734_v61, %v6559_v13  ;;  %v3525_v24 = vmul.f32 %v3524_v50, %v6563_v5  ;;  %v3536_v37 = vrot.slane %v5734_v61, %v6130_v31  ;;  %v3799_v13 = vld [vmem:[%s6684_s6] sm:$0xff]  ;;  %v3800_v5 = vld [vmem:[%s6684_s6 + $0x8] sm:$0xff] }
 0xd11   :  { %v3549_v38 = vmul.f32 %v3548_v4, %v6570_v8  ;;  %v3801_v8 = vld [vmem:[%s6684_s6 + $0x10] sm:$0xff] }
 0xd12   :  { %v3537_v12 = vmul.f32 %v3536_v37, %v6566_v21  ;;  %v3558_v16 = vmul.f32 %v3556_v10, %v3525_v24  ;;  %v5495_v21 = vpack.c.bf16 %v3800_v5, %v3799_v13 }
 0xd13   :  { %v3568_v45 = vmul.f32 %v3566_v34, %v3549_v38 }
 0xd14   :  { %v3563_v63 = vmul.f32 %v3561_v26, %v3537_v12 }
 0xd16   :  { %v3569_v11 = vadd.f32 %v3563_v63, %v3558_v16 }
 0xd18   :  { %v3570_v27 = vadd.f32 %v3569_v11, %v3568_v45 }
 0xd1a   :  { %3685 = vmatmul.mubr.f32.vlgmr.msra.gmra.mrb[24].mxu1 %v3570_v27  ;;  %4720 = vmatmul.mubr.f32.vlgmr.msra.gmra.mrb[30].mxu0 %v3570_v27 }
 0xd1b   :  { %4754 = vmatprep.mubr.msk.f32.mxu1 %vm5901_vm0, %v5900_v0  ;;  %5496 = vmatpush3.bf16.msra.mxu1 %v5495_v21  ;;  %v3802_v0 = vld [vmem:[%s6684_s6 + $0x18] sm:$0xff]  ;;  %s5909_s6 = smov [#allocation11]  }
 0xd1c   :  { %5497 = vmatprep.subr.bf16.mxu1 %v5904_v7  ;;  %v5498_v39 = vpack.c.bf16 %v3802_v0, %v3801_v8  ;;  %s3906_s27 = sshll.u32 %s5909_s6, 4  ;;  %s3907_s27 = int_to_ptr.vmem [resolvable:$true] %s3906_s27 }
 0xd1d   :  { %s5861_s29 = scalar_lea.vmem %s3907_s27, 64  ;;  %p5866_p13 = scmp.lt.s32.totalorder %s3907_s27, %s3907_s27 }
 0xd1e   :  { %p5862_p12 = scmp.ne.s32.totalorder %s3907_s27, %s5861_s29  ;;  %p5867_p0 = scmp.lt.s32.totalorder %s5861_s29, %s5861_s29 }
 0xd1f   :  { %5499 = vmatpush3.bf16.msra.mxu1 %v5498_v39 }
 0xd20   :  { %5500 = vmatprep.subr.bf16.mxu1 %v5904_v7  ;;  %p5868_p1 = por %p5867_p0, %p5866_p13 }
 0xd22   :  { %p5869_p2 = pnand %p5868_p1, %p5862_p12 }
 0xd23   :  { %5502 = vmatpush3.bf16.msra.mxu1 %v5501_v25 }
 0xd24   :  { %5503 = vmatprep.subr.bf16.mxu1 %v5904_v7 }
 0xd27   :  { %5505 = vmatpush3.bf16.msra.mxu1 %v5504_v40 }
 0xd28   :  { %5506 = vmatprep.subr.bf16.mxu1 %v5904_v7 }
 0xd2b   :  { %5508 = vmatpush3.bf16.msra.mxu1 %v5507_v43 }
 0xd2c   :  { %5509 = vmatprep.subr.bf16.mxu1 %v5904_v7 }
 0xd2f   :  { %5511 = vmatpush3.bf16.msra.mxu1 %v5510_v15 }
 0xd30   :  { %5512 = vmatprep.subr.bf16.mxu1 %v5904_v7 }
 0xd33   :  { %5514 = vmatpush3.bf16.msra.mxu1 %v5513_v22 }
 0xd34   :  { %5515 = vmatprep.subr.bf16.mxu1 %v5904_v7 }
 0xd37   :  { %5517 = vmatpush3.bf16.msra.mxu1 %v5516_v32 }
 0xded   :  { %v3686_v1 = vpop.f32.mrb[24].mxu1  ;;  %v3757_v49 = vpop.f32.mrb[30].mxu0 }
 0xdee   :  { %v3973_v51 = vmul.f32 -1.442695, %v3686_v1  ;;  %v3975_v41 = vmul.f32 -1.442695, %v3757_v49  ;;  %v3688_v28 = vpop.f32.mrb[25].mxu1  ;;  %v4721_v2 = vpop.f32.mrb[31].mxu0 }
 0xdef   :  { %v3974_v14 = vmul.f32 -1.442695, %v3688_v28 }
 0xdf0   :  { %5735 = vpow2.f32 %v3973_v51 }
 0xdf1   :  { %5737 = vpow2.f32 %v3975_v41 }
 0xdf2   :  { %5739 = vpow2.f32 %v3974_v14 }
 0xdfa   :  { %v5736_v57 = vpop.eup %5735 }
 0xdfb   :  { %v5738_v36 = vpop.eup %5737  ;;  %v3764_v33 = vadd.f32 1.0, %v5736_v57 }
 0xdfc   :  { %v5740_v35 = vpop.eup %5739  ;;  %v3778_v20 = vadd.f32 1.0, %v5738_v36 }
 0xdfd   :  { %5741 = vrcp.f32 %v3764_v33  ;;  %v3771_v6 = vadd.f32 1.0, %v5740_v35 }
 0xdfe   :  { %5743 = vrcp.f32 %v3778_v20 }
 0xdff   :  { %5745 = vrcp.f32 %v3771_v6 }
 0xe07   :  { %v5742_v7 = vpop.eup %5741 }
 0xe08   :  { %v5744_v54 = vpop.eup %5743  ;;  %v3767_v55 = vmul.f32 %v5742_v7, %v6586_v44  ;;  %v3976_v44 = vld [vmem:[#allocation10] ss:$0 sm:$0xff] }
 0xe09   :  { %v5746_v50 = vpop.eup %5745  ;;  %v3781_v61 = vmul.f32 %v5744_v54, %v6590_v3 }
 0xe0a   :  { %v3774_v10 = vmul.f32 %v5746_v50, %v6594_v59  ;;  %v3785_v4 = vrot.slane %v3767_v55, %v6126_v29 }
 0xe0b   :  { %v3795_v26 = vrot.slane %v3781_v61, %v6128_v30 }
 0xe0c   :  { %v3786_v24 = vmul.f32 %v6108_v48, %v3785_v4  ;;  %v3790_v37 = vrot.slane %v3774_v10, %v6130_v31 }
 0xe0d   :  { %v3796_v12 = vmul.f32 %v6112_v52, %v3795_v26 }
 0xe0e   :  { %v3791_v38 = vmul.f32 %v6106_v46, %v3790_v37 }
 0xe10   :  { %v3797_v16 = vadd.f32 %v3791_v38, %v3786_v24 }
 0xe12   :  { %v3798_v34 = vadd.f32 %v3797_v16, %v3796_v12 }
 0xe14   :  { %4755 = vmatmul.mubr.f32.vlgmr.msra.gmra.mrb[26].mxu1 %v3798_v34 }
 0xee7   :  { %v3888_v63 = vpop.f32.mrb[26].mxu1 }
 0xee8   :  { %v3889_v3 = vadd.f32 %v3976_v44, %v3888_v63  ;;  %v4756_v45 = vpop.f32.mrb[27].mxu1 }
 0xeea   :  { %v3977_v59 = vmul.f32 -1.442695, %v3889_v3 }
 0xeec   :  { %5747 = vpow2.f32 %v3977_v59 }
 0xef6   :  { %v5748_v29 = vpop.eup %5747 }
 0xef7   :  { %v3895_v11 = vadd.f32 1.0, %v5748_v29 }
 0xef9   :  { %5749 = vrcp.f32 %v3895_v11 }
 0xf03   :  { %v5750_v48 = vpop.eup %5749 }
 0xf04   :  { %3899 = vst.msk [vmem:[#allocation11] sm:$0xf] %vm3898_vm3, %v5750_v48 }
 0xf05   :  { %5872 = shalt.err (!%p5869_p2)
}
 0xf06   :  { %s5873_s28 = scalar_lea.hbm %s6686_s8, 64 }
 0xf07   :  { %p5874_p3 = scmp.ne.s32.totalorder %s6686_s8, %s5873_s28  ;;  %p5877_p4 = scmp.lt.u32.totalorder %s5873_s28, %s6686_s8 }
 0xf09   :  { %p5879_p5 = pnand %p5877_p4, %p5874_p3 }
 0xf0b   :  { %5882 = shalt.err (!%p5879_p5)
}
 0xf0c   :  { %3909 = dma.vmem_to_hbm [thread:$0]  %s3907_s27, 64, %s6686_s8, [#allocation4]  }
 0xf0d   :  { %5889 = dma.done.wait [#allocation4], 64  }
 0xf0e   :  { %5890 = vsyncadd [#allocation4], 4294967232 }
 0xf0f   :  { %3913 = vsyncpa [#allocation3], 1 }
 0xf10   :  { %3914 = vsyncpa [#allocation6], 1 }
 0xf11   :  { %3915 = vsyncpa [#allocation9], 1 }
 0xf12   :  { %3916 = vsyncpa [#allocation4], 1 }

</bundles_post_ra>
